<compile_context>
chip_gen: v7x
topology: tpu7x:2x2x1
jax: 0.10.0
libtpu: 0.0.40
codegen_flags: <defaults>
</compile_context>

<pallas_src>
import math

import jax
import jax.numpy as jnp
from jax.experimental import pallas as pl
from jax.experimental.pallas import tpu as pltpu


def _round_up(n, m):
    return ((n + m - 1) // m) * m


# ------------------------------ fused kernel -------------------------------- #

def _make_fused_kernel(num_conv_layers):
    """Refs: x (TB, lane) f32, w (NL+1, lane, lane) bf16, b (NL+1, 1, lane) f32, out."""

    def kernel(x_ref, w_ref, b_ref, out_ref):
        h = x_ref[...]                                     # (TB, lane) f32

        # 12 Conv+BN+ReLU stages, statically unrolled.  One bf16 MXU matmul
        # per stage on the lane-dense flat activation + folded bias + ReLU.
        for i in range(num_conv_layers):
            z = jnp.dot(h.astype(jnp.bfloat16), w_ref[i],
                        preferred_element_type=jnp.float32)
            h = jnp.maximum(z + b_ref[i], 0.0)

        # Linear (channel-major Flatten folded into the weight rows) + Softplus.
        z = jnp.dot(h.astype(jnp.bfloat16), w_ref[num_conv_layers],
                    preferred_element_type=jnp.float32) + b_ref[num_conv_layers]
        # numerically stable softplus: max(z,0) + log(1 + exp(-|z|))
        out_ref[...] = jnp.maximum(z, 0.0) + jnp.log(1.0 + jnp.exp(-jnp.abs(z)))

    return kernel


# ------------------------------- wrapper ------------------------------------ #

def autoencoder_forward(params, x1, x2, *, block_b=128):
    w_slab = params["w"]                     # (NL+1, lane, lane) bf16
    b_slab = params["b"]                     # (NL+1, 1, lane) f32
    n_layers = w_slab.shape[0]
    n_conv = n_layers - 1
    lane = w_slab.shape[-1]

    B, L = x1.shape
    # Interleave x1/x2 l-major (x1[l], x2[l], ...) == torch cat on channel dim
    # in the flat (l-major, c-minor) layout, then zero-pad to the lane width.
    x = jnp.stack([x1.astype(jnp.float32), x2.astype(jnp.float32)],
                  axis=-1).reshape(B, 2 * L)
    x = jnp.pad(x, ((0, 0), (0, lane - 2 * L)))

    tb = min(block_b, _round_up(B, 8))
    b_pad = _round_up(B, tb)
    if b_pad != B:
        x = jnp.pad(x, ((0, b_pad - B), (0, 0)))

    out = pl.pallas_call(
        _make_fused_kernel(n_conv),
        out_shape=jax.ShapeDtypeStruct((b_pad, lane), jnp.float32),
        grid=(b_pad // tb,),
        in_specs=[
            # activations: tiled over the batch axis
            pl.BlockSpec((tb, lane), lambda b: (b, 0)),
            # parameter slabs: constant block index -> fetched once, kept
            # VMEM-resident across all batch tiles.
            pl.BlockSpec(w_slab.shape, lambda b: (0, 0, 0)),
            pl.BlockSpec(b_slab.shape, lambda b: (0, 0, 0)),
        ],
        out_specs=pl.BlockSpec((tb, lane), lambda b: (b, 0)),
        compiler_params=pltpu.CompilerParams(
            dimension_semantics=("parallel",)),
    )(x, w_slab, b_slab)

    return out[:B, :L]


# --------------------------- parameter creation ------------------------------ #

def make_params(key, input_size, D1, D2, D3, D4, D5, D6):
    L = input_size
    eps = 1e-5
    # encoder: 2->D1->D2->D3->D4->D5->D6 ; decoder convs: D6->D5->D4->D3->D2->D1->D1
    dims = [(2, D1), (D1, D2), (D2, D3), (D3, D4), (D4, D5), (D5, D6),
            (D6, D5), (D5, D4), (D4, D3), (D3, D2), (D2, D1), (D1, D1)]

    widths = [L * c for pair in dims for c in pair] + [L * D1, L]
    lane = _round_up(max(widths), 128)

    def block_toeplitz(w_kio, cin, cout):
        """(3, Cin, Cout) taps -> (L*Cin, L*Cout) matrix, zero padding=1 baked in.

        T[l*Cin + ci, m*Cout + co] = w[k = l - m + 1, ci, co] for |l - m| <= 1.
        """
        lpos = jnp.arange(L)[:, None]           # input position (rows)
        mpos = jnp.arange(L)[None, :]           # output position (cols)
        k = lpos - mpos + 1
        valid = ((k >= 0) & (k <= 2)).astype(jnp.float32)
        taps = w_kio[jnp.clip(k, 0, 2)] * valid[:, :, None, None]   # (L, L, Cin, Cout)
        return jnp.transpose(taps, (0, 2, 1, 3)).reshape(L * cin, L * cout)

    w_blocks, b_rows, raw_convs = [], [], []
    for cin, cout in dims:
        key, k1, k2 = jax.random.split(key, 3)
        bound = 1.0 / math.sqrt(cin * 3.0)                 # PyTorch Conv1d default range
        w_torch = jax.random.uniform(k1, (cout, cin, 3), jnp.float32, -bound, bound)
        b = jax.random.uniform(k2, (cout,), jnp.float32, -bound, bound)
        # BatchNorm1d (eval-mode, identity stats) folded into scale/shift.
        gamma = jnp.ones((cout,), jnp.float32)
        beta = jnp.zeros((cout,), jnp.float32)
        mean = jnp.zeros((cout,), jnp.float32)
        var = jnp.ones((cout,), jnp.float32)
        scale = gamma / jnp.sqrt(var + eps)
        shift = (b - mean) * scale + beta
        w_kio = jnp.transpose(w_torch, (2, 1, 0)) * scale[None, None, :]
        # Quantize the effective taps to bf16 (exactly what the kernel stores),
        # so the pure-JAX reference uses identical effective weights.
        w_kio = w_kio.astype(jnp.bfloat16).astype(jnp.float32)
        raw_convs.append((w_kio, shift))

        T = block_toeplitz(w_kio, cin, cout)
        Tp = jnp.zeros((lane, lane), jnp.float32).at[:L * cin, :L * cout].set(T)
        bp = jnp.zeros((lane,), jnp.float32).at[:L * cout].set(jnp.tile(shift, L))
        w_blocks.append(Tp)
        b_rows.append(bp)

    # Linear(D1*L -> L); fold the torch channel-major Flatten ((B,C,L)->(B,C*L))
    # into a row permutation so the kernel consumes the l-major flat activation.
    key, k1, k2 = jax.random.split(key, 3)
    F = D1 * L
    bound = 1.0 / math.sqrt(float(F))                      # PyTorch Linear default range
    lin_w_torch = jax.random.uniform(k1, (L, F), jnp.float32, -bound, bound)
    lin_w_torch = lin_w_torch.astype(jnp.bfloat16).astype(jnp.float32)
    lin_b = jax.random.uniform(k2, (L,), jnp.float32, -bound, bound)
    perm = (jnp.arange(L)[:, None] + L * jnp.arange(D1)[None, :]).reshape(-1)
    lin_w = lin_w_torch.T[perm, :]                         # (F, L) rows in l-major/c-minor order
    Wp = jnp.zeros((lane, lane), jnp.float32).at[:F, :L].set(lin_w)
    bp = jnp.zeros((lane,), jnp.float32).at[:L].set(lin_b)
    w_blocks.append(Wp)
    b_rows.append(bp)

    w_slab = jnp.stack(w_blocks).astype(jnp.bfloat16)      # (13, lane, lane) bf16
    b_slab = jnp.stack(b_rows)[:, None, :]                 # (13, 1, lane) f32

    params = {"w": w_slab, "b": b_slab}
    raw = {"convs": raw_convs, "lin_wT": lin_w_torch.T, "lin_b": lin_b}
    return params, raw


# --------------------------- pure-JAX reference ------------------------------ #

def reference_forward(raw, x1, x2):
    """Independent per-tap conv formulation; mirrors the kernel's bf16 cast points."""
    hp = jax.lax.Precision.HIGHEST
    x = jnp.stack([x1, x2], axis=-1).astype(jnp.float32)   # (B, L, C) channels-last
    L = x.shape[1]
    for w_kio, shift in raw["convs"]:                      # (3, Cin, Cout), BN folded
        xq = x.astype(jnp.bfloat16).astype(jnp.float32)
        xp = jnp.pad(xq, ((0, 0), (1, 1), (0, 0)))
        y = sum(jnp.einsum("blc,cd->bld", xp[:, k:k + L, :], w_kio[k], precision=hp)
                for k in range(3))
        x = jax.nn.relu(y + shift[None, None, :])
    B, _, C = x.shape
    flat = jnp.transpose(x, (0, 2, 1)).reshape(B, C * L)   # torch channel-major flatten
    flat = flat.astype(jnp.bfloat16).astype(jnp.float32)
    z = jnp.dot(flat, raw["lin_wT"], precision=hp) + raw["lin_b"]
    return jax.nn.softplus(z)


if __name__ == "__main__":
    input_size = 16
    D1, D2, D3, D4, D5, D6 = 16, 16, 8, 8, 8, 8
    B = 256     # batch >= 128 so the MXU M dimension is filled; tiled at 128 rows

    key = jax.random.PRNGKey(0)
    kp, kx1, kx2 = jax.random.split(key, 3)
    params, raw = make_params(kp, input_size, D1, D2, D3, D4, D5, D6)
    x1 = jax.random.normal(kx1, (B, input_size), jnp.float32)
    x2 = jax.random.normal(kx2, (B, input_size), jnp.float32)

    fwd = jax.jit(autoencoder_forward)
    out = jax.block_until_ready(fwd(params, x1, x2))

    assert out.shape == (B, input_size), out.shape
    assert bool(jnp.all(jnp.isfinite(out)))

    # Cross-check the fused kernel against the independent pure-JAX formulation.
    ref = reference_forward(raw, x1, x2)
    max_err = float(jnp.max(jnp.abs(out - ref)))
    assert bool(jnp.allclose(out, ref, atol=2e-3, rtol=2e-3)), max_err

    print("KERNEL_OK")
</pallas_src>

<mosaic_0001>
module attributes {stable_mosaic.version = 11 : i64} {
  func.func @kernel(%arg0: i32, %arg1: memref<128x256xf32, #tpu.memory_space<vmem>>, %arg2: memref<13x256x256xbf16, #tpu.memory_space<vmem>>, %arg3: memref<13x1x256xf32, #tpu.memory_space<vmem>>, %arg4: memref<128x256xf32, #tpu.memory_space<vmem>>) attributes {dimension_semantics = [#tpu.dimension_semantics<parallel>], iteration_bounds = array<i64: 2>, scalar_prefetch = 0 : i64, scratch_operands = 0 : i64, tpu.core_type = #tpu.core_type<tc>, window_params = [{transform_indices = @transform_0, window_bounds = array<i64: 128, 256>}, {pipeline_mode = #tpu.pipeline_mode<synchronous>, transform_indices = @transform_1, window_bounds = array<i64: 13, 256, 256>}, {pipeline_mode = #tpu.pipeline_mode<synchronous>, transform_indices = @transform_2, window_bounds = array<i64: 13, 1, 256>}, {transform_indices = @transform_3, window_bounds = array<i64: 128, 256>}]} {
    %c0 = arith.constant 0 : index
    %c0_0 = arith.constant 0 : index
    %0 = vector.load %arg1[%c0, %c0_0] : memref<128x256xf32, #tpu.memory_space<vmem>>, vector<128x256xf32>
    %1 = arith.truncf %0 : vector<128x256xf32> to vector<128x256xbf16>
    %c0_1 = arith.constant 0 : index
    %c0_2 = arith.constant 0 : index
    %c0_3 = arith.constant 0 : index
    %2 = vector.load %arg2[%c0_1, %c0_2, %c0_3] : memref<13x256x256xbf16, #tpu.memory_space<vmem>>, vector<1x256x256xbf16>
    %3 = vector.shape_cast %2 : vector<1x256x256xbf16> to vector<256x256xbf16>
    %cst = arith.constant dense<0.000000e+00> : vector<128x256xf32>
    %4 = tpu.matmul %1, %3, %cst {dimension_numbers = #tpu.dot_dimension_numbers<[1], [0], [0], [1], [0, 0, 1, 1], [], []>} : vector<128x256xbf16>, vector<256x256xbf16>, vector<128x256xf32> -> vector<128x256xf32>
    %c0_4 = arith.constant 0 : index
    %c0_5 = arith.constant 0 : index
    %c0_6 = arith.constant 0 : index
    %5 = vector.load %arg3[%c0_4, %c0_5, %c0_6] : memref<13x1x256xf32, #tpu.memory_space<vmem>>, vector<1x1x256xf32>
    %6 = vector.shape_cast %5 : vector<1x1x256xf32> to vector<1x256xf32>
    %7 = vector.broadcast %6 : vector<1x256xf32> to vector<128x256xf32>
    %8 = arith.addf %4, %7 : vector<128x256xf32>
    %cst_7 = arith.constant 0.000000e+00 : f32
    %9 = vector.broadcast %cst_7 : f32 to vector<128x256xf32>
    %10 = arith.maximumf %8, %9 : vector<128x256xf32>
    %11 = arith.truncf %10 : vector<128x256xf32> to vector<128x256xbf16>
    %c1 = arith.constant 1 : index
    %c0_8 = arith.constant 0 : index
    %c0_9 = arith.constant 0 : index
    %12 = vector.load %arg2[%c1, %c0_8, %c0_9] : memref<13x256x256xbf16, #tpu.memory_space<vmem>>, vector<1x256x256xbf16>
    %13 = vector.shape_cast %12 : vector<1x256x256xbf16> to vector<256x256xbf16>
    %cst_10 = arith.constant dense<0.000000e+00> : vector<128x256xf32>
    %14 = tpu.matmul %11, %13, %cst_10 {dimension_numbers = #tpu.dot_dimension_numbers<[1], [0], [0], [1], [0, 0, 1, 1], [], []>} : vector<128x256xbf16>, vector<256x256xbf16>, vector<128x256xf32> -> vector<128x256xf32>
    %c1_11 = arith.constant 1 : index
    %c0_12 = arith.constant 0 : index
    %c0_13 = arith.constant 0 : index
    %15 = vector.load %arg3[%c1_11, %c0_12, %c0_13] : memref<13x1x256xf32, #tpu.memory_space<vmem>>, vector<1x1x256xf32>
    %16 = vector.shape_cast %15 : vector<1x1x256xf32> to vector<1x256xf32>
    %17 = vector.broadcast %16 : vector<1x256xf32> to vector<128x256xf32>
    %18 = arith.addf %14, %17 : vector<128x256xf32>
    %cst_14 = arith.constant 0.000000e+00 : f32
    %19 = vector.broadcast %cst_14 : f32 to vector<128x256xf32>
    %20 = arith.maximumf %18, %19 : vector<128x256xf32>
    %21 = arith.truncf %20 : vector<128x256xf32> to vector<128x256xbf16>
    %c2 = arith.constant 2 : index
    %c0_15 = arith.constant 0 : index
    %c0_16 = arith.constant 0 : index
    %22 = vector.load %arg2[%c2, %c0_15, %c0_16] : memref<13x256x256xbf16, #tpu.memory_space<vmem>>, vector<1x256x256xbf16>
    %23 = vector.shape_cast %22 : vector<1x256x256xbf16> to vector<256x256xbf16>
    %cst_17 = arith.constant dense<0.000000e+00> : vector<128x256xf32>
    %24 = tpu.matmul %21, %23, %cst_17 {dimension_numbers = #tpu.dot_dimension_numbers<[1], [0], [0], [1], [0, 0, 1, 1], [], []>} : vector<128x256xbf16>, vector<256x256xbf16>, vector<128x256xf32> -> vector<128x256xf32>
    %c2_18 = arith.constant 2 : index
    %c0_19 = arith.constant 0 : index
    %c0_20 = arith.constant 0 : index
    %25 = vector.load %arg3[%c2_18, %c0_19, %c0_20] : memref<13x1x256xf32, #tpu.memory_space<vmem>>, vector<1x1x256xf32>
    %26 = vector.shape_cast %25 : vector<1x1x256xf32> to vector<1x256xf32>
    %27 = vector.broadcast %26 : vector<1x256xf32> to vector<128x256xf32>
    %28 = arith.addf %24, %27 : vector<128x256xf32>
    %cst_21 = arith.constant 0.000000e+00 : f32
    %29 = vector.broadcast %cst_21 : f32 to vector<128x256xf32>
    %30 = arith.maximumf %28, %29 : vector<128x256xf32>
    %31 = arith.truncf %30 : vector<128x256xf32> to vector<128x256xbf16>
    %c3 = arith.constant 3 : index
    %c0_22 = arith.constant 0 : index
    %c0_23 = arith.constant 0 : index
    %32 = vector.load %arg2[%c3, %c0_22, %c0_23] : memref<13x256x256xbf16, #tpu.memory_space<vmem>>, vector<1x256x256xbf16>
    %33 = vector.shape_cast %32 : vector<1x256x256xbf16> to vector<256x256xbf16>
    %cst_24 = arith.constant dense<0.000000e+00> : vector<128x256xf32>
    %34 = tpu.matmul %31, %33, %cst_24 {dimension_numbers = #tpu.dot_dimension_numbers<[1], [0], [0], [1], [0, 0, 1, 1], [], []>} : vector<128x256xbf16>, vector<256x256xbf16>, vector<128x256xf32> -> vector<128x256xf32>
    %c3_25 = arith.constant 3 : index
    %c0_26 = arith.constant 0 : index
    %c0_27 = arith.constant 0 : index
    %35 = vector.load %arg3[%c3_25, %c0_26, %c0_27] : memref<13x1x256xf32, #tpu.memory_space<vmem>>, vector<1x1x256xf32>
    %36 = vector.shape_cast %35 : vector<1x1x256xf32> to vector<1x256xf32>
    %37 = vector.broadcast %36 : vector<1x256xf32> to vector<128x256xf32>
    %38 = arith.addf %34, %37 : vector<128x256xf32>
    %cst_28 = arith.constant 0.000000e+00 : f32
    %39 = vector.broadcast %cst_28 : f32 to vector<128x256xf32>
    %40 = arith.maximumf %38, %39 : vector<128x256xf32>
    %41 = arith.truncf %40 : vector<128x256xf32> to vector<128x256xbf16>
    %c4 = arith.constant 4 : index
    %c0_29 = arith.constant 0 : index
    %c0_30 = arith.constant 0 : index
    %42 = vector.load %arg2[%c4, %c0_29, %c0_30] : memref<13x256x256xbf16, #tpu.memory_space<vmem>>, vector<1x256x256xbf16>
    %43 = vector.shape_cast %42 : vector<1x256x256xbf16> to vector<256x256xbf16>
    %cst_31 = arith.constant dense<0.000000e+00> : vector<128x256xf32>
    %44 = tpu.matmul %41, %43, %cst_31 {dimension_numbers = #tpu.dot_dimension_numbers<[1], [0], [0], [1], [0, 0, 1, 1], [], []>} : vector<128x256xbf16>, vector<256x256xbf16>, vector<128x256xf32> -> vector<128x256xf32>
    %c4_32 = arith.constant 4 : index
    %c0_33 = arith.constant 0 : index
    %c0_34 = arith.constant 0 : index
    %45 = vector.load %arg3[%c4_32, %c0_33, %c0_34] : memref<13x1x256xf32, #tpu.memory_space<vmem>>, vector<1x1x256xf32>
    %46 = vector.shape_cast %45 : vector<1x1x256xf32> to vector<1x256xf32>
    %47 = vector.broadcast %46 : vector<1x256xf32> to vector<128x256xf32>
    %48 = arith.addf %44, %47 : vector<128x256xf32>
    %cst_35 = arith.constant 0.000000e+00 : f32
    %49 = vector.broadcast %cst_35 : f32 to vector<128x256xf32>
    %50 = arith.maximumf %48, %49 : vector<128x256xf32>
    %51 = arith.truncf %50 : vector<128x256xf32> to vector<128x256xbf16>
    %c5 = arith.constant 5 : index
    %c0_36 = arith.constant 0 : index
    %c0_37 = arith.constant 0 : index
    %52 = vector.load %arg2[%c5, %c0_36, %c0_37] : memref<13x256x256xbf16, #tpu.memory_space<vmem>>, vector<1x256x256xbf16>
    %53 = vector.shape_cast %52 : vector<1x256x256xbf16> to vector<256x256xbf16>
    %cst_38 = arith.constant dense<0.000000e+00> : vector<128x256xf32>
    %54 = tpu.matmul %51, %53, %cst_38 {dimension_numbers = #tpu.dot_dimension_numbers<[1], [0], [0], [1], [0, 0, 1, 1], [], []>} : vector<128x256xbf16>, vector<256x256xbf16>, vector<128x256xf32> -> vector<128x256xf32>
    %c5_39 = arith.constant 5 : index
    %c0_40 = arith.constant 0 : index
    %c0_41 = arith.constant 0 : index
    %55 = vector.load %arg3[%c5_39, %c0_40, %c0_41] : memref<13x1x256xf32, #tpu.memory_space<vmem>>, vector<1x1x256xf32>
    %56 = vector.shape_cast %55 : vector<1x1x256xf32> to vector<1x256xf32>
    %57 = vector.broadcast %56 : vector<1x256xf32> to vector<128x256xf32>
    %58 = arith.addf %54, %57 : vector<128x256xf32>
    %cst_42 = arith.constant 0.000000e+00 : f32
    %59 = vector.broadcast %cst_42 : f32 to vector<128x256xf32>
    %60 = arith.maximumf %58, %59 : vector<128x256xf32>
    %61 = arith.truncf %60 : vector<128x256xf32> to vector<128x256xbf16>
    %c6 = arith.constant 6 : index
    %c0_43 = arith.constant 0 : index
    %c0_44 = arith.constant 0 : index
    %62 = vector.load %arg2[%c6, %c0_43, %c0_44] : memref<13x256x256xbf16, #tpu.memory_space<vmem>>, vector<1x256x256xbf16>
    %63 = vector.shape_cast %62 : vector<1x256x256xbf16> to vector<256x256xbf16>
    %cst_45 = arith.constant dense<0.000000e+00> : vector<128x256xf32>
    %64 = tpu.matmul %61, %63, %cst_45 {dimension_numbers = #tpu.dot_dimension_numbers<[1], [0], [0], [1], [0, 0, 1, 1], [], []>} : vector<128x256xbf16>, vector<256x256xbf16>, vector<128x256xf32> -> vector<128x256xf32>
    %c6_46 = arith.constant 6 : index
    %c0_47 = arith.constant 0 : index
    %c0_48 = arith.constant 0 : index
    %65 = vector.load %arg3[%c6_46, %c0_47, %c0_48] : memref<13x1x256xf32, #tpu.memory_space<vmem>>, vector<1x1x256xf32>
    %66 = vector.shape_cast %65 : vector<1x1x256xf32> to vector<1x256xf32>
    %67 = vector.broadcast %66 : vector<1x256xf32> to vector<128x256xf32>
    %68 = arith.addf %64, %67 : vector<128x256xf32>
    %cst_49 = arith.constant 0.000000e+00 : f32
    %69 = vector.broadcast %cst_49 : f32 to vector<128x256xf32>
    %70 = arith.maximumf %68, %69 : vector<128x256xf32>
    %71 = arith.truncf %70 : vector<128x256xf32> to vector<128x256xbf16>
    %c7 = arith.constant 7 : index
    %c0_50 = arith.constant 0 : index
    %c0_51 = arith.constant 0 : index
    %72 = vector.load %arg2[%c7, %c0_50, %c0_51] : memref<13x256x256xbf16, #tpu.memory_space<vmem>>, vector<1x256x256xbf16>
    %73 = vector.shape_cast %72 : vector<1x256x256xbf16> to vector<256x256xbf16>
    %cst_52 = arith.constant dense<0.000000e+00> : vector<128x256xf32>
    %74 = tpu.matmul %71, %73, %cst_52 {dimension_numbers = #tpu.dot_dimension_numbers<[1], [0], [0], [1], [0, 0, 1, 1], [], []>} : vector<128x256xbf16>, vector<256x256xbf16>, vector<128x256xf32> -> vector<128x256xf32>
    %c7_53 = arith.constant 7 : index
    %c0_54 = arith.constant 0 : index
    %c0_55 = arith.constant 0 : index
    %75 = vector.load %arg3[%c7_53, %c0_54, %c0_55] : memref<13x1x256xf32, #tpu.memory_space<vmem>>, vector<1x1x256xf32>
    %76 = vector.shape_cast %75 : vector<1x1x256xf32> to vector<1x256xf32>
    %77 = vector.broadcast %76 : vector<1x256xf32> to vector<128x256xf32>
    %78 = arith.addf %74, %77 : vector<128x256xf32>
    %cst_56 = arith.constant 0.000000e+00 : f32
    %79 = vector.broadcast %cst_56 : f32 to vector<128x256xf32>
    %80 = arith.maximumf %78, %79 : vector<128x256xf32>
    %81 = arith.truncf %80 : vector<128x256xf32> to vector<128x256xbf16>
    %c8 = arith.constant 8 : index
    %c0_57 = arith.constant 0 : index
    %c0_58 = arith.constant 0 : index
    %82 = vector.load %arg2[%c8, %c0_57, %c0_58] : memref<13x256x256xbf16, #tpu.memory_space<vmem>>, vector<1x256x256xbf16>
    %83 = vector.shape_cast %82 : vector<1x256x256xbf16> to vector<256x256xbf16>
    %cst_59 = arith.constant dense<0.000000e+00> : vector<128x256xf32>
    %84 = tpu.matmul %81, %83, %cst_59 {dimension_numbers = #tpu.dot_dimension_numbers<[1], [0], [0], [1], [0, 0, 1, 1], [], []>} : vector<128x256xbf16>, vector<256x256xbf16>, vector<128x256xf32> -> vector<128x256xf32>
    %c8_60 = arith.constant 8 : index
    %c0_61 = arith.constant 0 : index
    %c0_62 = arith.constant 0 : index
    %85 = vector.load %arg3[%c8_60, %c0_61, %c0_62] : memref<13x1x256xf32, #tpu.memory_space<vmem>>, vector<1x1x256xf32>
    %86 = vector.shape_cast %85 : vector<1x1x256xf32> to vector<1x256xf32>
    %87 = vector.broadcast %86 : vector<1x256xf32> to vector<128x256xf32>
    %88 = arith.addf %84, %87 : vector<128x256xf32>
    %cst_63 = arith.constant 0.000000e+00 : f32
    %89 = vector.broadcast %cst_63 : f32 to vector<128x256xf32>
    %90 = arith.maximumf %88, %89 : vector<128x256xf32>
    %91 = arith.truncf %90 : vector<128x256xf32> to vector<128x256xbf16>
    %c9 = arith.constant 9 : index
    %c0_64 = arith.constant 0 : index
    %c0_65 = arith.constant 0 : index
    %92 = vector.load %arg2[%c9, %c0_64, %c0_65] : memref<13x256x256xbf16, #tpu.memory_space<vmem>>, vector<1x256x256xbf16>
    %93 = vector.shape_cast %92 : vector<1x256x256xbf16> to vector<256x256xbf16>
    %cst_66 = arith.constant dense<0.000000e+00> : vector<128x256xf32>
    %94 = tpu.matmul %91, %93, %cst_66 {dimension_numbers = #tpu.dot_dimension_numbers<[1], [0], [0], [1], [0, 0, 1, 1], [], []>} : vector<128x256xbf16>, vector<256x256xbf16>, vector<128x256xf32> -> vector<128x256xf32>
    %c9_67 = arith.constant 9 : index
    %c0_68 = arith.constant 0 : index
    %c0_69 = arith.constant 0 : index
    %95 = vector.load %arg3[%c9_67, %c0_68, %c0_69] : memref<13x1x256xf32, #tpu.memory_space<vmem>>, vector<1x1x256xf32>
    %96 = vector.shape_cast %95 : vector<1x1x256xf32> to vector<1x256xf32>
    %97 = vector.broadcast %96 : vector<1x256xf32> to vector<128x256xf32>
    %98 = arith.addf %94, %97 : vector<128x256xf32>
    %cst_70 = arith.constant 0.000000e+00 : f32
    %99 = vector.broadcast %cst_70 : f32 to vector<128x256xf32>
    %100 = arith.maximumf %98, %99 : vector<128x256xf32>
    %101 = arith.truncf %100 : vector<128x256xf32> to vector<128x256xbf16>
    %c10 = arith.constant 10 : index
    %c0_71 = arith.constant 0 : index
    %c0_72 = arith.constant 0 : index
    %102 = vector.load %arg2[%c10, %c0_71, %c0_72] : memref<13x256x256xbf16, #tpu.memory_space<vmem>>, vector<1x256x256xbf16>
    %103 = vector.shape_cast %102 : vector<1x256x256xbf16> to vector<256x256xbf16>
    %cst_73 = arith.constant dense<0.000000e+00> : vector<128x256xf32>
    %104 = tpu.matmul %101, %103, %cst_73 {dimension_numbers = #tpu.dot_dimension_numbers<[1], [0], [0], [1], [0, 0, 1, 1], [], []>} : vector<128x256xbf16>, vector<256x256xbf16>, vector<128x256xf32> -> vector<128x256xf32>
    %c10_74 = arith.constant 10 : index
    %c0_75 = arith.constant 0 : index
    %c0_76 = arith.constant 0 : index
    %105 = vector.load %arg3[%c10_74, %c0_75, %c0_76] : memref<13x1x256xf32, #tpu.memory_space<vmem>>, vector<1x1x256xf32>
    %106 = vector.shape_cast %105 : vector<1x1x256xf32> to vector<1x256xf32>
    %107 = vector.broadcast %106 : vector<1x256xf32> to vector<128x256xf32>
    %108 = arith.addf %104, %107 : vector<128x256xf32>
    %cst_77 = arith.constant 0.000000e+00 : f32
    %109 = vector.broadcast %cst_77 : f32 to vector<128x256xf32>
    %110 = arith.maximumf %108, %109 : vector<128x256xf32>
    %111 = arith.truncf %110 : vector<128x256xf32> to vector<128x256xbf16>
    %c11 = arith.constant 11 : index
    %c0_78 = arith.constant 0 : index
    %c0_79 = arith.constant 0 : index
    %112 = vector.load %arg2[%c11, %c0_78, %c0_79] : memref<13x256x256xbf16, #tpu.memory_space<vmem>>, vector<1x256x256xbf16>
    %113 = vector.shape_cast %112 : vector<1x256x256xbf16> to vector<256x256xbf16>
    %cst_80 = arith.constant dense<0.000000e+00> : vector<128x256xf32>
    %114 = tpu.matmul %111, %113, %cst_80 {dimension_numbers = #tpu.dot_dimension_numbers<[1], [0], [0], [1], [0, 0, 1, 1], [], []>} : vector<128x256xbf16>, vector<256x256xbf16>, vector<128x256xf32> -> vector<128x256xf32>
    %c11_81 = arith.constant 11 : index
    %c0_82 = arith.constant 0 : index
    %c0_83 = arith.constant 0 : index
    %115 = vector.load %arg3[%c11_81, %c0_82, %c0_83] : memref<13x1x256xf32, #tpu.memory_space<vmem>>, vector<1x1x256xf32>
    %116 = vector.shape_cast %115 : vector<1x1x256xf32> to vector<1x256xf32>
    %117 = vector.broadcast %116 : vector<1x256xf32> to vector<128x256xf32>
    %118 = arith.addf %114, %117 : vector<128x256xf32>
    %cst_84 = arith.constant 0.000000e+00 : f32
    %119 = vector.broadcast %cst_84 : f32 to vector<128x256xf32>
    %120 = arith.maximumf %118, %119 : vector<128x256xf32>
    %121 = arith.truncf %120 : vector<128x256xf32> to vector<128x256xbf16>
    %c12 = arith.constant 12 : index
    %c0_85 = arith.constant 0 : index
    %c0_86 = arith.constant 0 : index
    %122 = vector.load %arg2[%c12, %c0_85, %c0_86] : memref<13x256x256xbf16, #tpu.memory_space<vmem>>, vector<1x256x256xbf16>
    %123 = vector.shape_cast %122 : vector<1x256x256xbf16> to vector<256x256xbf16>
    %cst_87 = arith.constant dense<0.000000e+00> : vector<128x256xf32>
    %124 = tpu.matmul %121, %123, %cst_87 {dimension_numbers = #tpu.dot_dimension_numbers<[1], [0], [0], [1], [0, 0, 1, 1], [], []>} : vector<128x256xbf16>, vector<256x256xbf16>, vector<128x256xf32> -> vector<128x256xf32>
    %c12_88 = arith.constant 12 : index
    %c0_89 = arith.constant 0 : index
    %c0_90 = arith.constant 0 : index
    %125 = vector.load %arg3[%c12_88, %c0_89, %c0_90] : memref<13x1x256xf32, #tpu.memory_space<vmem>>, vector<1x1x256xf32>
    %126 = vector.shape_cast %125 : vector<1x1x256xf32> to vector<1x256xf32>
    %127 = vector.broadcast %126 : vector<1x256xf32> to vector<128x256xf32>
    %128 = arith.addf %124, %127 : vector<128x256xf32>
    %cst_91 = arith.constant 0.000000e+00 : f32
    %129 = vector.broadcast %cst_91 : f32 to vector<128x256xf32>
    %130 = arith.maximumf %128, %129 : vector<128x256xf32>
    %131 = math.absf %128 : vector<128x256xf32>
    %cst_92 = arith.constant 0.000000e+00 : f32
    %132 = vector.broadcast %cst_92 : f32 to vector<128x256xf32>
    %133 = arith.subf %132, %131 : vector<128x256xf32>
    %134 = math.exp %133 : vector<128x256xf32>
    %cst_93 = arith.constant 1.000000e+00 : f32
    %135 = vector.broadcast %cst_93 : f32 to vector<128x256xf32>
    %136 = arith.addf %135, %134 : vector<128x256xf32>
    %137 = math.log %136 : vector<128x256xf32>
    %138 = arith.addf %130, %137 : vector<128x256xf32>
    %c0_94 = arith.constant 0 : index
    %c0_95 = arith.constant 0 : index
    %139 = vector.load %arg4[%c0_94, %c0_95] : memref<128x256xf32, #tpu.memory_space<vmem>>, vector<128x256xf32>
    tpu.vector_store %arg4[%c0_94, %c0_95], %138 {strides = array<i32>} : memref<128x256xf32, #tpu.memory_space<vmem>>, vector<128x256xf32>,
    return
  }
  func.func @transform_0(%arg0: i32) -> (i32, i32) {
    %c0_i32 = arith.constant 0 : i32
    %c0_i32_0 = arith.constant 0 : i32
    return %arg0, %c0_i32 : i32, i32
  }
  func.func @transform_1(%arg0: i32) -> (i32, i32, i32) {
    %c0_i32 = arith.constant 0 : i32
    %c0_i32_0 = arith.constant 0 : i32
    %c0_i32_1 = arith.constant 0 : i32
    %c0_i32_2 = arith.constant 0 : i32
    return %c0_i32, %c0_i32_0, %c0_i32_1 : i32, i32, i32
  }
  func.func @transform_2(%arg0: i32) -> (i32, i32, i32) {
    %c0_i32 = arith.constant 0 : i32
    %c0_i32_0 = arith.constant 0 : i32
    %c0_i32_1 = arith.constant 0 : i32
    %c0_i32_2 = arith.constant 0 : i32
    return %c0_i32, %c0_i32_0, %c0_i32_1 : i32, i32, i32
  }
  func.func @transform_3(%arg0: i32) -> (i32, i32) {
    %c0_i32 = arith.constant 0 : i32
    %c0_i32_0 = arith.constant 0 : i32
    return %arg0, %c0_i32 : i32, i32
  }
}

</mosaic_0001>

<bundles_post_ra>
// kernel: autoencoder_forward.1
= control target key start
LH: loop header
LB: loop body
LE: loop exit
PB: predicated region body
PF: predicated region fallthrough
CT: control target
= control target key end

     0   :  { %8 = vsyncpa [#allocation3], 0  ;;  %s7635_s0 = inlined_call_operand.vmem [shape: f32[256,256], index: 0, kind: input, shape index: {}]   ;;  %s7636_s1 = inlined_call_operand.hbm [shape: bf16[13,256,256], index: 1, kind: input, shape index: {}]   ;;  %s7637_s2 = inlined_call_operand.hbm [shape: f32[13,1,256], index: 2, kind: input, shape index: {}]   ;;  %s7638_s3 = inlined_call_operand.vmem [shape: f32[256,256], index: 3, kind: output, shape index: {}]  }
   0x1   :  { %9 = vsyncpa [#allocation5], 0  ;;  %s6728_s12 = smov 0  }
   0x2 LB: > { %s6702_s13 = smov [#allocation2]   ;;  %s5378_s15 = sadd.s32 4294967295, %s6700_s12   ;;  %s6700_s12 = sphi %s6728_s12, %s15_s12  }
   0x3   : > { %s126_s14 = sshll.u32 %s6702_s13, 4  ;;  %p5380_p0 = scmp.ge.s32.totalorder %s6700_s12, 1  ;;  %s127_s14 = int_to_ptr.vmem [resolvable:$true] %s126_s14 }
   0x4   : > { %p114_p1 = scmp.lt.s32.totalorder %s6700_s12, 3  ;;  %p6742_p3 = scmp.eq.s32.totalorder %s5378_s15, 0 }
   0x5   : > { %s6703_s18 = smov [#allocation4]   ;;  %s6630_s23 = scalar_lea.hbm %s7636_s1, 53248 }
   0x6   : > { %p6736_p2 = pnand %p5380_p0, %p114_p1  ;;  %s139_s19 = sshll.u32 %s6703_s18, 4  ;;  %s6754_s19 = int_to_ptr.vmem [resolvable:$true] %s139_s19 }
   0x7   : > { %s7643_s17 = scalar_select %p6742_p3, 1, 0 }
   0x8   : > { %s7642_s16 = scalar_select %p6736_p2, 1, 0 }
   0x9   : > { %p5853_p4 = pneg %p6736_p2  ;;  %p6631_p6 = scmp.ne.s32.totalorder %s7636_s1, %s6630_s23 }
   0xa   : > { %p6637_p10 = scmp.lt.u32.totalorder %s6630_s23, %s7636_s1 }
   0xb   : > { %p6750_p5 = pnand %p6742_p3, %p5853_p4 }
   0xd   : > { %p6632_p7 = pneg %p6750_p5 }
   0xf   : > { %p6633_p8 = pnand %p6632_p7, %p6631_p6 }
  0x11   : > { %p6634_p9 = pneg %p6633_p8 }
  0x13   : > { %p6639_p11 = pnand %p6637_p10, %p6634_p9 }
  0x15   : > { %6642 = shalt.err (!%p6639_p11)
}
  0x16   : > { %s6643_s28 = scalar_lea.vmem %s127_s14, 53248  ;;  %p6651_p1 = scmp.lt.s32.totalorder %s127_s14, %s127_s14 }
  0x17   : > { %p6644_p12 = scmp.ne.s32.totalorder %s127_s14, %s6643_s28  ;;  %p6652_p4 = scmp.lt.s32.totalorder %s6643_s28, %s6643_s28 }
  0x19   : > { %p6646_p13 = pnand %p6644_p12, %p6632_p7  ;;  %p6653_p3 = por %p6652_p4, %p6651_p1 }
  0x1b   : > { %p6647_p0 = pneg %p6646_p13 }
  0x1d   : > { %p6654_p2 = pnand %p6653_p3, %p6647_p0 }
  0x1f   : > { %6657 = shalt.err (!%p6654_p2)
}
  0x20   : > { %s6704_s29 = smov 128   ;;  %s6705_s30 = smov 8  }
  0x21   : > { %5856 = dma.hbm_to_vmem [thread:$0]  (!%p6750_p5), %s7636_s1, 53248, %s127_s14, [#allocation3], %s6704_s29, %s6704_s29, %s6705_s30  }
  0x22   : > { %s6658_s8 = scalar_lea.hbm %s7637_s2, 416 }
  0x23   : > { %p6659_p6 = scmp.ne.s32.totalorder %s7637_s2, %s6658_s8  ;;  %p6665_p8 = scmp.lt.u32.totalorder %s6658_s8, %s7637_s2 }
  0x25   : > { %p6661_p2 = pnand %p6659_p6, %p6632_p7 }
  0x27   : > { %p6662_p3 = pneg %p6661_p2 }
  0x29   : > { %p6667_p9 = pnand %p6665_p8, %p6662_p3 }
  0x2b   : > { %6670 = shalt.err (!%p6667_p9)
}
  0x2c   : > { %s6671_s14 = scalar_lea.vmem %s6754_s19, 416  ;;  %p6679_p13 = scmp.lt.s32.totalorder %s6754_s19, %s6754_s19 }
  0x2d   : > { %p6672_p10 = scmp.ne.s32.totalorder %s6754_s19, %s6671_s14  ;;  %p6680_p0 = scmp.lt.s32.totalorder %s6671_s14, %s6671_s14 }
  0x2f   : > { %p6674_p11 = pnand %p6672_p10, %p6632_p7  ;;  %p6681_p1 = por %p6680_p0, %p6679_p13 }
  0x31   : > { %p6675_p12 = pneg %p6674_p11 }
  0x33   : > { %p6682_p4 = pnand %p6681_p1, %p6675_p12 }
  0x35   : > { %6685 = shalt.err (!%p6682_p4)
}
  0x36   : > { %s6706_s18 = smov 32   ;;  %s6707_s21 = smov 2  }
  0x37   : > { %5859 = dma.hbm_to_vmem [thread:$0]  (!%p6750_p5), %s7637_s2, 416, %s6754_s19, [#allocation5], %s6706_s18, %s6706_s18, %s6707_s21  }
  0x38   : > { %p7645_p6 = scmp.ne.s32.totalorder %s7642_s16, 0 }
  0x39   : > { %p7646_p7 = scmp.ne.s32.totalorder (!%p7645_p6), %s7643_s17, 0 }
  0x3a   : > { %165 = sbr.rel (%p7645_p6) target bundleno = 3120 (0xc30), region = 32 }
  0x41   : > { %6691 = dma.done.wait (%p7646_p7), [#allocation3], 53248  }
  0x42   : > { %6693 = vsyncadd (%p7646_p7), [#allocation3], 4294914048 }
  0x43   : > { %6695 = dma.done.wait (%p7646_p7), [#allocation5], 416  }
  0x44   : > { %6697 = vsyncadd (%p7646_p7), [#allocation5], 4294966880  ;;  %v5878_v0 = vld [vmem:[#allocation2 + $0x4] ss:$8 sps:$4 sm:$0xff]   ;;  %v5880_v1 = vld [vmem:[#allocation2] ss:$8 sps:$4 sm:$0xff]  }
  0x45   : > { %461 = vmatprep.subr.bf16.mxu0 %v5878_v0  ;;  %v5881_v2 = vld [vmem:[#allocation2 + $0x14] ss:$8 sps:$4 sm:$0xff]   ;;  %v5883_v3 = vld [vmem:[#allocation2 + $0x10] ss:$8 sps:$4 sm:$0xff]   ;;  %v5884_v4 = vld [vmem:[#allocation2 + $0x24] ss:$8 sps:$4 sm:$0xff]  }
  0x46   : > { %462 = vmatpush1.bf16.msra.mxu0 %v5880_v1  ;;  %s5387_s16 = sshll.u32 %s5378_s15, 4  ;;  %v5886_v5 = vld [vmem:[#allocation2 + $0x20] ss:$8 sps:$4 sm:$0xff]   ;;  %v5887_v6 = vld [vmem:[#allocation2 + $0x34] ss:$8 sps:$4 sm:$0xff]  }
  0x47   : > { %463 = vmatprep.subr.bf16.mxu0 %v5881_v2  ;;  %p196_p5 = scmp.lt.s32.totalorder %s5387_s16, 31  ;;  %v5889_v7 = vld [vmem:[#allocation2 + $0x30] ss:$8 sps:$4 sm:$0xff]   ;;  %v5890_v8 = vld [vmem:[#allocation2 + $0x44] ss:$8 sps:$4 sm:$0xff]  }
  0x48   : > { %v5892_v9 = vld [vmem:[#allocation2 + $0x40] ss:$8 sps:$4 sm:$0xff]   ;;  %v5893_v10 = vld [vmem:[#allocation2 + $0x54] ss:$8 sps:$4 sm:$0xff]   ;;  %v5895_v11 = vld [vmem:[#allocation2 + $0x50] ss:$8 sps:$4 sm:$0xff]  }
  0x49   : > { %s7648_s16 = smov (!%p196_p5, %s5387_s16), 31  ;;  %v5896_v12 = vld [vmem:[#allocation2 + $0x64] ss:$8 sps:$4 sm:$0xff]   ;;  %v5898_v16 = vld [vmem:[#allocation2 + $0x60] ss:$8 sps:$4 sm:$0xff]  }
  0x4a   : > { %464 = vmatpush1.bf16.msra.mxu0 %v5883_v3  ;;  %s5811_s17 = sshll.u32 %s7648_s16, 4  ;;  %v5899_v17 = vld [vmem:[#allocation2 + $0x74] ss:$8 sps:$4 sm:$0xff]   ;;  %v5901_v18 = vld [vmem:[#allocation2 + $0x70] ss:$8 sps:$4 sm:$0xff]  }
  0x4b   : > { %465 = vmatprep.subr.bf16.mxu0 %v5884_v4  ;;  %s6823_s20 = scalar_lea.vmem %s7635_s0, %s5811_s17  ;;  %v5902_v19 = vld [vmem:[#allocation2 + $0x84] ss:$8 sps:$4 sm:$0xff]   ;;  %v5904_v20 = vld [vmem:[#allocation2 + $0x80] ss:$8 sps:$4 sm:$0xff]   ;;  %v5905_v21 = vld [vmem:[#allocation2 + $0x94] ss:$8 sps:$4 sm:$0xff]   ;;  %s7508_s26 = scalar_lea.vmem %s7638_s3, %s5811_s17 }
  0x4c   : > { %v210_v13 = vld [vmem:[%s6823_s20 + $0x8] sm:$0xff]  ;;  %v212_v14 = vld [vmem:[%s6823_s20 + $0x18] sm:$0xff]  ;;  %v209_v50 = vld [vmem:[%s6823_s20] sm:$0xff] }
  0x4d   : > { %v242_v15 = vpack.c.bf16 %v212_v14, %v210_v13  ;;  %v5926_v22 = vld [vmem:[#allocation2 + $0x104] ss:$8 sps:$4 sm:$0xff]   ;;  %v5928_v23 = vld [vmem:[#allocation2 + $0x100] ss:$8 sps:$4 sm:$0xff]   ;;  %v5907_v24 = vld [vmem:[#allocation2 + $0x90] ss:$8 sps:$4 sm:$0xff]  }
  0x4e   : > { %466 = vmatpush1.bf16.msra.mxu0 %v5886_v5  ;;  %828 = vmatprep.subr.bf16.mxu1 %v5926_v22  ;;  %v5929_v25 = vld [vmem:[#allocation2 + $0x114] ss:$8 sps:$4 sm:$0xff]   ;;  %v5908_v26 = vld [vmem:[#allocation2 + $0xa4] ss:$8 sps:$4 sm:$0xff]   ;;  %v5931_v27 = vld [vmem:[#allocation2 + $0x110] ss:$8 sps:$4 sm:$0xff]  }
  0x4f   : > { %467 = vmatprep.subr.bf16.mxu0 %v5887_v6  ;;  %493 = vmatprep.mubr.bf16.mxu0 %v242_v15  ;;  %v5932_v28 = vld [vmem:[#allocation2 + $0x124] ss:$8 sps:$4 sm:$0xff]   ;;  %v5910_v29 = vld [vmem:[#allocation2 + $0xa0] ss:$8 sps:$4 sm:$0xff]   ;;  %v5911_v30 = vld [vmem:[#allocation2 + $0xb4] ss:$8 sps:$4 sm:$0xff]  }
  0x50   : > { %829 = vmatpush1.bf16.msra.mxu1 %v5928_v23  ;;  %v5934_v31 = vld [vmem:[#allocation2 + $0x120] ss:$8 sps:$4 sm:$0xff]   ;;  %v5935_v32 = vld [vmem:[#allocation2 + $0x134] ss:$8 sps:$4 sm:$0xff]   ;;  %v5913_v33 = vld [vmem:[#allocation2 + $0xb0] ss:$8 sps:$4 sm:$0xff]  }
  0x51   : > { %830 = vmatprep.subr.bf16.mxu1 %v5929_v25  ;;  %v5914_v34 = vld [vmem:[#allocation2 + $0xc4] ss:$8 sps:$4 sm:$0xff]   ;;  %v5937_v35 = vld [vmem:[#allocation2 + $0x130] ss:$8 sps:$4 sm:$0xff]   ;;  %v5916_v37 = vld [vmem:[#allocation2 + $0xc0] ss:$8 sps:$4 sm:$0xff]  }
  0x52   : > { %468 = vmatpush1.bf16.msra.mxu0 %v5889_v7  ;;  %v5938_v36 = vld [vmem:[#allocation2 + $0x144] ss:$8 sps:$4 sm:$0xff]   ;;  %v5917_v38 = vld [vmem:[#allocation2 + $0xd4] ss:$8 sps:$4 sm:$0xff]   ;;  %v5940_v39 = vld [vmem:[#allocation2 + $0x140] ss:$8 sps:$4 sm:$0xff]  }
  0x53   : > { %469 = vmatprep.subr.bf16.mxu0 %v5890_v8  ;;  %v5941_v40 = vld [vmem:[#allocation2 + $0x154] ss:$8 sps:$4 sm:$0xff]   ;;  %v5919_v41 = vld [vmem:[#allocation2 + $0xd0] ss:$8 sps:$4 sm:$0xff]   ;;  %v5920_v42 = vld [vmem:[#allocation2 + $0xe4] ss:$8 sps:$4 sm:$0xff]  }
  0x54   : > { %831 = vmatpush1.bf16.msra.mxu1 %v5931_v27  ;;  %v5943_v43 = vld [vmem:[#allocation2 + $0x150] ss:$8 sps:$4 sm:$0xff]   ;;  %v5944_v44 = vld [vmem:[#allocation2 + $0x164] ss:$8 sps:$4 sm:$0xff]   ;;  %v5922_v45 = vld [vmem:[#allocation2 + $0xe0] ss:$8 sps:$4 sm:$0xff]  }
  0x55   : > { %832 = vmatprep.subr.bf16.mxu1 %v5932_v28  ;;  %v5946_v46 = vld [vmem:[#allocation2 + $0x160] ss:$8 sps:$4 sm:$0xff]   ;;  %v5923_v47 = vld [vmem:[#allocation2 + $0xf4] ss:$8 sps:$4 sm:$0xff]   ;;  %v5925_v49 = vld [vmem:[#allocation2 + $0xf0] ss:$8 sps:$4 sm:$0xff]  }
  0x56   : > { %470 = vmatpush1.bf16.msra.mxu0 %v5892_v9  ;;  %v5947_v48 = vld [vmem:[#allocation2 + $0x174] ss:$8 sps:$4 sm:$0xff]   ;;  %v5949_v52 = vld [vmem:[#allocation2 + $0x170] ss:$8 sps:$4 sm:$0xff]   ;;  %v214_v53 = vld [vmem:[%s6823_s20 + $0x28] sm:$0xff] }
  0x57   : > { %471 = vmatprep.subr.bf16.mxu0 %v5893_v10  ;;  %v211_v51 = vld [vmem:[%s6823_s20 + $0x10] sm:$0xff]  ;;  %v216_v54 = vld [vmem:[%s6823_s20 + $0x38] sm:$0xff]  ;;  %v5950_v55 = vld [vmem:[#allocation2 + $0x184] ss:$8 sps:$4 sm:$0xff]  }
  0x58   : > { %833 = vmatpush1.bf16.msra.mxu1 %v5934_v31  ;;  %v5952_v56 = vld [vmem:[#allocation2 + $0x180] ss:$8 sps:$4 sm:$0xff]   ;;  %v241_v57 = vpack.c.bf16 %v211_v51, %v209_v50  ;;  %v5953_v58 = vld [vmem:[#allocation2 + $0x194] ss:$8 sps:$4 sm:$0xff]   ;;  %v244_v59 = vpack.c.bf16 %v216_v54, %v214_v53  ;;  %v5955_v62 = vld [vmem:[#allocation2 + $0x190] ss:$8 sps:$4 sm:$0xff]  }
  0x59   : > { %834 = vmatprep.subr.bf16.mxu1 %v5935_v32  ;;  %v213_v60 = vld [vmem:[%s6823_s20 + $0x20] sm:$0xff]  ;;  %v215_v61 = vld [vmem:[%s6823_s20 + $0x30] sm:$0xff]  ;;  %v218_v63 = vld [vmem:[%s6823_s20 + $0x48] sm:$0xff] }
  0x5a   : > { %472 = vmatpush1.bf16.msra.mxu0 %v5895_v11  ;;  %v220_v0 = vld [vmem:[%s6823_s20 + $0x58] sm:$0xff]  ;;  %v5956_v1 = vld [vmem:[#allocation2 + $0x1a4] ss:$8 sps:$4 sm:$0xff]   ;;  %v5958_v2 = vld [vmem:[#allocation2 + $0x1a0] ss:$8 sps:$4 sm:$0xff]   ;;  %v243_v3 = vpack.c.bf16 %v215_v61, %v213_v60 }
  0x5b   : > { %473 = vmatprep.subr.bf16.mxu0 %v5896_v12  ;;  %v5959_v4 = vld [vmem:[#allocation2 + $0x1b4] ss:$8 sps:$4 sm:$0xff]   ;;  %v246_v5 = vpack.c.bf16 %v220_v0, %v218_v63  ;;  %v217_v6 = vld [vmem:[%s6823_s20 + $0x40] sm:$0xff]  ;;  %v5961_v8 = vld [vmem:[#allocation2 + $0x1b0] ss:$8 sps:$4 sm:$0xff]  }
  0x5c   : > { %835 = vmatpush1.bf16.msra.mxu1 %v5937_v35  ;;  %v219_v7 = vld [vmem:[%s6823_s20 + $0x50] sm:$0xff]  ;;  %v222_v9 = vld [vmem:[%s6823_s20 + $0x68] sm:$0xff]  ;;  %v224_v10 = vld [vmem:[%s6823_s20 + $0x78] sm:$0xff] }
  0x5d   : > { %836 = vmatprep.subr.bf16.mxu1 %v5938_v36  ;;  %v5962_v11 = vld [vmem:[#allocation2 + $0x1c4] ss:$8 sps:$4 sm:$0xff]   ;;  %v5964_v12 = vld [vmem:[#allocation2 + $0x1c0] ss:$8 sps:$4 sm:$0xff]   ;;  %v245_v13 = vpack.c.bf16 %v219_v7, %v217_v6  ;;  %v5965_v14 = vld [vmem:[#allocation2 + $0x1d4] ss:$8 sps:$4 sm:$0xff]   ;;  %v248_v15 = vpack.c.bf16 %v224_v10, %v222_v9  ;;  %v291_v9 = vlaneseq }
  0x5e   : > { %474 = vmatpush1.bf16.msra.mxu0 %v5898_v16  ;;  %v221_v16 = vld [vmem:[%s6823_s20 + $0x60] sm:$0xff]  ;;  %v227_v23 = vld [vmem:[%s6823_s20 + $0x90] sm:$0xff]  ;;  %v232_v25 = vld [vmem:[%s6823_s20 + $0xb8] sm:$0xff] }
  0x5f   : > { %475 = vmatprep.subr.bf16.mxu0 %v5899_v17  ;;  %v223_v17 = vld [vmem:[%s6823_s20 + $0x70] sm:$0xff]  ;;  %v225_v22 = vld [vmem:[%s6823_s20 + $0x80] sm:$0xff]  ;;  %v236_v31 = vld [vmem:[%s6823_s20 + $0xd8] sm:$0xff] }
  0x60   : > { %837 = vmatpush1.bf16.msra.mxu1 %v5940_v39  ;;  %v229_v28 = vld [vmem:[%s6823_s20 + $0xa0] sm:$0xff]  ;;  %v235_v35 = vld [vmem:[%s6823_s20 + $0xd0] sm:$0xff]  ;;  %v238_v36 = vld [vmem:[%s6823_s20 + $0xe8] sm:$0xff] }
  0x61   : > { %838 = vmatprep.subr.bf16.mxu1 %v5941_v40  ;;  %v237_v40 = vld [vmem:[%s6823_s20 + $0xe0] sm:$0xff]  ;;  %v5979_v50 = vld [vmem:[#allocation2 + $0x214] ss:$8 sps:$4 sm:$0xff]   ;;  %v5977_v51 = vld [vmem:[#allocation2 + $0x210] ss:$8 sps:$4 sm:$0xff]  }
  0x62   : > { %476 = vmatpush1.bf16.msra.mxu0 %v5901_v18  ;;  %v226_v18 = vld [vmem:[%s6823_s20 + $0x88] sm:$0xff]  ;;  %v5985_v54 = vld [vmem:[#allocation2 + $0x234] ss:$8 sps:$4 sm:$0xff]   ;;  %v5995_v63 = vld [vmem:[#allocation2 + $0x270] ss:$8 sps:$4 sm:$0xff]  }
  0x63   : > { %477 = vmatprep.subr.bf16.mxu0 %v5902_v19  ;;  %v228_v19 = vld [vmem:[%s6823_s20 + $0x98] sm:$0xff]  ;;  %v5980_v53 = vld [vmem:[#allocation2 + $0x220] ss:$8 sps:$4 sm:$0xff]   ;;  %v5994_v60 = vld [vmem:[#allocation2 + $0x264] ss:$8 sps:$4 sm:$0xff]  }
  0x64   : > { %839 = vmatpush1.bf16.msra.mxu1 %v5943_v43  ;;  %v5967_v43 = vld [vmem:[#allocation2 + $0x1d0] ss:$8 sps:$4 sm:$0xff]   ;;  %v5992_v61 = vld [vmem:[#allocation2 + $0x260] ss:$8 sps:$4 sm:$0xff]   ;;  %v6000_v0 = vld [vmem:[#allocation2 + $0x284] ss:$8 sps:$4 sm:$0xff]  }
  0x65   : > { %840 = vmatprep.subr.bf16.mxu1 %v5944_v44  ;;  %v5968_v44 = vld [vmem:[#allocation2 + $0x1e4] ss:$8 sps:$4 sm:$0xff]   ;;  %v6009_v6 = vld [vmem:[#allocation2 + $0x2b4] ss:$8 sps:$4 sm:$0xff]   ;;  %v6007_v7 = vld [vmem:[#allocation2 + $0x2b0] ss:$8 sps:$4 sm:$0xff]  }
  0x66   : > { %478 = vmatpush1.bf16.msra.mxu0 %v5904_v20  ;;  %v247_v20 = vpack.c.bf16 %v223_v17, %v221_v16  ;;  %v6010_v10 = vld [vmem:[#allocation2 + $0x2c0] ss:$8 sps:$4 sm:$0xff]  }
  0x67   : > { %479 = vmatprep.subr.bf16.mxu0 %v5905_v21  ;;  %v250_v21 = vpack.c.bf16 %v228_v19, %v226_v18 }
  0x68   : > { %841 = vmatpush1.bf16.msra.mxu1 %v5946_v46  ;;  %v5971_v46 = vld [vmem:[#allocation2 + $0x1f4] ss:$8 sps:$4 sm:$0xff]  }
  0x69   : > { %842 = vmatprep.subr.bf16.mxu1 %v5947_v48  ;;  %v5974_v48 = vld [vmem:[#allocation2 + $0x200] ss:$8 sps:$4 sm:$0xff]  }
  0x6a   : > { %480 = vmatpush1.bf16.msra.mxu0 %v5907_v24  ;;  %v230_v24 = vld [vmem:[%s6823_s20 + $0xa8] sm:$0xff] }
  0x6b   : > { %481 = vmatprep.subr.bf16.mxu0 %v5908_v26  ;;  %v249_v26 = vpack.c.bf16 %v227_v23, %v225_v22  ;;  %v252_v27 = vpack.c.bf16 %v232_v25, %v230_v24 }
  0x6c   : > { %843 = vmatpush1.bf16.msra.mxu1 %v5949_v52  ;;  %v5982_v52 = vld [vmem:[#allocation2 + $0x224] ss:$8 sps:$4 sm:$0xff]  }
  0x6d   : > { %844 = vmatprep.subr.bf16.mxu1 %v5950_v55  ;;  %v5983_v55 = vld [vmem:[#allocation2 + $0x230] ss:$8 sps:$4 sm:$0xff]  }
  0x6e   : > { %482 = vmatpush1.bf16.msra.mxu0 %v5910_v29  ;;  %v231_v29 = vld [vmem:[%s6823_s20 + $0xb0] sm:$0xff] }
  0x6f   : > { %483 = vmatprep.subr.bf16.mxu0 %v5911_v30  ;;  %v234_v30 = vld [vmem:[%s6823_s20 + $0xc8] sm:$0xff]  ;;  %v251_v32 = vpack.c.bf16 %v231_v29, %v229_v28 }
  0x70   : > { %845 = vmatpush1.bf16.msra.mxu1 %v5952_v56  ;;  %v5988_v56 = vld [vmem:[#allocation2 + $0x244] ss:$8 sps:$4 sm:$0xff]  }
  0x71   : > { %846 = vmatprep.subr.bf16.mxu1 %v5953_v58  ;;  %v5991_v58 = vld [vmem:[#allocation2 + $0x254] ss:$8 sps:$4 sm:$0xff]  }
  0x72   : > { %484 = vmatpush1.bf16.msra.mxu0 %v5913_v33  ;;  %v254_v33 = vpack.c.bf16 %v236_v31, %v234_v30 }
  0x73   : > { %485 = vmatprep.subr.bf16.mxu0 %v5914_v34  ;;  %v233_v34 = vld [vmem:[%s6823_s20 + $0xc0] sm:$0xff] }
  0x74   : > { %847 = vmatpush1.bf16.msra.mxu1 %v5955_v62  ;;  %v5997_v62 = vld [vmem:[#allocation2 + $0x274] ss:$8 sps:$4 sm:$0xff]  }
  0x75   : > { %848 = vmatprep.subr.bf16.mxu1 %v5956_v1  ;;  %v5998_v1 = vld [vmem:[#allocation2 + $0x280] ss:$8 sps:$4 sm:$0xff]  }
  0x76   : > { %486 = vmatpush1.bf16.msra.mxu0 %v5916_v37  ;;  %v240_v37 = vld [vmem:[%s6823_s20 + $0xf8] sm:$0xff] }
  0x77   : > { %487 = vmatprep.subr.bf16.mxu0 %v5917_v38  ;;  %v253_v38 = vpack.c.bf16 %v235_v35, %v233_v34  ;;  %v256_v39 = vpack.c.bf16 %v240_v37, %v238_v36 }
  0x78   : > { %849 = vmatpush1.bf16.msra.mxu1 %v5958_v2  ;;  %v6003_v2 = vld [vmem:[#allocation2 + $0x294] ss:$8 sps:$4 sm:$0xff]  }
  0x79   : > { %850 = vmatprep.subr.bf16.mxu1 %v5959_v4  ;;  %v6006_v4 = vld [vmem:[#allocation2 + $0x2a4] ss:$8 sps:$4 sm:$0xff]  }
  0x7a   : > { %488 = vmatpush1.bf16.msra.mxu0 %v5919_v41  ;;  %v239_v41 = vld [vmem:[%s6823_s20 + $0xf0] sm:$0xff] }
  0x7b   : > { %489 = vmatprep.subr.bf16.mxu0 %v5920_v42  ;;  %v255_v42 = vpack.c.bf16 %v239_v41, %v237_v40 }
  0x7c   : > { %851 = vmatpush1.bf16.msra.mxu1 %v5961_v8  ;;  %v6012_v8 = vld [vmem:[#allocation2 + $0x2c4] ss:$8 sps:$4 sm:$0xff]  }
  0x7d   : > { %852 = vmatprep.subr.bf16.mxu1 %v5962_v11  ;;  %v6015_v11 = vld [vmem:[#allocation2 + $0x2d4] ss:$8 sps:$4 sm:$0xff]  }
  0x7e   : > { %490 = vmatpush1.bf16.msra.mxu0 %v5922_v45  ;;  %v5970_v45 = vld [vmem:[#allocation2 + $0x1e0] ss:$8 sps:$4 sm:$0xff]  }
  0x7f   : > { %491 = vmatprep.subr.bf16.mxu0 %v5923_v47  ;;  %v5973_v47 = vld [vmem:[#allocation2 + $0x1f0] ss:$8 sps:$4 sm:$0xff]  }
  0x80   : > { %853 = vmatpush1.bf16.msra.mxu1 %v5964_v12  ;;  %v292_v12 = vshrl.u32 %v291_v9, 7 }
  0x81   : > { %854 = vmatprep.subr.bf16.mxu1 %v5965_v14 }
  0x82   : > { %492 = vmatpush1.bf16.msra.mxu0 %v5925_v49  ;;  %v5976_v49 = vld [vmem:[#allocation2 + $0x204] ss:$8 sps:$4 sm:$0xff]   ;;  %v6857_v14 = vsub.s32 0, %v292_v12  ;;  %v6859_v16 = vsub.s32 1, %v292_v12 }
  0x83   : > { %1195 = vmatprep.subr.bf16.mxu0 %v5976_v49 }
  0x84   : > { %855 = vmatpush1.bf16.msra.mxu1 %v5967_v43 }
  0x85   : > { %494 = vmatmul.mubr.bf16.vlgmr.msra.gmra.mrb[0].mxu0 %v241_v57  ;;  %856 = vmatprep.subr.bf16.mxu1 %v5968_v44  ;;  %v5986_v57 = vld [vmem:[#allocation2 + $0x240] ss:$8 sps:$4 sm:$0xff]  }
  0x86   : > { %503 = vmatprep.mubr.bf16.mxu0 %v244_v59  ;;  %1196 = vmatpush1.bf16.msra.mxu0 %v5974_v48  ;;  %v5989_v59 = vld [vmem:[#allocation2 + $0x250] ss:$8 sps:$4 sm:$0xff]  }
  0x87   : > { %1197 = vmatprep.subr.bf16.mxu0 %v5979_v50 }
  0x88   : > { %857 = vmatpush1.bf16.msra.mxu1 %v5970_v45 }
  0x89   : > { %858 = vmatprep.subr.bf16.mxu1 %v5971_v46 }
  0x8a   : > { %1198 = vmatpush1.bf16.msra.mxu0 %v5977_v51 }
  0x8b   : > { %1199 = vmatprep.subr.bf16.mxu0 %v5982_v52 }
  0x8c   : > { %859 = vmatpush1.bf16.msra.mxu1 %v5973_v47 }
  0x8d   : > { %504 = vmatmul.mubr.bf16.gmra.mrb[4].mxu0 %v243_v3  ;;  %v6001_v3 = vld [vmem:[#allocation2 + $0x290] ss:$8 sps:$4 sm:$0xff]  }
  0x8e   : > { %513 = vmatprep.mubr.bf16.mxu0 %v246_v5  ;;  %1200 = vmatpush1.bf16.msra.mxu0 %v5980_v53  ;;  %v6004_v5 = vld [vmem:[#allocation2 + $0x2a0] ss:$8 sps:$4 sm:$0xff]  }
  0x8f   : > { %1201 = vmatprep.subr.bf16.mxu0 %v5985_v54 }
  0x92   : > { %1202 = vmatpush1.bf16.msra.mxu0 %v5983_v55 }
  0x93   : > { %1203 = vmatprep.subr.bf16.mxu0 %v5988_v56 }
  0x95   : > { %514 = vmatmul.mubr.bf16.gmra.mrb[8].mxu0 %v245_v13  ;;  %v6013_v13 = vld [vmem:[#allocation2 + $0x2d0] ss:$8 sps:$4 sm:$0xff]  }
  0x96   : > { %523 = vmatprep.mubr.bf16.mxu0 %v248_v15  ;;  %1204 = vmatpush1.bf16.msra.mxu0 %v5986_v57  ;;  %v289_v15 = vld [vmem:[#allocation4] sm:$0x3] }
  0x97   : > { %1205 = vmatprep.subr.bf16.mxu0 %v5991_v58  ;;  %v6862_v17 = vrot.slane %v289_v15, %v6857_v14  ;;  %v6865_v18 = vrot.slane %v289_v15, %v6859_v16 }
  0x9a   : > { %1206 = vmatpush1.bf16.msra.mxu0 %v5989_v59 }
  0x9b   : > { %1207 = vmatprep.subr.bf16.mxu0 %v5994_v60 }
  0x9d   : > { %524 = vmatmul.mubr.bf16.gmra.mrb[12].mxu0 %v247_v20 }
  0x9e   : > { %533 = vmatprep.mubr.bf16.mxu0 %v250_v21  ;;  %1208 = vmatpush1.bf16.msra.mxu0 %v5992_v61 }
  0x9f   : > { %1209 = vmatprep.subr.bf16.mxu0 %v5997_v62 }
  0xa2   : > { %1210 = vmatpush1.bf16.msra.mxu0 %v5995_v63 }
  0xa3   : > { %1211 = vmatprep.subr.bf16.mxu0 %v6000_v0 }
  0xa5   : > { %534 = vmatmul.mubr.bf16.gmra.mrb[16].mxu0 %v249_v26 }
  0xa6   : > { %543 = vmatprep.mubr.bf16.mxu0 %v252_v27  ;;  %1212 = vmatpush1.bf16.msra.mxu0 %v5998_v1 }
  0xa7   : > { %1213 = vmatprep.subr.bf16.mxu0 %v6003_v2 }
  0xaa   : > { %1214 = vmatpush1.bf16.msra.mxu0 %v6001_v3 }
  0xab   : > { %1215 = vmatprep.subr.bf16.mxu0 %v6006_v4 }
  0xad   : > { %544 = vmatmul.mubr.bf16.gmra.mrb[20].mxu0 %v251_v32 }
  0xae   : > { %553 = vmatprep.mubr.bf16.mxu0 %v254_v33  ;;  %1216 = vmatpush1.bf16.msra.mxu0 %v6004_v5 }
  0xaf   : > { %1217 = vmatprep.subr.bf16.mxu0 %v6009_v6 }
  0xb2   : > { %1218 = vmatpush1.bf16.msra.mxu0 %v6007_v7 }
  0xb3   : > { %1219 = vmatprep.subr.bf16.mxu0 %v6012_v8 }
  0xb5   : > { %554 = vmatmul.mubr.bf16.gmra.mrb[24].mxu0 %v253_v38 }
  0xb6   : > { %563 = vmatprep.mubr.bf16.mxu0 %v256_v39  ;;  %1220 = vmatpush1.bf16.msra.mxu0 %v6010_v10 }
  0xb7   : > { %1221 = vmatprep.subr.bf16.mxu0 %v6015_v11 }
  0xba   : > { %1222 = vmatpush1.bf16.msra.mxu0 %v6013_v13 }
  0xbd   : > { %564 = vmatmul.mubr.bf16.gmra.mrb[28].mxu0 %v255_v42 }
 0x158   : > { %v495_v19 = vpop.f32.mrb[0].mxu0 }
 0x159   : > { %v496_v20 = vadd.f32 %v495_v19, %v6862_v17  ;;  %v497_v21 = vpop.f32.mrb[1].mxu0 }
 0x15a   : > { %v498_v22 = vadd.f32 %v497_v21, %v6865_v18  ;;  %v499_v23 = vpop.f32.mrb[2].mxu0 }
 0x15b   : > { %v500_v24 = vadd.f32 %v499_v23, %v6862_v17  ;;  %v501_v25 = vpop.f32.mrb[3].mxu0  ;;  %v574_v27 = vmax.f32 %v496_v20, 0.0 }
 0x15c   : > { %v502_v26 = vadd.f32 %v501_v25, %v6865_v18  ;;  %v575_v29 = vmax.f32 %v498_v22, 0.0 }
 0x15d   : > { %v576_v28 = vmax.f32 %v500_v24, 0.0 }
 0x15e   : > { %v577_v30 = vmax.f32 %v502_v26, 0.0 }
 0x15f   : > { %v606_v31 = vpack.c.bf16 %v576_v28, %v574_v27 }
 0x160   : > { %v505_v32 = vpop.f32.mrb[4].mxu0  ;;  %v607_v33 = vpack.c.bf16 %v577_v30, %v575_v29 }
 0x161   : > { %v506_v34 = vadd.f32 %v505_v32, %v6862_v17  ;;  %v507_v35 = vpop.f32.mrb[5].mxu0 }
 0x162   : > { %v508_v36 = vadd.f32 %v507_v35, %v6865_v18  ;;  %v509_v37 = vpop.f32.mrb[6].mxu0  ;;  %860 = vmatprep.mubr.bf16.mxu1 %v607_v33 }
 0x163   : > { %v510_v38 = vadd.f32 %v509_v37, %v6862_v17  ;;  %v511_v39 = vpop.f32.mrb[7].mxu0  ;;  %861 = vmatmul.mubr.bf16.vlgmr.msra.gmra.mrb[0].mxu1 %v606_v31  ;;  %v578_v41 = vmax.f32 %v506_v34, 0.0 }
 0x164   : > { %v512_v40 = vadd.f32 %v511_v39, %v6865_v18  ;;  %v579_v43 = vmax.f32 %v508_v36, 0.0 }
 0x165   : > { %v580_v42 = vmax.f32 %v510_v38, 0.0 }
 0x166   : > { %v581_v44 = vmax.f32 %v512_v40, 0.0 }
 0x167   : > { %v608_v45 = vpack.c.bf16 %v580_v42, %v578_v41 }
 0x168   : > { %v609_v46 = vpack.c.bf16 %v581_v44, %v579_v43  ;;  %v515_v47 = vpop.f32.mrb[8].mxu0 }
 0x169   : > { %v516_v48 = vadd.f32 %v515_v47, %v6862_v17  ;;  %v517_v49 = vpop.f32.mrb[9].mxu0 }
 0x16a   : > { %v518_v50 = vadd.f32 %v517_v49, %v6865_v18  ;;  %v519_v51 = vpop.f32.mrb[10].mxu0  ;;  %870 = vmatprep.mubr.bf16.mxu1 %v609_v46 }
 0x16b   : > { %v520_v52 = vadd.f32 %v519_v51, %v6862_v17  ;;  %v521_v53 = vpop.f32.mrb[11].mxu0  ;;  %871 = vmatmul.mubr.bf16.gmra.mrb[4].mxu1 %v608_v45  ;;  %v582_v55 = vmax.f32 %v516_v48, 0.0 }
 0x16c   : > { %v522_v54 = vadd.f32 %v521_v53, %v6865_v18  ;;  %v583_v57 = vmax.f32 %v518_v50, 0.0 }
 0x16d   : > { %v584_v56 = vmax.f32 %v520_v52, 0.0 }
 0x16e   : > { %v585_v58 = vmax.f32 %v522_v54, 0.0 }
 0x16f   : > { %v610_v59 = vpack.c.bf16 %v584_v56, %v582_v55 }
 0x170   : > { %v611_v60 = vpack.c.bf16 %v585_v58, %v583_v57  ;;  %v525_v61 = vpop.f32.mrb[12].mxu0 }
 0x171   : > { %v526_v62 = vadd.f32 %v525_v61, %v6862_v17  ;;  %v527_v63 = vpop.f32.mrb[13].mxu0 }
 0x172   : > { %v528_v0 = vadd.f32 %v527_v63, %v6865_v18  ;;  %v529_v1 = vpop.f32.mrb[14].mxu0  ;;  %880 = vmatprep.mubr.bf16.mxu1 %v611_v60 }
 0x173   : > { %v530_v2 = vadd.f32 %v529_v1, %v6862_v17  ;;  %v531_v3 = vpop.f32.mrb[15].mxu0  ;;  %881 = vmatmul.mubr.bf16.gmra.mrb[8].mxu1 %v610_v59  ;;  %v586_v5 = vmax.f32 %v526_v62, 0.0 }
 0x174   : > { %v532_v4 = vadd.f32 %v531_v3, %v6865_v18  ;;  %v587_v7 = vmax.f32 %v528_v0, 0.0 }
 0x175   : > { %v588_v6 = vmax.f32 %v530_v2, 0.0 }
 0x176   : > { %v589_v8 = vmax.f32 %v532_v4, 0.0 }
 0x177   : > { %v612_v9 = vpack.c.bf16 %v588_v6, %v586_v5 }
 0x178   : > { %v613_v10 = vpack.c.bf16 %v589_v8, %v587_v7  ;;  %v535_v11 = vpop.f32.mrb[16].mxu0  ;;  %v6018_v7 = vld [vmem:[#allocation2 + $0x2e4] ss:$8 sps:$4 sm:$0xff]   ;;  %v6016_v8 = vld [vmem:[#allocation2 + $0x2e0] ss:$8 sps:$4 sm:$0xff]  }
 0x179   : > { %v536_v12 = vadd.f32 %v535_v11, %v6862_v17  ;;  %v537_v13 = vpop.f32.mrb[17].mxu0  ;;  %1223 = vmatprep.subr.bf16.mxu0 %v6018_v7  ;;  %v6024_v11 = vld [vmem:[#allocation2 + $0x304] ss:$8 sps:$4 sm:$0xff]  }
 0x17a   : > { %v538_v15 = vadd.f32 %v537_v13, %v6865_v18  ;;  %v539_v19 = vpop.f32.mrb[18].mxu0  ;;  %890 = vmatprep.mubr.bf16.mxu1 %v613_v10  ;;  %1224 = vmatpush1.bf16.msra.mxu0 %v6016_v8  ;;  %v6019_v10 = vld [vmem:[#allocation2 + $0x2f0] ss:$8 sps:$4 sm:$0xff]   ;;  %v6030_v13 = vld [vmem:[#allocation2 + $0x324] ss:$8 sps:$4 sm:$0xff]  }
 0x17b   : > { %v540_v20 = vadd.f32 %v539_v19, %v6862_v17  ;;  %v541_v21 = vpop.f32.mrb[19].mxu0  ;;  %891 = vmatmul.mubr.bf16.gmra.mrb[12].mxu1 %v612_v9  ;;  %v590_v23 = vmax.f32 %v536_v12, 0.0  ;;  %v6021_v9 = vld [vmem:[#allocation2 + $0x2f4] ss:$8 sps:$4 sm:$0xff]   ;;  %1562 = vmatprep.subr.bf16.mxu1 %v6024_v11 }
 0x17c   : > { %v542_v22 = vadd.f32 %v541_v21, %v6865_v18  ;;  %v591_v25 = vmax.f32 %v538_v15, 0.0  ;;  %1225 = vmatprep.subr.bf16.mxu0 %v6021_v9  ;;  %v6027_v12 = vld [vmem:[#allocation2 + $0x314] ss:$8 sps:$4 sm:$0xff]   ;;  %v6028_v15 = vld [vmem:[#allocation2 + $0x320] ss:$8 sps:$4 sm:$0xff]  }
 0x17d   : > { %v592_v24 = vmax.f32 %v540_v20, 0.0  ;;  %v6033_v19 = vld [vmem:[#allocation2 + $0x334] ss:$8 sps:$4 sm:$0xff]   ;;  %v6031_v20 = vld [vmem:[#allocation2 + $0x330] ss:$8 sps:$4 sm:$0xff]  }
 0x17e   : > { %v593_v26 = vmax.f32 %v542_v22, 0.0  ;;  %1226 = vmatpush1.bf16.msra.mxu0 %v6019_v10  ;;  %v6036_v21 = vld [vmem:[#allocation2 + $0x344] ss:$8 sps:$4 sm:$0xff]   ;;  %v6034_v22 = vld [vmem:[#allocation2 + $0x340] ss:$8 sps:$4 sm:$0xff]  }
 0x17f   : > { %v614_v27 = vpack.c.bf16 %v592_v24, %v590_v23  ;;  %v6039_v23 = vld [vmem:[#allocation2 + $0x354] ss:$8 sps:$4 sm:$0xff]   ;;  %v6037_v24 = vld [vmem:[#allocation2 + $0x350] ss:$8 sps:$4 sm:$0xff]  }
 0x180   : > { %v615_v28 = vpack.c.bf16 %v593_v26, %v591_v25  ;;  %v545_v29 = vpop.f32.mrb[20].mxu0  ;;  %v6042_v25 = vld [vmem:[#allocation2 + $0x364] ss:$8 sps:$4 sm:$0xff]   ;;  %v6040_v26 = vld [vmem:[#allocation2 + $0x360] ss:$8 sps:$4 sm:$0xff]  }
 0x181   : > { %v546_v30 = vadd.f32 %v545_v29, %v6862_v17  ;;  %v547_v31 = vpop.f32.mrb[21].mxu0  ;;  %v6048_v29 = vld [vmem:[#allocation2 + $0x384] ss:$8 sps:$4 sm:$0xff]  }
 0x182   : > { %v548_v32 = vadd.f32 %v547_v31, %v6865_v18  ;;  %v549_v33 = vpop.f32.mrb[22].mxu0  ;;  %900 = vmatprep.mubr.bf16.mxu1 %v615_v28  ;;  %v6043_v28 = vld [vmem:[#allocation2 + $0x370] ss:$8 sps:$4 sm:$0xff]   ;;  %v6051_v31 = vld [vmem:[#allocation2 + $0x394] ss:$8 sps:$4 sm:$0xff]  }
 0x183   : > { %v550_v34 = vadd.f32 %v549_v33, %v6862_v17  ;;  %v551_v35 = vpop.f32.mrb[23].mxu0  ;;  %901 = vmatmul.mubr.bf16.gmra.mrb[16].mxu1 %v614_v27  ;;  %v594_v37 = vmax.f32 %v546_v30, 0.0  ;;  %v6045_v27 = vld [vmem:[#allocation2 + $0x374] ss:$8 sps:$4 sm:$0xff]   ;;  %v6046_v30 = vld [vmem:[#allocation2 + $0x380] ss:$8 sps:$4 sm:$0xff]  }
 0x184   : > { %v552_v36 = vadd.f32 %v551_v35, %v6865_v18  ;;  %v595_v39 = vmax.f32 %v548_v32, 0.0  ;;  %v6049_v32 = vld [vmem:[#allocation2 + $0x390] ss:$8 sps:$4 sm:$0xff]   ;;  %v6054_v33 = vld [vmem:[#allocation2 + $0x3a4] ss:$8 sps:$4 sm:$0xff]  }
 0x185   : > { %v596_v38 = vmax.f32 %v550_v34, 0.0  ;;  %v6052_v34 = vld [vmem:[#allocation2 + $0x3a0] ss:$8 sps:$4 sm:$0xff]   ;;  %v6057_v35 = vld [vmem:[#allocation2 + $0x3b4] ss:$8 sps:$4 sm:$0xff]  }
 0x186   : > { %v597_v40 = vmax.f32 %v552_v36, 0.0  ;;  %v6055_v36 = vld [vmem:[#allocation2 + $0x3b0] ss:$8 sps:$4 sm:$0xff]  }
 0x187   : > { %v616_v41 = vpack.c.bf16 %v596_v38, %v594_v37  ;;  %v6060_v37 = vld [vmem:[#allocation2 + $0x3c4] ss:$8 sps:$4 sm:$0xff]   ;;  %v6058_v38 = vld [vmem:[#allocation2 + $0x3c0] ss:$8 sps:$4 sm:$0xff]  }
 0x188   : > { %v617_v42 = vpack.c.bf16 %v597_v40, %v595_v39  ;;  %v555_v43 = vpop.f32.mrb[24].mxu0  ;;  %v6063_v39 = vld [vmem:[#allocation2 + $0x3d4] ss:$8 sps:$4 sm:$0xff]   ;;  %v6061_v40 = vld [vmem:[#allocation2 + $0x3d0] ss:$8 sps:$4 sm:$0xff]  }
 0x189   : > { %v556_v44 = vadd.f32 %v555_v43, %v6862_v17  ;;  %v557_v45 = vpop.f32.mrb[25].mxu0 }
 0x18a   : > { %v558_v46 = vadd.f32 %v557_v45, %v6865_v18  ;;  %v559_v47 = vpop.f32.mrb[26].mxu0  ;;  %910 = vmatprep.mubr.bf16.mxu1 %v617_v42 }
 0x18b   : > { %v560_v48 = vadd.f32 %v559_v47, %v6862_v17  ;;  %v561_v49 = vpop.f32.mrb[27].mxu0  ;;  %911 = vmatmul.mubr.bf16.gmra.mrb[20].mxu1 %v616_v41  ;;  %v598_v51 = vmax.f32 %v556_v44, 0.0  ;;  %v656_v41 = vld [vmem:[#allocation4 + $0x2] sm:$0x3] }
 0x18c   : > { %v562_v50 = vadd.f32 %v561_v49, %v6865_v18  ;;  %v599_v53 = vmax.f32 %v558_v46, 0.0  ;;  %v6900_v42 = vrot.slane %v656_v41, %v6857_v14  ;;  %v6903_v43 = vrot.slane %v656_v41, %v6859_v16 }
 0x18d   : > { %v600_v52 = vmax.f32 %v560_v48, 0.0 }
 0x18e   : > { %v601_v54 = vmax.f32 %v562_v50, 0.0 }
 0x18f   : > { %v618_v55 = vpack.c.bf16 %v600_v52, %v598_v51 }
 0x190   : > { %v619_v56 = vpack.c.bf16 %v601_v54, %v599_v53  ;;  %v565_v57 = vpop.f32.mrb[28].mxu0 }
 0x191   : > { %v566_v58 = vadd.f32 %v565_v57, %v6862_v17  ;;  %v567_v59 = vpop.f32.mrb[29].mxu0 }
 0x192   : > { %v568_v60 = vadd.f32 %v567_v59, %v6865_v18  ;;  %v569_v61 = vpop.f32.mrb[30].mxu0  ;;  %920 = vmatprep.mubr.bf16.mxu1 %v619_v56 }
 0x193   : > { %v570_v62 = vadd.f32 %v569_v61, %v6862_v17  ;;  %v571_v63 = vpop.f32.mrb[31].mxu0  ;;  %921 = vmatmul.mubr.bf16.gmra.mrb[24].mxu1 %v618_v55  ;;  %v602_v1 = vmax.f32 %v566_v58, 0.0  ;;  %v6022_v17 = vld [vmem:[#allocation2 + $0x300] ss:$8 sps:$4 sm:$0xff]  }
 0x194   : > { %v572_v0 = vadd.f32 %v571_v63, %v6865_v18  ;;  %v603_v3 = vmax.f32 %v568_v60, 0.0  ;;  %1563 = vmatpush1.bf16.msra.mxu1 %v6022_v17  ;;  %v6025_v18 = vld [vmem:[#allocation2 + $0x310] ss:$8 sps:$4 sm:$0xff]  }
 0x195   : > { %v604_v2 = vmax.f32 %v570_v62, 0.0  ;;  %1564 = vmatprep.subr.bf16.mxu1 %v6027_v12 }
 0x196   : > { %v605_v4 = vmax.f32 %v572_v0, 0.0 }
 0x197   : > { %v620_v5 = vpack.c.bf16 %v604_v2, %v602_v1 }
 0x198   : > { %v621_v6 = vpack.c.bf16 %v605_v4, %v603_v3  ;;  %1565 = vmatpush1.bf16.msra.mxu1 %v6025_v18 }
 0x199   : > { %1566 = vmatprep.subr.bf16.mxu1 %v6030_v13 }
 0x19a   : > { %930 = vmatprep.mubr.bf16.mxu1 %v621_v6 }
 0x19b   : > { %931 = vmatmul.mubr.bf16.gmra.mrb[28].mxu1 %v620_v5 }
 0x19c   : > { %1567 = vmatpush1.bf16.msra.mxu1 %v6028_v15 }
 0x19d   : > { %1568 = vmatprep.subr.bf16.mxu1 %v6033_v19 }
 0x1a0   : > { %1569 = vmatpush1.bf16.msra.mxu1 %v6031_v20 }
 0x1a1   : > { %1570 = vmatprep.subr.bf16.mxu1 %v6036_v21 }
 0x1a4   : > { %1571 = vmatpush1.bf16.msra.mxu1 %v6034_v22 }
 0x1a5   : > { %1572 = vmatprep.subr.bf16.mxu1 %v6039_v23 }
 0x1a8   : > { %1573 = vmatpush1.bf16.msra.mxu1 %v6037_v24 }
 0x1a9   : > { %1574 = vmatprep.subr.bf16.mxu1 %v6042_v25 }
 0x1ac   : > { %1575 = vmatpush1.bf16.msra.mxu1 %v6040_v26 }
 0x1ad   : > { %1576 = vmatprep.subr.bf16.mxu1 %v6045_v27 }
 0x1b0   : > { %1577 = vmatpush1.bf16.msra.mxu1 %v6043_v28 }
 0x1b1   : > { %1578 = vmatprep.subr.bf16.mxu1 %v6048_v29 }
 0x1b4   : > { %1579 = vmatpush1.bf16.msra.mxu1 %v6046_v30 }
 0x1b5   : > { %1580 = vmatprep.subr.bf16.mxu1 %v6051_v31 }
 0x1b8   : > { %1581 = vmatpush1.bf16.msra.mxu1 %v6049_v32 }
 0x1b9   : > { %1582 = vmatprep.subr.bf16.mxu1 %v6054_v33 }
 0x1bc   : > { %1583 = vmatpush1.bf16.msra.mxu1 %v6052_v34 }
 0x1bd   : > { %1584 = vmatprep.subr.bf16.mxu1 %v6057_v35 }
 0x1c0   : > { %1585 = vmatpush1.bf16.msra.mxu1 %v6055_v36 }
 0x1c1   : > { %1586 = vmatprep.subr.bf16.mxu1 %v6060_v37 }
 0x1c4   : > { %1587 = vmatpush1.bf16.msra.mxu1 %v6058_v38 }
 0x1c5   : > { %1588 = vmatprep.subr.bf16.mxu1 %v6063_v39 }
 0x1c8   : > { %1589 = vmatpush1.bf16.msra.mxu1 %v6061_v40 }
 0x236   : > { %v862_v44 = vpop.f32.mrb[0].mxu1 }
 0x237   : > { %v863_v45 = vadd.f32 %v862_v44, %v6900_v42  ;;  %v864_v46 = vpop.f32.mrb[1].mxu1 }
 0x238   : > { %v865_v47 = vadd.f32 %v864_v46, %v6903_v43  ;;  %v866_v48 = vpop.f32.mrb[2].mxu1 }
 0x239   : > { %v867_v49 = vadd.f32 %v866_v48, %v6900_v42  ;;  %v868_v50 = vpop.f32.mrb[3].mxu1  ;;  %v941_v52 = vmax.f32 %v863_v45, 0.0 }
 0x23a   : > { %v869_v51 = vadd.f32 %v868_v50, %v6903_v43  ;;  %v942_v54 = vmax.f32 %v865_v47, 0.0 }
 0x23b   : > { %v943_v53 = vmax.f32 %v867_v49, 0.0 }
 0x23c   : > { %v944_v55 = vmax.f32 %v869_v51, 0.0 }
 0x23d   : > { %v973_v56 = vpack.c.bf16 %v943_v53, %v941_v52 }
 0x23e   : > { %v974_v57 = vpack.c.bf16 %v944_v55, %v942_v54  ;;  %v872_v58 = vpop.f32.mrb[4].mxu1 }
 0x23f   : > { %v873_v59 = vadd.f32 %v872_v58, %v6900_v42  ;;  %v874_v60 = vpop.f32.mrb[5].mxu1 }
 0x240   : > { %v875_v61 = vadd.f32 %v874_v60, %v6903_v43  ;;  %v876_v62 = vpop.f32.mrb[6].mxu1  ;;  %1227 = vmatprep.mubr.bf16.mxu0 %v974_v57 }
 0x241   : > { %v877_v63 = vadd.f32 %v876_v62, %v6900_v42  ;;  %v878_v0 = vpop.f32.mrb[7].mxu1  ;;  %1228 = vmatmul.mubr.bf16.vlgmr.msra.gmra.mrb[32].mxu0 %v973_v56  ;;  %v945_v2 = vmax.f32 %v873_v59, 0.0 }
 0x242   : > { %v879_v1 = vadd.f32 %v878_v0, %v6903_v43  ;;  %v946_v4 = vmax.f32 %v875_v61, 0.0 }
 0x243   : > { %v947_v3 = vmax.f32 %v877_v63, 0.0 }
 0x244   : > { %v948_v5 = vmax.f32 %v879_v1, 0.0 }
 0x245   : > { %v975_v6 = vpack.c.bf16 %v947_v3, %v945_v2 }
 0x246   : > { %v976_v7 = vpack.c.bf16 %v948_v5, %v946_v4  ;;  %v882_v8 = vpop.f32.mrb[8].mxu1 }
 0x247   : > { %v883_v9 = vadd.f32 %v882_v8, %v6900_v42  ;;  %v884_v10 = vpop.f32.mrb[9].mxu1 }
 0x248   : > { %v885_v17 = vadd.f32 %v884_v10, %v6903_v43  ;;  %v886_v11 = vpop.f32.mrb[10].mxu1  ;;  %1237 = vmatprep.mubr.bf16.mxu0 %v976_v7 }
 0x249   : > { %v887_v12 = vadd.f32 %v886_v11, %v6900_v42  ;;  %v888_v18 = vpop.f32.mrb[11].mxu1  ;;  %1238 = vmatmul.mubr.bf16.gmra.mrb[36].mxu0 %v975_v6  ;;  %v949_v15 = vmax.f32 %v883_v9, 0.0 }
 0x24a   : > { %v889_v13 = vadd.f32 %v888_v18, %v6903_v43  ;;  %v950_v20 = vmax.f32 %v885_v17, 0.0 }
 0x24b   : > { %v951_v19 = vmax.f32 %v887_v12, 0.0 }
 0x24c   : > { %v952_v21 = vmax.f32 %v889_v13, 0.0 }
 0x24d   : > { %v977_v22 = vpack.c.bf16 %v951_v19, %v949_v15 }
 0x24e   : > { %v978_v23 = vpack.c.bf16 %v952_v21, %v950_v20  ;;  %v892_v24 = vpop.f32.mrb[12].mxu1 }
 0x24f   : > { %v893_v25 = vadd.f32 %v892_v24, %v6900_v42  ;;  %v894_v26 = vpop.f32.mrb[13].mxu1 }
 0x250   : > { %v895_v27 = vadd.f32 %v894_v26, %v6903_v43  ;;  %v896_v28 = vpop.f32.mrb[14].mxu1  ;;  %1247 = vmatprep.mubr.bf16.mxu0 %v978_v23 }
 0x251   : > { %v897_v29 = vadd.f32 %v896_v28, %v6900_v42  ;;  %v898_v30 = vpop.f32.mrb[15].mxu1  ;;  %1248 = vmatmul.mubr.bf16.gmra.mrb[40].mxu0 %v977_v22  ;;  %v953_v32 = vmax.f32 %v893_v25, 0.0 }
 0x252   : > { %v899_v31 = vadd.f32 %v898_v30, %v6903_v43  ;;  %v954_v34 = vmax.f32 %v895_v27, 0.0 }
 0x253   : > { %v955_v33 = vmax.f32 %v897_v29, 0.0 }
 0x254   : > { %v956_v35 = vmax.f32 %v899_v31, 0.0 }
 0x255   : > { %v979_v36 = vpack.c.bf16 %v955_v33, %v953_v32 }
 0x256   : > { %v980_v37 = vpack.c.bf16 %v956_v35, %v954_v34  ;;  %v902_v38 = vpop.f32.mrb[16].mxu1  ;;  %v6066_v34 = vld [vmem:[#allocation2 + $0x3e4] ss:$8 sps:$4 sm:$0xff]   ;;  %v6064_v35 = vld [vmem:[#allocation2 + $0x3e0] ss:$8 sps:$4 sm:$0xff]  }
 0x257   : > { %v903_v39 = vadd.f32 %v902_v38, %v6900_v42  ;;  %v904_v40 = vpop.f32.mrb[17].mxu1  ;;  %1590 = vmatprep.subr.bf16.mxu1 %v6066_v34  ;;  %v6072_v38 = vld [vmem:[#allocation2 + $0x404] ss:$8 sps:$4 sm:$0xff]  }
 0x258   : > { %v905_v41 = vadd.f32 %v904_v40, %v6903_v43  ;;  %v906_v44 = vpop.f32.mrb[18].mxu1  ;;  %1257 = vmatprep.mubr.bf16.mxu0 %v980_v37  ;;  %1591 = vmatpush1.bf16.msra.mxu1 %v6064_v35  ;;  %v6067_v37 = vld [vmem:[#allocation2 + $0x3f0] ss:$8 sps:$4 sm:$0xff]   ;;  %v6078_v40 = vld [vmem:[#allocation2 + $0x424] ss:$8 sps:$4 sm:$0xff]  }
 0x259   : > { %v907_v45 = vadd.f32 %v906_v44, %v6900_v42  ;;  %v908_v46 = vpop.f32.mrb[19].mxu1  ;;  %1258 = vmatmul.mubr.bf16.gmra.mrb[44].mxu0 %v979_v36  ;;  %v957_v48 = vmax.f32 %v903_v39, 0.0  ;;  %v6069_v36 = vld [vmem:[#allocation2 + $0x3f4] ss:$8 sps:$4 sm:$0xff]   ;;  %1929 = vmatprep.subr.bf16.mxu0 %v6072_v38 }
 0x25a   : > { %v909_v47 = vadd.f32 %v908_v46, %v6903_v43  ;;  %v958_v50 = vmax.f32 %v905_v41, 0.0  ;;  %1592 = vmatprep.subr.bf16.mxu1 %v6069_v36  ;;  %v6075_v39 = vld [vmem:[#allocation2 + $0x414] ss:$8 sps:$4 sm:$0xff]   ;;  %v6076_v41 = vld [vmem:[#allocation2 + $0x420] ss:$8 sps:$4 sm:$0xff]  }
 0x25b   : > { %v959_v49 = vmax.f32 %v907_v45, 0.0  ;;  %v6081_v44 = vld [vmem:[#allocation2 + $0x434] ss:$8 sps:$4 sm:$0xff]   ;;  %v6079_v45 = vld [vmem:[#allocation2 + $0x430] ss:$8 sps:$4 sm:$0xff]  }
 0x25c   : > { %v960_v51 = vmax.f32 %v909_v47, 0.0  ;;  %1593 = vmatpush1.bf16.msra.mxu1 %v6067_v37  ;;  %v6084_v46 = vld [vmem:[#allocation2 + $0x444] ss:$8 sps:$4 sm:$0xff]   ;;  %v6082_v47 = vld [vmem:[#allocation2 + $0x440] ss:$8 sps:$4 sm:$0xff]  }
 0x25d   : > { %v981_v52 = vpack.c.bf16 %v959_v49, %v957_v48  ;;  %v6087_v48 = vld [vmem:[#allocation2 + $0x454] ss:$8 sps:$4 sm:$0xff]   ;;  %v6085_v49 = vld [vmem:[#allocation2 + $0x450] ss:$8 sps:$4 sm:$0xff]  }
 0x25e   : > { %v982_v53 = vpack.c.bf16 %v960_v51, %v958_v50  ;;  %v912_v54 = vpop.f32.mrb[20].mxu1  ;;  %v6090_v50 = vld [vmem:[#allocation2 + $0x464] ss:$8 sps:$4 sm:$0xff]   ;;  %v6088_v51 = vld [vmem:[#allocation2 + $0x460] ss:$8 sps:$4 sm:$0xff]  }
 0x25f   : > { %v913_v55 = vadd.f32 %v912_v54, %v6900_v42  ;;  %v914_v56 = vpop.f32.mrb[21].mxu1  ;;  %v6096_v54 = vld [vmem:[#allocation2 + $0x484] ss:$8 sps:$4 sm:$0xff]  }
 0x260   : > { %v915_v57 = vadd.f32 %v914_v56, %v6903_v43  ;;  %v916_v58 = vpop.f32.mrb[22].mxu1  ;;  %1267 = vmatprep.mubr.bf16.mxu0 %v982_v53  ;;  %v6091_v53 = vld [vmem:[#allocation2 + $0x470] ss:$8 sps:$4 sm:$0xff]   ;;  %v6099_v56 = vld [vmem:[#allocation2 + $0x494] ss:$8 sps:$4 sm:$0xff]  }
 0x261   : > { %v917_v59 = vadd.f32 %v916_v58, %v6900_v42  ;;  %v918_v60 = vpop.f32.mrb[23].mxu1  ;;  %1268 = vmatmul.mubr.bf16.gmra.mrb[48].mxu0 %v981_v52  ;;  %v961_v62 = vmax.f32 %v913_v55, 0.0  ;;  %v6093_v52 = vld [vmem:[#allocation2 + $0x474] ss:$8 sps:$4 sm:$0xff]   ;;  %v6094_v55 = vld [vmem:[#allocation2 + $0x480] ss:$8 sps:$4 sm:$0xff]  }
 0x262   : > { %v919_v61 = vadd.f32 %v918_v60, %v6903_v43  ;;  %v962_v0 = vmax.f32 %v915_v57, 0.0  ;;  %v6097_v57 = vld [vmem:[#allocation2 + $0x490] ss:$8 sps:$4 sm:$0xff]   ;;  %v6102_v58 = vld [vmem:[#allocation2 + $0x4a4] ss:$8 sps:$4 sm:$0xff]  }
 0x263   : > { %v963_v63 = vmax.f32 %v917_v59, 0.0  ;;  %v6100_v59 = vld [vmem:[#allocation2 + $0x4a0] ss:$8 sps:$4 sm:$0xff]   ;;  %v6105_v60 = vld [vmem:[#allocation2 + $0x4b4] ss:$8 sps:$4 sm:$0xff]  }
 0x264   : > { %v964_v1 = vmax.f32 %v919_v61, 0.0  ;;  %v6103_v61 = vld [vmem:[#allocation2 + $0x4b0] ss:$8 sps:$4 sm:$0xff]  }
 0x265   : > { %v983_v2 = vpack.c.bf16 %v963_v63, %v961_v62  ;;  %v6108_v62 = vld [vmem:[#allocation2 + $0x4c4] ss:$8 sps:$4 sm:$0xff]   ;;  %v6106_v63 = vld [vmem:[#allocation2 + $0x4c0] ss:$8 sps:$4 sm:$0xff]  }
 0x266   : > { %v984_v3 = vpack.c.bf16 %v964_v1, %v962_v0  ;;  %v922_v4 = vpop.f32.mrb[24].mxu1  ;;  %v6111_v0 = vld [vmem:[#allocation2 + $0x4d4] ss:$8 sps:$4 sm:$0xff]   ;;  %v6109_v1 = vld [vmem:[#allocation2 + $0x4d0] ss:$8 sps:$4 sm:$0xff]  }
 0x267   : > { %v923_v5 = vadd.f32 %v922_v4, %v6900_v42  ;;  %v924_v6 = vpop.f32.mrb[25].mxu1 }
 0x268   : > { %v925_v7 = vadd.f32 %v924_v6, %v6903_v43  ;;  %v926_v8 = vpop.f32.mrb[26].mxu1  ;;  %1277 = vmatprep.mubr.bf16.mxu0 %v984_v3 }
 0x269   : > { %v927_v9 = vadd.f32 %v926_v8, %v6900_v42  ;;  %v928_v10 = vpop.f32.mrb[27].mxu1  ;;  %1278 = vmatmul.mubr.bf16.gmra.mrb[52].mxu0 %v983_v2  ;;  %v965_v11 = vmax.f32 %v923_v5, 0.0  ;;  %v1023_v2 = vld [vmem:[#allocation4 + $0x4] sm:$0x3] }
 0x26a   : > { %v929_v17 = vadd.f32 %v928_v10, %v6903_v43  ;;  %v966_v18 = vmax.f32 %v925_v7, 0.0  ;;  %v6938_v3 = vrot.slane %v1023_v2, %v6857_v14  ;;  %v6941_v4 = vrot.slane %v1023_v2, %v6859_v16 }
 0x26b   : > { %v967_v12 = vmax.f32 %v927_v9, 0.0 }
 0x26c   : > { %v968_v13 = vmax.f32 %v929_v17, 0.0 }
 0x26d   : > { %v985_v15 = vpack.c.bf16 %v967_v12, %v965_v11 }
 0x26e   : > { %v986_v19 = vpack.c.bf16 %v968_v13, %v966_v18  ;;  %v932_v20 = vpop.f32.mrb[28].mxu1 }
 0x26f   : > { %v933_v21 = vadd.f32 %v932_v20, %v6900_v42  ;;  %v934_v22 = vpop.f32.mrb[29].mxu1 }
 0x270   : > { %v935_v23 = vadd.f32 %v934_v22, %v6903_v43  ;;  %v936_v24 = vpop.f32.mrb[30].mxu1  ;;  %1287 = vmatprep.mubr.bf16.mxu0 %v986_v19 }
 0x271   : > { %v937_v25 = vadd.f32 %v936_v24, %v6900_v42  ;;  %v938_v26 = vpop.f32.mrb[31].mxu1  ;;  %1288 = vmatmul.mubr.bf16.gmra.mrb[56].mxu0 %v985_v15  ;;  %v969_v28 = vmax.f32 %v933_v21, 0.0  ;;  %v6070_v42 = vld [vmem:[#allocation2 + $0x400] ss:$8 sps:$4 sm:$0xff]  }
 0x272   : > { %v939_v27 = vadd.f32 %v938_v26, %v6903_v43  ;;  %v970_v30 = vmax.f32 %v935_v23, 0.0  ;;  %1930 = vmatpush1.bf16.msra.mxu0 %v6070_v42  ;;  %v6073_v43 = vld [vmem:[#allocation2 + $0x410] ss:$8 sps:$4 sm:$0xff]  }
 0x273   : > { %v971_v29 = vmax.f32 %v937_v25, 0.0  ;;  %1931 = vmatprep.subr.bf16.mxu0 %v6075_v39 }
 0x274   : > { %v972_v31 = vmax.f32 %v939_v27, 0.0 }
 0x275   : > { %v987_v32 = vpack.c.bf16 %v971_v29, %v969_v28 }
 0x276   : > { %v988_v33 = vpack.c.bf16 %v972_v31, %v970_v30  ;;  %1932 = vmatpush1.bf16.msra.mxu0 %v6073_v43 }
 0x277   : > { %1933 = vmatprep.subr.bf16.mxu0 %v6078_v40 }
 0x278   : > { %1297 = vmatprep.mubr.bf16.mxu0 %v988_v33 }
 0x279   : > { %1298 = vmatmul.mubr.bf16.gmra.mrb[60].mxu0 %v987_v32 }
 0x27a   : > { %1934 = vmatpush1.bf16.msra.mxu0 %v6076_v41 }
 0x27b   : > { %1935 = vmatprep.subr.bf16.mxu0 %v6081_v44 }
 0x27e   : > { %1936 = vmatpush1.bf16.msra.mxu0 %v6079_v45 }
 0x27f   : > { %1937 = vmatprep.subr.bf16.mxu0 %v6084_v46 }
 0x282   : > { %1938 = vmatpush1.bf16.msra.mxu0 %v6082_v47 }
 0x283   : > { %1939 = vmatprep.subr.bf16.mxu0 %v6087_v48 }
 0x286   : > { %1940 = vmatpush1.bf16.msra.mxu0 %v6085_v49 }
 0x287   : > { %1941 = vmatprep.subr.bf16.mxu0 %v6090_v50 }
 0x28a   : > { %1942 = vmatpush1.bf16.msra.mxu0 %v6088_v51 }
 0x28b   : > { %1943 = vmatprep.subr.bf16.mxu0 %v6093_v52 }
 0x28e   : > { %1944 = vmatpush1.bf16.msra.mxu0 %v6091_v53 }
 0x28f   : > { %1945 = vmatprep.subr.bf16.mxu0 %v6096_v54 }
 0x292   : > { %1946 = vmatpush1.bf16.msra.mxu0 %v6094_v55 }
 0x293   : > { %1947 = vmatprep.subr.bf16.mxu0 %v6099_v56 }
 0x296   : > { %1948 = vmatpush1.bf16.msra.mxu0 %v6097_v57 }
 0x297   : > { %1949 = vmatprep.subr.bf16.mxu0 %v6102_v58 }
 0x29a   : > { %1950 = vmatpush1.bf16.msra.mxu0 %v6100_v59 }
 0x29b   : > { %1951 = vmatprep.subr.bf16.mxu0 %v6105_v60 }
 0x29e   : > { %1952 = vmatpush1.bf16.msra.mxu0 %v6103_v61 }
 0x29f   : > { %1953 = vmatprep.subr.bf16.mxu0 %v6108_v62 }
 0x2a2   : > { %1954 = vmatpush1.bf16.msra.mxu0 %v6106_v63 }
 0x2a3   : > { %1955 = vmatprep.subr.bf16.mxu0 %v6111_v0 }
 0x2a6   : > { %1956 = vmatpush1.bf16.msra.mxu0 %v6109_v1 }
 0x314   : > { %v1229_v5 = vpop.f32.mrb[32].mxu0 }
 0x315   : > { %v1230_v6 = vadd.f32 %v1229_v5, %v6938_v3  ;;  %v1231_v7 = vpop.f32.mrb[33].mxu0 }
 0x316   : > { %v1232_v8 = vadd.f32 %v1231_v7, %v6941_v4  ;;  %v1233_v9 = vpop.f32.mrb[34].mxu0 }
 0x317   : > { %v1234_v10 = vadd.f32 %v1233_v9, %v6938_v3  ;;  %v1235_v17 = vpop.f32.mrb[35].mxu0  ;;  %v1308_v12 = vmax.f32 %v1230_v6, 0.0 }
 0x318   : > { %v1236_v11 = vadd.f32 %v1235_v17, %v6941_v4  ;;  %v1309_v13 = vmax.f32 %v1232_v8, 0.0 }
 0x319   : > { %v1310_v18 = vmax.f32 %v1234_v10, 0.0 }
 0x31a   : > { %v1311_v15 = vmax.f32 %v1236_v11, 0.0 }
 0x31b   : > { %v1340_v19 = vpack.c.bf16 %v1310_v18, %v1308_v12 }
 0x31c   : > { %v1341_v20 = vpack.c.bf16 %v1311_v15, %v1309_v13  ;;  %v1239_v21 = vpop.f32.mrb[36].mxu0 }
 0x31d   : > { %v1240_v22 = vadd.f32 %v1239_v21, %v6938_v3  ;;  %v1241_v23 = vpop.f32.mrb[37].mxu0 }
 0x31e   : > { %v1242_v24 = vadd.f32 %v1241_v23, %v6941_v4  ;;  %v1243_v25 = vpop.f32.mrb[38].mxu0  ;;  %1594 = vmatprep.mubr.bf16.mxu1 %v1341_v20 }
 0x31f   : > { %v1244_v26 = vadd.f32 %v1243_v25, %v6938_v3  ;;  %v1245_v27 = vpop.f32.mrb[39].mxu0  ;;  %1595 = vmatmul.mubr.bf16.vlgmr.msra.gmra.mrb[32].mxu1 %v1340_v19  ;;  %v1312_v29 = vmax.f32 %v1240_v22, 0.0 }
 0x320   : > { %v1246_v28 = vadd.f32 %v1245_v27, %v6941_v4  ;;  %v1313_v31 = vmax.f32 %v1242_v24, 0.0 }
 0x321   : > { %v1314_v30 = vmax.f32 %v1244_v26, 0.0 }
 0x322   : > { %v1315_v32 = vmax.f32 %v1246_v28, 0.0 }
 0x323   : > { %v1342_v33 = vpack.c.bf16 %v1314_v30, %v1312_v29 }
 0x324   : > { %v1343_v34 = vpack.c.bf16 %v1315_v32, %v1313_v31  ;;  %v1249_v35 = vpop.f32.mrb[40].mxu0 }
 0x325   : > { %v1250_v36 = vadd.f32 %v1249_v35, %v6938_v3  ;;  %v1251_v37 = vpop.f32.mrb[41].mxu0 }
 0x326   : > { %v1252_v42 = vadd.f32 %v1251_v37, %v6941_v4  ;;  %v1253_v38 = vpop.f32.mrb[42].mxu0  ;;  %1604 = vmatprep.mubr.bf16.mxu1 %v1343_v34 }
 0x327   : > { %v1254_v39 = vadd.f32 %v1253_v38, %v6938_v3  ;;  %v1255_v43 = vpop.f32.mrb[43].mxu0  ;;  %1605 = vmatmul.mubr.bf16.gmra.mrb[36].mxu1 %v1342_v33  ;;  %v1316_v41 = vmax.f32 %v1250_v36, 0.0 }
 0x328   : > { %v1256_v40 = vadd.f32 %v1255_v43, %v6941_v4  ;;  %v1317_v45 = vmax.f32 %v1252_v42, 0.0 }
 0x329   : > { %v1318_v44 = vmax.f32 %v1254_v39, 0.0 }
 0x32a   : > { %v1319_v46 = vmax.f32 %v1256_v40, 0.0 }
 0x32b   : > { %v1344_v47 = vpack.c.bf16 %v1318_v44, %v1316_v41 }
 0x32c   : > { %v1345_v48 = vpack.c.bf16 %v1319_v46, %v1317_v45  ;;  %v1259_v49 = vpop.f32.mrb[44].mxu0 }
 0x32d   : > { %v1260_v50 = vadd.f32 %v1259_v49, %v6938_v3  ;;  %v1261_v51 = vpop.f32.mrb[45].mxu0 }
 0x32e   : > { %v1262_v52 = vadd.f32 %v1261_v51, %v6941_v4  ;;  %v1263_v53 = vpop.f32.mrb[46].mxu0  ;;  %1614 = vmatprep.mubr.bf16.mxu1 %v1345_v48 }
 0x32f   : > { %v1264_v54 = vadd.f32 %v1263_v53, %v6938_v3  ;;  %v1265_v55 = vpop.f32.mrb[47].mxu0  ;;  %1615 = vmatmul.mubr.bf16.gmra.mrb[40].mxu1 %v1344_v47  ;;  %v1320_v57 = vmax.f32 %v1260_v50, 0.0 }
 0x330   : > { %v1266_v56 = vadd.f32 %v1265_v55, %v6941_v4  ;;  %v1321_v59 = vmax.f32 %v1262_v52, 0.0 }
 0x331   : > { %v1322_v58 = vmax.f32 %v1264_v54, 0.0 }
 0x332   : > { %v1323_v60 = vmax.f32 %v1266_v56, 0.0 }
 0x333   : > { %v1346_v61 = vpack.c.bf16 %v1322_v58, %v1320_v57 }
 0x334   : > { %v1347_v62 = vpack.c.bf16 %v1323_v60, %v1321_v59  ;;  %v1269_v63 = vpop.f32.mrb[48].mxu0  ;;  %v6114_v59 = vld [vmem:[#allocation2 + $0x4e4] ss:$8 sps:$4 sm:$0xff]   ;;  %v6112_v60 = vld [vmem:[#allocation2 + $0x4e0] ss:$8 sps:$4 sm:$0xff]  }
 0x335   : > { %v1270_v0 = vadd.f32 %v1269_v63, %v6938_v3  ;;  %v1271_v1 = vpop.f32.mrb[49].mxu0  ;;  %1957 = vmatprep.subr.bf16.mxu0 %v6114_v59  ;;  %v6120_v63 = vld [vmem:[#allocation2 + $0x504] ss:$8 sps:$4 sm:$0xff]  }
 0x336   : > { %v1272_v2 = vadd.f32 %v1271_v1, %v6941_v4  ;;  %v1273_v5 = vpop.f32.mrb[50].mxu0  ;;  %1624 = vmatprep.mubr.bf16.mxu1 %v1347_v62  ;;  %1958 = vmatpush1.bf16.msra.mxu0 %v6112_v60  ;;  %v6115_v62 = vld [vmem:[#allocation2 + $0x4f0] ss:$8 sps:$4 sm:$0xff]   ;;  %v6126_v1 = vld [vmem:[#allocation2 + $0x524] ss:$8 sps:$4 sm:$0xff]  }
 0x337   : > { %v1274_v6 = vadd.f32 %v1273_v5, %v6938_v3  ;;  %v1275_v7 = vpop.f32.mrb[51].mxu0  ;;  %1625 = vmatmul.mubr.bf16.gmra.mrb[44].mxu1 %v1346_v61  ;;  %v1324_v9 = vmax.f32 %v1270_v0, 0.0  ;;  %v6117_v61 = vld [vmem:[#allocation2 + $0x4f4] ss:$8 sps:$4 sm:$0xff]   ;;  %2296 = vmatprep.subr.bf16.mxu1 %v6120_v63 }
 0x338   : > { %v1276_v8 = vadd.f32 %v1275_v7, %v6941_v4  ;;  %v1325_v17 = vmax.f32 %v1272_v2, 0.0  ;;  %1959 = vmatprep.subr.bf16.mxu0 %v6117_v61  ;;  %v6123_v0 = vld [vmem:[#allocation2 + $0x514] ss:$8 sps:$4 sm:$0xff]   ;;  %v6124_v2 = vld [vmem:[#allocation2 + $0x520] ss:$8 sps:$4 sm:$0xff]  }
 0x339   : > { %v1326_v10 = vmax.f32 %v1274_v6, 0.0  ;;  %v6129_v5 = vld [vmem:[#allocation2 + $0x534] ss:$8 sps:$4 sm:$0xff]   ;;  %v6127_v6 = vld [vmem:[#allocation2 + $0x530] ss:$8 sps:$4 sm:$0xff]  }
 0x33a   : > { %v1327_v11 = vmax.f32 %v1276_v8, 0.0  ;;  %1960 = vmatpush1.bf16.msra.mxu0 %v6115_v62  ;;  %v6132_v7 = vld [vmem:[#allocation2 + $0x544] ss:$8 sps:$4 sm:$0xff]   ;;  %v6130_v8 = vld [vmem:[#allocation2 + $0x540] ss:$8 sps:$4 sm:$0xff]  }
 0x33b   : > { %v1348_v12 = vpack.c.bf16 %v1326_v10, %v1324_v9  ;;  %v6135_v9 = vld [vmem:[#allocation2 + $0x554] ss:$8 sps:$4 sm:$0xff]   ;;  %v6133_v10 = vld [vmem:[#allocation2 + $0x550] ss:$8 sps:$4 sm:$0xff]  }
 0x33c   : > { %v1349_v18 = vpack.c.bf16 %v1327_v11, %v1325_v17  ;;  %v1279_v13 = vpop.f32.mrb[52].mxu0  ;;  %v6138_v17 = vld [vmem:[#allocation2 + $0x564] ss:$8 sps:$4 sm:$0xff]   ;;  %v6136_v11 = vld [vmem:[#allocation2 + $0x560] ss:$8 sps:$4 sm:$0xff]  }
 0x33d   : > { %v1280_v15 = vadd.f32 %v1279_v13, %v6938_v3  ;;  %v1281_v19 = vpop.f32.mrb[53].mxu0  ;;  %v6144_v13 = vld [vmem:[#allocation2 + $0x584] ss:$8 sps:$4 sm:$0xff]  }
 0x33e   : > { %v1282_v20 = vadd.f32 %v1281_v19, %v6941_v4  ;;  %v1283_v21 = vpop.f32.mrb[54].mxu0  ;;  %1634 = vmatprep.mubr.bf16.mxu1 %v1349_v18  ;;  %v6139_v18 = vld [vmem:[#allocation2 + $0x570] ss:$8 sps:$4 sm:$0xff]   ;;  %v6147_v19 = vld [vmem:[#allocation2 + $0x594] ss:$8 sps:$4 sm:$0xff]  }
 0x33f   : > { %v1284_v22 = vadd.f32 %v1283_v21, %v6938_v3  ;;  %v1285_v23 = vpop.f32.mrb[55].mxu0  ;;  %1635 = vmatmul.mubr.bf16.gmra.mrb[48].mxu1 %v1348_v12  ;;  %v1328_v25 = vmax.f32 %v1280_v15, 0.0  ;;  %v6141_v12 = vld [vmem:[#allocation2 + $0x574] ss:$8 sps:$4 sm:$0xff]   ;;  %v6142_v15 = vld [vmem:[#allocation2 + $0x580] ss:$8 sps:$4 sm:$0xff]  }
 0x340   : > { %v1286_v24 = vadd.f32 %v1285_v23, %v6941_v4  ;;  %v1329_v27 = vmax.f32 %v1282_v20, 0.0  ;;  %v6145_v20 = vld [vmem:[#allocation2 + $0x590] ss:$8 sps:$4 sm:$0xff]   ;;  %v6150_v21 = vld [vmem:[#allocation2 + $0x5a4] ss:$8 sps:$4 sm:$0xff]  }
 0x341   : > { %v1330_v26 = vmax.f32 %v1284_v22, 0.0  ;;  %v6148_v22 = vld [vmem:[#allocation2 + $0x5a0] ss:$8 sps:$4 sm:$0xff]   ;;  %v6153_v23 = vld [vmem:[#allocation2 + $0x5b4] ss:$8 sps:$4 sm:$0xff]  }
 0x342   : > { %v1331_v28 = vmax.f32 %v1286_v24, 0.0  ;;  %v6151_v24 = vld [vmem:[#allocation2 + $0x5b0] ss:$8 sps:$4 sm:$0xff]  }
 0x343   : > { %v1350_v29 = vpack.c.bf16 %v1330_v26, %v1328_v25  ;;  %v6156_v25 = vld [vmem:[#allocation2 + $0x5c4] ss:$8 sps:$4 sm:$0xff]   ;;  %v6154_v26 = vld [vmem:[#allocation2 + $0x5c0] ss:$8 sps:$4 sm:$0xff]  }
 0x344   : > { %v1351_v30 = vpack.c.bf16 %v1331_v28, %v1329_v27  ;;  %v1289_v31 = vpop.f32.mrb[56].mxu0  ;;  %v6159_v27 = vld [vmem:[#allocation2 + $0x5d4] ss:$8 sps:$4 sm:$0xff]   ;;  %v6157_v28 = vld [vmem:[#allocation2 + $0x5d0] ss:$8 sps:$4 sm:$0xff]  }
 0x345   : > { %v1290_v32 = vadd.f32 %v1289_v31, %v6938_v3  ;;  %v1291_v33 = vpop.f32.mrb[57].mxu0 }
 0x346   : > { %v1292_v34 = vadd.f32 %v1291_v33, %v6941_v4  ;;  %v1293_v35 = vpop.f32.mrb[58].mxu0  ;;  %1644 = vmatprep.mubr.bf16.mxu1 %v1351_v30 }
 0x347   : > { %v1294_v36 = vadd.f32 %v1293_v35, %v6938_v3  ;;  %v1295_v37 = vpop.f32.mrb[59].mxu0  ;;  %1645 = vmatmul.mubr.bf16.gmra.mrb[52].mxu1 %v1350_v29  ;;  %v1332_v38 = vmax.f32 %v1290_v32, 0.0  ;;  %v1390_v29 = vld [vmem:[#allocation4 + $0x6] sm:$0x3] }
 0x348   : > { %v1296_v42 = vadd.f32 %v1295_v37, %v6941_v4  ;;  %v1333_v43 = vmax.f32 %v1292_v34, 0.0  ;;  %v6976_v30 = vrot.slane %v1390_v29, %v6857_v14  ;;  %v6979_v31 = vrot.slane %v1390_v29, %v6859_v16 }
 0x349   : > { %v1334_v39 = vmax.f32 %v1294_v36, 0.0 }
 0x34a   : > { %v1335_v40 = vmax.f32 %v1296_v42, 0.0 }
 0x34b   : > { %v1352_v41 = vpack.c.bf16 %v1334_v39, %v1332_v38 }
 0x34c   : > { %v1353_v44 = vpack.c.bf16 %v1335_v40, %v1333_v43  ;;  %v1299_v45 = vpop.f32.mrb[60].mxu0 }
 0x34d   : > { %v1300_v46 = vadd.f32 %v1299_v45, %v6938_v3  ;;  %v1301_v47 = vpop.f32.mrb[61].mxu0 }
 0x34e   : > { %v1302_v48 = vadd.f32 %v1301_v47, %v6941_v4  ;;  %v1303_v49 = vpop.f32.mrb[62].mxu0  ;;  %1654 = vmatprep.mubr.bf16.mxu1 %v1353_v44 }
 0x34f   : > { %v1304_v50 = vadd.f32 %v1303_v49, %v6938_v3  ;;  %v1305_v51 = vpop.f32.mrb[63].mxu0  ;;  %1655 = vmatmul.mubr.bf16.gmra.mrb[56].mxu1 %v1352_v41  ;;  %v1336_v53 = vmax.f32 %v1300_v46, 0.0  ;;  %v6118_v3 = vld [vmem:[#allocation2 + $0x500] ss:$8 sps:$4 sm:$0xff]  }
 0x350   : > { %v1306_v52 = vadd.f32 %v1305_v51, %v6941_v4  ;;  %v1337_v55 = vmax.f32 %v1302_v48, 0.0  ;;  %2297 = vmatpush1.bf16.msra.mxu1 %v6118_v3  ;;  %v6121_v4 = vld [vmem:[#allocation2 + $0x510] ss:$8 sps:$4 sm:$0xff]  }
 0x351   : > { %v1338_v54 = vmax.f32 %v1304_v50, 0.0  ;;  %2298 = vmatprep.subr.bf16.mxu1 %v6123_v0 }
 0x352   : > { %v1339_v56 = vmax.f32 %v1306_v52, 0.0 }
 0x353   : > { %v1354_v57 = vpack.c.bf16 %v1338_v54, %v1336_v53 }
 0x354   : > { %v1355_v58 = vpack.c.bf16 %v1339_v56, %v1337_v55  ;;  %2299 = vmatpush1.bf16.msra.mxu1 %v6121_v4 }
 0x355   : > { %2300 = vmatprep.subr.bf16.mxu1 %v6126_v1 }
 0x356   : > { %1664 = vmatprep.mubr.bf16.mxu1 %v1355_v58 }
 0x357   : > { %1665 = vmatmul.mubr.bf16.gmra.mrb[60].mxu1 %v1354_v57 }
 0x358   : > { %2301 = vmatpush1.bf16.msra.mxu1 %v6124_v2 }
 0x359   : > { %2302 = vmatprep.subr.bf16.mxu1 %v6129_v5 }
 0x35c   : > { %2303 = vmatpush1.bf16.msra.mxu1 %v6127_v6 }
 0x35d   : > { %2304 = vmatprep.subr.bf16.mxu1 %v6132_v7 }
 0x360   : > { %2305 = vmatpush1.bf16.msra.mxu1 %v6130_v8 }
 0x361   : > { %2306 = vmatprep.subr.bf16.mxu1 %v6135_v9 }
 0x364   : > { %2307 = vmatpush1.bf16.msra.mxu1 %v6133_v10 }
 0x365   : > { %2308 = vmatprep.subr.bf16.mxu1 %v6138_v17 }
 0x368   : > { %2309 = vmatpush1.bf16.msra.mxu1 %v6136_v11 }
 0x369   : > { %2310 = vmatprep.subr.bf16.mxu1 %v6141_v12 }
 0x36c   : > { %2311 = vmatpush1.bf16.msra.mxu1 %v6139_v18 }
 0x36d   : > { %2312 = vmatprep.subr.bf16.mxu1 %v6144_v13 }
 0x370   : > { %2313 = vmatpush1.bf16.msra.mxu1 %v6142_v15 }
 0x371   : > { %2314 = vmatprep.subr.bf16.mxu1 %v6147_v19 }
 0x374   : > { %2315 = vmatpush1.bf16.msra.mxu1 %v6145_v20 }
 0x375   : > { %2316 = vmatprep.subr.bf16.mxu1 %v6150_v21 }
 0x378   : > { %2317 = vmatpush1.bf16.msra.mxu1 %v6148_v22 }
 0x379   : > { %2318 = vmatprep.subr.bf16.mxu1 %v6153_v23 }
 0x37c   : > { %2319 = vmatpush1.bf16.msra.mxu1 %v6151_v24 }
 0x37d   : > { %2320 = vmatprep.subr.bf16.mxu1 %v6156_v25 }
 0x380   : > { %2321 = vmatpush1.bf16.msra.mxu1 %v6154_v26 }
 0x381   : > { %2322 = vmatprep.subr.bf16.mxu1 %v6159_v27 }
 0x384   : > { %2323 = vmatpush1.bf16.msra.mxu1 %v6157_v28 }
 0x3f2   : > { %v1596_v32 = vpop.f32.mrb[32].mxu1 }
 0x3f3   : > { %v1597_v33 = vadd.f32 %v1596_v32, %v6976_v30  ;;  %v1598_v34 = vpop.f32.mrb[33].mxu1 }
 0x3f4   : > { %v1599_v35 = vadd.f32 %v1598_v34, %v6979_v31  ;;  %v1600_v36 = vpop.f32.mrb[34].mxu1 }
 0x3f5   : > { %v1601_v37 = vadd.f32 %v1600_v36, %v6976_v30  ;;  %v1602_v42 = vpop.f32.mrb[35].mxu1  ;;  %v1675_v39 = vmax.f32 %v1597_v33, 0.0 }
 0x3f6   : > { %v1603_v38 = vadd.f32 %v1602_v42, %v6979_v31  ;;  %v1676_v40 = vmax.f32 %v1599_v35, 0.0 }
 0x3f7   : > { %v1677_v43 = vmax.f32 %v1601_v37, 0.0 }
 0x3f8   : > { %v1678_v41 = vmax.f32 %v1603_v38, 0.0 }
 0x3f9   : > { %v1707_v44 = vpack.c.bf16 %v1677_v43, %v1675_v39 }
 0x3fa   : > { %v1708_v45 = vpack.c.bf16 %v1678_v41, %v1676_v40  ;;  %v1606_v46 = vpop.f32.mrb[36].mxu1 }
 0x3fb   : > { %v1607_v47 = vadd.f32 %v1606_v46, %v6976_v30  ;;  %v1608_v48 = vpop.f32.mrb[37].mxu1 }
 0x3fc   : > { %v1609_v49 = vadd.f32 %v1608_v48, %v6979_v31  ;;  %v1610_v50 = vpop.f32.mrb[38].mxu1  ;;  %1961 = vmatprep.mubr.bf16.mxu0 %v1708_v45 }
 0x3fd   : > { %v1611_v51 = vadd.f32 %v1610_v50, %v6976_v30  ;;  %v1612_v52 = vpop.f32.mrb[39].mxu1  ;;  %1962 = vmatmul.mubr.bf16.vlgmr.msra.gmra.mrb[64].mxu0 %v1707_v44  ;;  %v1679_v54 = vmax.f32 %v1607_v47, 0.0 }
 0x3fe   : > { %v1613_v53 = vadd.f32 %v1612_v52, %v6979_v31  ;;  %v1680_v56 = vmax.f32 %v1609_v49, 0.0 }
 0x3ff   : > { %v1681_v55 = vmax.f32 %v1611_v51, 0.0 }
 0x400   : > { %v1682_v57 = vmax.f32 %v1613_v53, 0.0 }
 0x401   : > { %v1709_v58 = vpack.c.bf16 %v1681_v55, %v1679_v54 }
 0x402   : > { %v1710_v59 = vpack.c.bf16 %v1682_v57, %v1680_v56  ;;  %v1616_v60 = vpop.f32.mrb[40].mxu1 }
 0x403   : > { %v1617_v61 = vadd.f32 %v1616_v60, %v6976_v30  ;;  %v1618_v62 = vpop.f32.mrb[41].mxu1 }
 0x404   : > { %v1619_v3 = vadd.f32 %v1618_v62, %v6979_v31  ;;  %v1620_v63 = vpop.f32.mrb[42].mxu1  ;;  %1971 = vmatprep.mubr.bf16.mxu0 %v1710_v59 }
 0x405   : > { %v1621_v0 = vadd.f32 %v1620_v63, %v6976_v30  ;;  %v1622_v4 = vpop.f32.mrb[43].mxu1  ;;  %1972 = vmatmul.mubr.bf16.gmra.mrb[68].mxu0 %v1709_v58  ;;  %v1683_v2 = vmax.f32 %v1617_v61, 0.0 }
 0x406   : > { %v1623_v1 = vadd.f32 %v1622_v4, %v6979_v31  ;;  %v1684_v6 = vmax.f32 %v1619_v3, 0.0 }
 0x407   : > { %v1685_v5 = vmax.f32 %v1621_v0, 0.0 }
 0x408   : > { %v1686_v7 = vmax.f32 %v1623_v1, 0.0 }
 0x409   : > { %v1711_v8 = vpack.c.bf16 %v1685_v5, %v1683_v2 }
 0x40a   : > { %v1712_v9 = vpack.c.bf16 %v1686_v7, %v1684_v6  ;;  %v1626_v10 = vpop.f32.mrb[44].mxu1 }
 0x40b   : > { %v1627_v17 = vadd.f32 %v1626_v10, %v6976_v30  ;;  %v1628_v11 = vpop.f32.mrb[45].mxu1 }
 0x40c   : > { %v1629_v12 = vadd.f32 %v1628_v11, %v6979_v31  ;;  %v1630_v18 = vpop.f32.mrb[46].mxu1  ;;  %1981 = vmatprep.mubr.bf16.mxu0 %v1712_v9 }
 0x40d   : > { %v1631_v13 = vadd.f32 %v1630_v18, %v6976_v30  ;;  %v1632_v15 = vpop.f32.mrb[47].mxu1  ;;  %1982 = vmatmul.mubr.bf16.gmra.mrb[72].mxu0 %v1711_v8  ;;  %v1687_v20 = vmax.f32 %v1627_v17, 0.0 }
 0x40e   : > { %v1633_v19 = vadd.f32 %v1632_v15, %v6979_v31  ;;  %v1688_v22 = vmax.f32 %v1629_v12, 0.0 }
 0x40f   : > { %v1689_v21 = vmax.f32 %v1631_v13, 0.0 }
 0x410   : > { %v1690_v23 = vmax.f32 %v1633_v19, 0.0 }
 0x411   : > { %v1713_v24 = vpack.c.bf16 %v1689_v21, %v1687_v20 }
 0x412   : > { %v1714_v25 = vpack.c.bf16 %v1690_v23, %v1688_v22  ;;  %v1636_v26 = vpop.f32.mrb[48].mxu1  ;;  %v6162_v22 = vld [vmem:[#allocation2 + $0x5e4] ss:$8 sps:$4 sm:$0xff]   ;;  %v6160_v23 = vld [vmem:[#allocation2 + $0x5e0] ss:$8 sps:$4 sm:$0xff]  }
 0x413   : > { %v1637_v27 = vadd.f32 %v1636_v26, %v6976_v30  ;;  %v1638_v28 = vpop.f32.mrb[49].mxu1  ;;  %2324 = vmatprep.subr.bf16.mxu1 %v6162_v22  ;;  %v6168_v26 = vld [vmem:[#allocation2 + $0x604] ss:$8 sps:$4 sm:$0xff]  }
 0x414   : > { %v1639_v29 = vadd.f32 %v1638_v28, %v6979_v31  ;;  %v1640_v32 = vpop.f32.mrb[50].mxu1  ;;  %1991 = vmatprep.mubr.bf16.mxu0 %v1714_v25  ;;  %2325 = vmatpush1.bf16.msra.mxu1 %v6160_v23  ;;  %v6163_v25 = vld [vmem:[#allocation2 + $0x5f0] ss:$8 sps:$4 sm:$0xff]   ;;  %v6174_v28 = vld [vmem:[#allocation2 + $0x624] ss:$8 sps:$4 sm:$0xff]  }
 0x415   : > { %v1641_v33 = vadd.f32 %v1640_v32, %v6976_v30  ;;  %v1642_v34 = vpop.f32.mrb[51].mxu1  ;;  %1992 = vmatmul.mubr.bf16.gmra.mrb[76].mxu0 %v1713_v24  ;;  %v1691_v36 = vmax.f32 %v1637_v27, 0.0  ;;  %v6165_v24 = vld [vmem:[#allocation2 + $0x5f4] ss:$8 sps:$4 sm:$0xff]   ;;  %2663 = vmatprep.subr.bf16.mxu0 %v6168_v26 }
 0x416   : > { %v1643_v35 = vadd.f32 %v1642_v34, %v6979_v31  ;;  %v1692_v42 = vmax.f32 %v1639_v29, 0.0  ;;  %2326 = vmatprep.subr.bf16.mxu1 %v6165_v24  ;;  %v6171_v27 = vld [vmem:[#allocation2 + $0x614] ss:$8 sps:$4 sm:$0xff]   ;;  %v6172_v29 = vld [vmem:[#allocation2 + $0x620] ss:$8 sps:$4 sm:$0xff]  }
 0x417   : > { %v1693_v37 = vmax.f32 %v1641_v33, 0.0  ;;  %v6177_v32 = vld [vmem:[#allocation2 + $0x634] ss:$8 sps:$4 sm:$0xff]   ;;  %v6175_v33 = vld [vmem:[#allocation2 + $0x630] ss:$8 sps:$4 sm:$0xff]  }
 0x418   : > { %v1694_v38 = vmax.f32 %v1643_v35, 0.0  ;;  %2327 = vmatpush1.bf16.msra.mxu1 %v6163_v25  ;;  %v6180_v34 = vld [vmem:[#allocation2 + $0x644] ss:$8 sps:$4 sm:$0xff]   ;;  %v6178_v35 = vld [vmem:[#allocation2 + $0x640] ss:$8 sps:$4 sm:$0xff]  }
 0x419   : > { %v1715_v39 = vpack.c.bf16 %v1693_v37, %v1691_v36  ;;  %v6183_v36 = vld [vmem:[#allocation2 + $0x654] ss:$8 sps:$4 sm:$0xff]   ;;  %v6181_v37 = vld [vmem:[#allocation2 + $0x650] ss:$8 sps:$4 sm:$0xff]  }
 0x41a   : > { %v1716_v43 = vpack.c.bf16 %v1694_v38, %v1692_v42  ;;  %v1646_v40 = vpop.f32.mrb[52].mxu1  ;;  %v6186_v42 = vld [vmem:[#allocation2 + $0x664] ss:$8 sps:$4 sm:$0xff]   ;;  %v6184_v38 = vld [vmem:[#allocation2 + $0x660] ss:$8 sps:$4 sm:$0xff]  }
 0x41b   : > { %v1647_v41 = vadd.f32 %v1646_v40, %v6976_v30  ;;  %v1648_v44 = vpop.f32.mrb[53].mxu1  ;;  %v6192_v40 = vld [vmem:[#allocation2 + $0x684] ss:$8 sps:$4 sm:$0xff]  }
 0x41c   : > { %v1649_v45 = vadd.f32 %v1648_v44, %v6979_v31  ;;  %v1650_v46 = vpop.f32.mrb[54].mxu1  ;;  %2001 = vmatprep.mubr.bf16.mxu0 %v1716_v43  ;;  %v6187_v43 = vld [vmem:[#allocation2 + $0x670] ss:$8 sps:$4 sm:$0xff]   ;;  %v6195_v44 = vld [vmem:[#allocation2 + $0x694] ss:$8 sps:$4 sm:$0xff]  }
 0x41d   : > { %v1651_v47 = vadd.f32 %v1650_v46, %v6976_v30  ;;  %v1652_v48 = vpop.f32.mrb[55].mxu1  ;;  %2002 = vmatmul.mubr.bf16.gmra.mrb[80].mxu0 %v1715_v39  ;;  %v1695_v50 = vmax.f32 %v1647_v41, 0.0  ;;  %v6189_v39 = vld [vmem:[#allocation2 + $0x674] ss:$8 sps:$4 sm:$0xff]   ;;  %v6190_v41 = vld [vmem:[#allocation2 + $0x680] ss:$8 sps:$4 sm:$0xff]  }
 0x41e   : > { %v1653_v49 = vadd.f32 %v1652_v48, %v6979_v31  ;;  %v1696_v52 = vmax.f32 %v1649_v45, 0.0  ;;  %v6193_v45 = vld [vmem:[#allocation2 + $0x690] ss:$8 sps:$4 sm:$0xff]   ;;  %v6198_v46 = vld [vmem:[#allocation2 + $0x6a4] ss:$8 sps:$4 sm:$0xff]  }
 0x41f   : > { %v1697_v51 = vmax.f32 %v1651_v47, 0.0  ;;  %v6196_v47 = vld [vmem:[#allocation2 + $0x6a0] ss:$8 sps:$4 sm:$0xff]   ;;  %v6201_v48 = vld [vmem:[#allocation2 + $0x6b4] ss:$8 sps:$4 sm:$0xff]  }
 0x420   : > { %v1698_v53 = vmax.f32 %v1653_v49, 0.0  ;;  %v6199_v49 = vld [vmem:[#allocation2 + $0x6b0] ss:$8 sps:$4 sm:$0xff]  }
 0x421   : > { %v1717_v54 = vpack.c.bf16 %v1697_v51, %v1695_v50  ;;  %v6204_v50 = vld [vmem:[#allocation2 + $0x6c4] ss:$8 sps:$4 sm:$0xff]   ;;  %v6202_v51 = vld [vmem:[#allocation2 + $0x6c0] ss:$8 sps:$4 sm:$0xff]  }
 0x422   : > { %v1718_v55 = vpack.c.bf16 %v1698_v53, %v1696_v52  ;;  %v1656_v56 = vpop.f32.mrb[56].mxu1  ;;  %v6207_v52 = vld [vmem:[#allocation2 + $0x6d4] ss:$8 sps:$4 sm:$0xff]   ;;  %v6205_v53 = vld [vmem:[#allocation2 + $0x6d0] ss:$8 sps:$4 sm:$0xff]  }
 0x423   : > { %v1657_v57 = vadd.f32 %v1656_v56, %v6976_v30  ;;  %v1658_v58 = vpop.f32.mrb[57].mxu1 }
 0x424   : > { %v1659_v59 = vadd.f32 %v1658_v58, %v6979_v31  ;;  %v1660_v60 = vpop.f32.mrb[58].mxu1  ;;  %2011 = vmatprep.mubr.bf16.mxu0 %v1718_v55 }
 0x425   : > { %v1661_v61 = vadd.f32 %v1660_v60, %v6976_v30  ;;  %v1662_v62 = vpop.f32.mrb[59].mxu1  ;;  %2012 = vmatmul.mubr.bf16.gmra.mrb[84].mxu0 %v1717_v54  ;;  %v1699_v63 = vmax.f32 %v1657_v57, 0.0  ;;  %v1757_v54 = vld [vmem:[#allocation4 + $0x8] sm:$0x3] }
 0x426   : > { %v1663_v3 = vadd.f32 %v1662_v62, %v6979_v31  ;;  %v1700_v4 = vmax.f32 %v1659_v59, 0.0  ;;  %v7014_v55 = vrot.slane %v1757_v54, %v6857_v14  ;;  %v7017_v56 = vrot.slane %v1757_v54, %v6859_v16 }
 0x427   : > { %v1701_v0 = vmax.f32 %v1661_v61, 0.0 }
 0x428   : > { %v1702_v1 = vmax.f32 %v1663_v3, 0.0 }
 0x429   : > { %v1719_v2 = vpack.c.bf16 %v1701_v0, %v1699_v63 }
 0x42a   : > { %v1720_v5 = vpack.c.bf16 %v1702_v1, %v1700_v4  ;;  %v1666_v6 = vpop.f32.mrb[60].mxu1 }
 0x42b   : > { %v1667_v7 = vadd.f32 %v1666_v6, %v6976_v30  ;;  %v1668_v8 = vpop.f32.mrb[61].mxu1 }
 0x42c   : > { %v1669_v9 = vadd.f32 %v1668_v8, %v6979_v31  ;;  %v1670_v10 = vpop.f32.mrb[62].mxu1  ;;  %2021 = vmatprep.mubr.bf16.mxu0 %v1720_v5 }
 0x42d   : > { %v1671_v17 = vadd.f32 %v1670_v10, %v6976_v30  ;;  %v1672_v11 = vpop.f32.mrb[63].mxu1  ;;  %2022 = vmatmul.mubr.bf16.gmra.mrb[88].mxu0 %v1719_v2  ;;  %v1703_v18 = vmax.f32 %v1667_v7, 0.0  ;;  %v6166_v30 = vld [vmem:[#allocation2 + $0x600] ss:$8 sps:$4 sm:$0xff]  }
 0x42e   : > { %v1673_v12 = vadd.f32 %v1672_v11, %v6979_v31  ;;  %v1704_v15 = vmax.f32 %v1669_v9, 0.0  ;;  %2664 = vmatpush1.bf16.msra.mxu0 %v6166_v30  ;;  %v6169_v31 = vld [vmem:[#allocation2 + $0x610] ss:$8 sps:$4 sm:$0xff]  }
 0x42f   : > { %v1705_v13 = vmax.f32 %v1671_v17, 0.0  ;;  %2665 = vmatprep.subr.bf16.mxu0 %v6171_v27 }
 0x430   : > { %v1706_v19 = vmax.f32 %v1673_v12, 0.0 }
 0x431   : > { %v1721_v20 = vpack.c.bf16 %v1705_v13, %v1703_v18 }
 0x432   : > { %v1722_v21 = vpack.c.bf16 %v1706_v19, %v1704_v15  ;;  %2666 = vmatpush1.bf16.msra.mxu0 %v6169_v31 }
 0x433   : > { %2667 = vmatprep.subr.bf16.mxu0 %v6174_v28 }
 0x434   : > { %2031 = vmatprep.mubr.bf16.mxu0 %v1722_v21 }
 0x435   : > { %2032 = vmatmul.mubr.bf16.gmra.mrb[92].mxu0 %v1721_v20 }
 0x436   : > { %2668 = vmatpush1.bf16.msra.mxu0 %v6172_v29 }
 0x437   : > { %2669 = vmatprep.subr.bf16.mxu0 %v6177_v32 }
 0x43a   : > { %2670 = vmatpush1.bf16.msra.mxu0 %v6175_v33 }
 0x43b   : > { %2671 = vmatprep.subr.bf16.mxu0 %v6180_v34 }
 0x43e   : > { %2672 = vmatpush1.bf16.msra.mxu0 %v6178_v35 }
 0x43f   : > { %2673 = vmatprep.subr.bf16.mxu0 %v6183_v36 }
 0x442   : > { %2674 = vmatpush1.bf16.msra.mxu0 %v6181_v37 }
 0x443   : > { %2675 = vmatprep.subr.bf16.mxu0 %v6186_v42 }
 0x446   : > { %2676 = vmatpush1.bf16.msra.mxu0 %v6184_v38 }
 0x447   : > { %2677 = vmatprep.subr.bf16.mxu0 %v6189_v39 }
 0x44a   : > { %2678 = vmatpush1.bf16.msra.mxu0 %v6187_v43 }
 0x44b   : > { %2679 = vmatprep.subr.bf16.mxu0 %v6192_v40 }
 0x44e   : > { %2680 = vmatpush1.bf16.msra.mxu0 %v6190_v41 }
 0x44f   : > { %2681 = vmatprep.subr.bf16.mxu0 %v6195_v44 }
 0x452   : > { %2682 = vmatpush1.bf16.msra.mxu0 %v6193_v45 }
 0x453   : > { %2683 = vmatprep.subr.bf16.mxu0 %v6198_v46 }
 0x456   : > { %2684 = vmatpush1.bf16.msra.mxu0 %v6196_v47 }
 0x457   : > { %2685 = vmatprep.subr.bf16.mxu0 %v6201_v48 }
 0x45a   : > { %2686 = vmatpush1.bf16.msra.mxu0 %v6199_v49 }
 0x45b   : > { %2687 = vmatprep.subr.bf16.mxu0 %v6204_v50 }
 0x45e   : > { %2688 = vmatpush1.bf16.msra.mxu0 %v6202_v51 }
 0x45f   : > { %2689 = vmatprep.subr.bf16.mxu0 %v6207_v52 }
 0x462   : > { %2690 = vmatpush1.bf16.msra.mxu0 %v6205_v53 }
 0x4d0   : > { %v1963_v57 = vpop.f32.mrb[64].mxu0 }
 0x4d1   : > { %v1964_v58 = vadd.f32 %v1963_v57, %v7014_v55  ;;  %v1965_v59 = vpop.f32.mrb[65].mxu0 }
 0x4d2   : > { %v1966_v60 = vadd.f32 %v1965_v59, %v7017_v56  ;;  %v1967_v61 = vpop.f32.mrb[66].mxu0 }
 0x4d3   : > { %v1968_v62 = vadd.f32 %v1967_v61, %v7014_v55  ;;  %v1969_v3 = vpop.f32.mrb[67].mxu0  ;;  %v2042_v0 = vmax.f32 %v1964_v58, 0.0 }
 0x4d4   : > { %v1970_v63 = vadd.f32 %v1969_v3, %v7017_v56  ;;  %v2043_v1 = vmax.f32 %v1966_v60, 0.0 }
 0x4d5   : > { %v2044_v4 = vmax.f32 %v1968_v62, 0.0 }
 0x4d6   : > { %v2045_v2 = vmax.f32 %v1970_v63, 0.0 }
 0x4d7   : > { %v2074_v5 = vpack.c.bf16 %v2044_v4, %v2042_v0 }
 0x4d8   : > { %v2075_v6 = vpack.c.bf16 %v2045_v2, %v2043_v1  ;;  %v1973_v7 = vpop.f32.mrb[68].mxu0 }
 0x4d9   : > { %v1974_v8 = vadd.f32 %v1973_v7, %v7014_v55  ;;  %v1975_v9 = vpop.f32.mrb[69].mxu0 }
 0x4da   : > { %v1976_v10 = vadd.f32 %v1975_v9, %v7017_v56  ;;  %v1977_v17 = vpop.f32.mrb[70].mxu0  ;;  %2328 = vmatprep.mubr.bf16.mxu1 %v2075_v6 }
 0x4db   : > { %v1978_v11 = vadd.f32 %v1977_v17, %v7014_v55  ;;  %v1979_v12 = vpop.f32.mrb[71].mxu0  ;;  %2329 = vmatmul.mubr.bf16.vlgmr.msra.gmra.mrb[64].mxu1 %v2074_v5  ;;  %v2046_v13 = vmax.f32 %v1974_v8, 0.0 }
 0x4dc   : > { %v1980_v18 = vadd.f32 %v1979_v12, %v7017_v56  ;;  %v2047_v19 = vmax.f32 %v1976_v10, 0.0 }
 0x4dd   : > { %v2048_v15 = vmax.f32 %v1978_v11, 0.0 }
 0x4de   : > { %v2049_v20 = vmax.f32 %v1980_v18, 0.0 }
 0x4df   : > { %v2076_v21 = vpack.c.bf16 %v2048_v15, %v2046_v13 }
 0x4e0   : > { %v2077_v22 = vpack.c.bf16 %v2049_v20, %v2047_v19  ;;  %v1983_v23 = vpop.f32.mrb[72].mxu0 }
 0x4e1   : > { %v1984_v24 = vadd.f32 %v1983_v23, %v7014_v55  ;;  %v1985_v25 = vpop.f32.mrb[73].mxu0 }
 0x4e2   : > { %v1986_v30 = vadd.f32 %v1985_v25, %v7017_v56  ;;  %v1987_v26 = vpop.f32.mrb[74].mxu0  ;;  %2338 = vmatprep.mubr.bf16.mxu1 %v2077_v22 }
 0x4e3   : > { %v1988_v27 = vadd.f32 %v1987_v26, %v7014_v55  ;;  %v1989_v31 = vpop.f32.mrb[75].mxu0  ;;  %2339 = vmatmul.mubr.bf16.gmra.mrb[68].mxu1 %v2076_v21  ;;  %v2050_v29 = vmax.f32 %v1984_v24, 0.0 }
 0x4e4   : > { %v1990_v28 = vadd.f32 %v1989_v31, %v7017_v56  ;;  %v2051_v33 = vmax.f32 %v1986_v30, 0.0 }
 0x4e5   : > { %v2052_v32 = vmax.f32 %v1988_v27, 0.0 }
 0x4e6   : > { %v2053_v34 = vmax.f32 %v1990_v28, 0.0 }
 0x4e7   : > { %v2078_v35 = vpack.c.bf16 %v2052_v32, %v2050_v29 }
 0x4e8   : > { %v2079_v36 = vpack.c.bf16 %v2053_v34, %v2051_v33  ;;  %v1993_v37 = vpop.f32.mrb[76].mxu0 }
 0x4e9   : > { %v1994_v42 = vadd.f32 %v1993_v37, %v7014_v55  ;;  %v1995_v38 = vpop.f32.mrb[77].mxu0 }
 0x4ea   : > { %v1996_v39 = vadd.f32 %v1995_v38, %v7017_v56  ;;  %v1997_v43 = vpop.f32.mrb[78].mxu0  ;;  %2348 = vmatprep.mubr.bf16.mxu1 %v2079_v36 }
 0x4eb   : > { %v1998_v40 = vadd.f32 %v1997_v43, %v7014_v55  ;;  %v1999_v41 = vpop.f32.mrb[79].mxu0  ;;  %2349 = vmatmul.mubr.bf16.gmra.mrb[72].mxu1 %v2078_v35  ;;  %v2054_v45 = vmax.f32 %v1994_v42, 0.0 }
 0x4ec   : > { %v2000_v44 = vadd.f32 %v1999_v41, %v7017_v56  ;;  %v2055_v47 = vmax.f32 %v1996_v39, 0.0 }
 0x4ed   : > { %v2056_v46 = vmax.f32 %v1998_v40, 0.0 }
 0x4ee   : > { %v2057_v48 = vmax.f32 %v2000_v44, 0.0 }
 0x4ef   : > { %v2080_v49 = vpack.c.bf16 %v2056_v46, %v2054_v45 }
 0x4f0   : > { %v2081_v50 = vpack.c.bf16 %v2057_v48, %v2055_v47  ;;  %v2003_v51 = vpop.f32.mrb[80].mxu0  ;;  %v6210_v47 = vld [vmem:[#allocation2 + $0x6e4] ss:$8 sps:$4 sm:$0xff]   ;;  %v6208_v48 = vld [vmem:[#allocation2 + $0x6e0] ss:$8 sps:$4 sm:$0xff]  }
 0x4f1   : > { %v2004_v52 = vadd.f32 %v2003_v51, %v7014_v55  ;;  %v2005_v53 = vpop.f32.mrb[81].mxu0  ;;  %2691 = vmatprep.subr.bf16.mxu0 %v6210_v47  ;;  %v6216_v51 = vld [vmem:[#allocation2 + $0x704] ss:$8 sps:$4 sm:$0xff]  }
 0x4f2   : > { %v2006_v54 = vadd.f32 %v2005_v53, %v7017_v56  ;;  %v2007_v57 = vpop.f32.mrb[82].mxu0  ;;  %2358 = vmatprep.mubr.bf16.mxu1 %v2081_v50  ;;  %2692 = vmatpush1.bf16.msra.mxu0 %v6208_v48  ;;  %v6211_v50 = vld [vmem:[#allocation2 + $0x6f0] ss:$8 sps:$4 sm:$0xff]   ;;  %v6222_v53 = vld [vmem:[#allocation2 + $0x724] ss:$8 sps:$4 sm:$0xff]  }
 0x4f3   : > { %v2008_v58 = vadd.f32 %v2007_v57, %v7014_v55  ;;  %v2009_v59 = vpop.f32.mrb[83].mxu0  ;;  %2359 = vmatmul.mubr.bf16.gmra.mrb[76].mxu1 %v2080_v49  ;;  %v2058_v61 = vmax.f32 %v2004_v52, 0.0  ;;  %v6213_v49 = vld [vmem:[#allocation2 + $0x6f4] ss:$8 sps:$4 sm:$0xff]   ;;  %3030 = vmatprep.subr.bf16.mxu1 %v6216_v51 }
 0x4f4   : > { %v2010_v60 = vadd.f32 %v2009_v59, %v7017_v56  ;;  %v2059_v3 = vmax.f32 %v2006_v54, 0.0  ;;  %2693 = vmatprep.subr.bf16.mxu0 %v6213_v49  ;;  %v6219_v52 = vld [vmem:[#allocation2 + $0x714] ss:$8 sps:$4 sm:$0xff]   ;;  %v6220_v54 = vld [vmem:[#allocation2 + $0x720] ss:$8 sps:$4 sm:$0xff]  }
 0x4f5   : > { %v2060_v62 = vmax.f32 %v2008_v58, 0.0  ;;  %v6225_v57 = vld [vmem:[#allocation2 + $0x734] ss:$8 sps:$4 sm:$0xff]   ;;  %v6223_v58 = vld [vmem:[#allocation2 + $0x730] ss:$8 sps:$4 sm:$0xff]  }
 0x4f6   : > { %v2061_v63 = vmax.f32 %v2010_v60, 0.0  ;;  %2694 = vmatpush1.bf16.msra.mxu0 %v6211_v50  ;;  %v6228_v59 = vld [vmem:[#allocation2 + $0x744] ss:$8 sps:$4 sm:$0xff]   ;;  %v6226_v60 = vld [vmem:[#allocation2 + $0x740] ss:$8 sps:$4 sm:$0xff]  }
 0x4f7   : > { %v2082_v0 = vpack.c.bf16 %v2060_v62, %v2058_v61  ;;  %v6231_v61 = vld [vmem:[#allocation2 + $0x754] ss:$8 sps:$4 sm:$0xff]   ;;  %v6229_v62 = vld [vmem:[#allocation2 + $0x750] ss:$8 sps:$4 sm:$0xff]  }
 0x4f8   : > { %v2083_v4 = vpack.c.bf16 %v2061_v63, %v2059_v3  ;;  %v2013_v1 = vpop.f32.mrb[84].mxu0  ;;  %v6234_v3 = vld [vmem:[#allocation2 + $0x764] ss:$8 sps:$4 sm:$0xff]   ;;  %v6232_v63 = vld [vmem:[#allocation2 + $0x760] ss:$8 sps:$4 sm:$0xff]  }
 0x4f9   : > { %v2014_v2 = vadd.f32 %v2013_v1, %v7014_v55  ;;  %v2015_v5 = vpop.f32.mrb[85].mxu0  ;;  %v6240_v1 = vld [vmem:[#allocation2 + $0x784] ss:$8 sps:$4 sm:$0xff]  }
 0x4fa   : > { %v2016_v6 = vadd.f32 %v2015_v5, %v7017_v56  ;;  %v2017_v7 = vpop.f32.mrb[86].mxu0  ;;  %2368 = vmatprep.mubr.bf16.mxu1 %v2083_v4  ;;  %v6235_v4 = vld [vmem:[#allocation2 + $0x770] ss:$8 sps:$4 sm:$0xff]   ;;  %v6243_v5 = vld [vmem:[#allocation2 + $0x794] ss:$8 sps:$4 sm:$0xff]  }
 0x4fb   : > { %v2018_v8 = vadd.f32 %v2017_v7, %v7014_v55  ;;  %v2019_v9 = vpop.f32.mrb[87].mxu0  ;;  %2369 = vmatmul.mubr.bf16.gmra.mrb[80].mxu1 %v2082_v0  ;;  %v2062_v17 = vmax.f32 %v2014_v2, 0.0  ;;  %v6237_v0 = vld [vmem:[#allocation2 + $0x774] ss:$8 sps:$4 sm:$0xff]   ;;  %v6238_v2 = vld [vmem:[#allocation2 + $0x780] ss:$8 sps:$4 sm:$0xff]  }
 0x4fc   : > { %v2020_v10 = vadd.f32 %v2019_v9, %v7017_v56  ;;  %v2063_v12 = vmax.f32 %v2016_v6, 0.0  ;;  %v6241_v6 = vld [vmem:[#allocation2 + $0x790] ss:$8 sps:$4 sm:$0xff]   ;;  %v6246_v7 = vld [vmem:[#allocation2 + $0x7a4] ss:$8 sps:$4 sm:$0xff]  }
 0x4fd   : > { %v2064_v11 = vmax.f32 %v2018_v8, 0.0  ;;  %v6244_v8 = vld [vmem:[#allocation2 + $0x7a0] ss:$8 sps:$4 sm:$0xff]   ;;  %v6249_v9 = vld [vmem:[#allocation2 + $0x7b4] ss:$8 sps:$4 sm:$0xff]  }
 0x4fe   : > { %v2065_v18 = vmax.f32 %v2020_v10, 0.0  ;;  %v6247_v10 = vld [vmem:[#allocation2 + $0x7b0] ss:$8 sps:$4 sm:$0xff]  }
 0x4ff   : > { %v2084_v13 = vpack.c.bf16 %v2064_v11, %v2062_v17  ;;  %v6252_v17 = vld [vmem:[#allocation2 + $0x7c4] ss:$8 sps:$4 sm:$0xff]   ;;  %v6250_v11 = vld [vmem:[#allocation2 + $0x7c0] ss:$8 sps:$4 sm:$0xff]  }
 0x500   : > { %v2085_v15 = vpack.c.bf16 %v2065_v18, %v2063_v12  ;;  %v2023_v19 = vpop.f32.mrb[88].mxu0  ;;  %v6255_v12 = vld [vmem:[#allocation2 + $0x7d4] ss:$8 sps:$4 sm:$0xff]   ;;  %v6253_v18 = vld [vmem:[#allocation2 + $0x7d0] ss:$8 sps:$4 sm:$0xff]  }
 0x501   : > { %v2024_v20 = vadd.f32 %v2023_v19, %v7014_v55  ;;  %v2025_v21 = vpop.f32.mrb[89].mxu0 }
 0x502   : > { %v2026_v22 = vadd.f32 %v2025_v21, %v7017_v56  ;;  %v2027_v23 = vpop.f32.mrb[90].mxu0  ;;  %2378 = vmatprep.mubr.bf16.mxu1 %v2085_v15 }
 0x503   : > { %v2028_v24 = vadd.f32 %v2027_v23, %v7014_v55  ;;  %v2029_v25 = vpop.f32.mrb[91].mxu0  ;;  %2379 = vmatmul.mubr.bf16.gmra.mrb[84].mxu1 %v2084_v13  ;;  %v2066_v26 = vmax.f32 %v2024_v20, 0.0  ;;  %v2124_v13 = vld [vmem:[#allocation4 + $0xa] sm:$0x3] }
 0x504   : > { %v2030_v30 = vadd.f32 %v2029_v25, %v7017_v56  ;;  %v2067_v31 = vmax.f32 %v2026_v22, 0.0  ;;  %v7052_v15 = vrot.slane %v2124_v13, %v6857_v14  ;;  %v7055_v19 = vrot.slane %v2124_v13, %v6859_v16 }
 0x505   : > { %v2068_v27 = vmax.f32 %v2028_v24, 0.0 }
 0x506   : > { %v2069_v28 = vmax.f32 %v2030_v30, 0.0 }
 0x507   : > { %v2086_v29 = vpack.c.bf16 %v2068_v27, %v2066_v26 }
 0x508   : > { %v2087_v32 = vpack.c.bf16 %v2069_v28, %v2067_v31  ;;  %v2033_v33 = vpop.f32.mrb[92].mxu0 }
 0x509   : > { %v2034_v34 = vadd.f32 %v2033_v33, %v7014_v55  ;;  %v2035_v35 = vpop.f32.mrb[93].mxu0 }
 0x50a   : > { %v2036_v36 = vadd.f32 %v2035_v35, %v7017_v56  ;;  %v2037_v37 = vpop.f32.mrb[94].mxu0  ;;  %2388 = vmatprep.mubr.bf16.mxu1 %v2087_v32 }
 0x50b   : > { %v2038_v42 = vadd.f32 %v2037_v37, %v7014_v55  ;;  %v2039_v38 = vpop.f32.mrb[95].mxu0  ;;  %2389 = vmatmul.mubr.bf16.gmra.mrb[88].mxu1 %v2086_v29  ;;  %v2070_v43 = vmax.f32 %v2034_v34, 0.0  ;;  %v6214_v55 = vld [vmem:[#allocation2 + $0x700] ss:$8 sps:$4 sm:$0xff]  }
 0x50c   : > { %v2040_v39 = vadd.f32 %v2039_v38, %v7017_v56  ;;  %v2071_v41 = vmax.f32 %v2036_v36, 0.0  ;;  %3031 = vmatpush1.bf16.msra.mxu1 %v6214_v55  ;;  %v6217_v56 = vld [vmem:[#allocation2 + $0x710] ss:$8 sps:$4 sm:$0xff]  }
 0x50d   : > { %v2072_v40 = vmax.f32 %v2038_v42, 0.0  ;;  %3032 = vmatprep.subr.bf16.mxu1 %v6219_v52 }
 0x50e   : > { %v2073_v44 = vmax.f32 %v2040_v39, 0.0 }
 0x50f   : > { %v2088_v45 = vpack.c.bf16 %v2072_v40, %v2070_v43 }
 0x510   : > { %v2089_v46 = vpack.c.bf16 %v2073_v44, %v2071_v41  ;;  %3033 = vmatpush1.bf16.msra.mxu1 %v6217_v56 }
 0x511   : > { %3034 = vmatprep.subr.bf16.mxu1 %v6222_v53 }
 0x512   : > { %2398 = vmatprep.mubr.bf16.mxu1 %v2089_v46 }
 0x513   : > { %2399 = vmatmul.mubr.bf16.gmra.mrb[92].mxu1 %v2088_v45 }
 0x514   : > { %3035 = vmatpush1.bf16.msra.mxu1 %v6220_v54 }
 0x515   : > { %3036 = vmatprep.subr.bf16.mxu1 %v6225_v57 }
 0x518   : > { %3037 = vmatpush1.bf16.msra.mxu1 %v6223_v58 }
 0x519   : > { %3038 = vmatprep.subr.bf16.mxu1 %v6228_v59 }
 0x51c   : > { %3039 = vmatpush1.bf16.msra.mxu1 %v6226_v60 }
 0x51d   : > { %3040 = vmatprep.subr.bf16.mxu1 %v6231_v61 }
 0x520   : > { %3041 = vmatpush1.bf16.msra.mxu1 %v6229_v62 }
 0x521   : > { %3042 = vmatprep.subr.bf16.mxu1 %v6234_v3 }
 0x524   : > { %3043 = vmatpush1.bf16.msra.mxu1 %v6232_v63 }
 0x525   : > { %3044 = vmatprep.subr.bf16.mxu1 %v6237_v0 }
 0x528   : > { %3045 = vmatpush1.bf16.msra.mxu1 %v6235_v4 }
 0x529   : > { %3046 = vmatprep.subr.bf16.mxu1 %v6240_v1 }
 0x52c   : > { %3047 = vmatpush1.bf16.msra.mxu1 %v6238_v2 }
 0x52d   : > { %3048 = vmatprep.subr.bf16.mxu1 %v6243_v5 }
 0x530   : > { %3049 = vmatpush1.bf16.msra.mxu1 %v6241_v6 }
 0x531   : > { %3050 = vmatprep.subr.bf16.mxu1 %v6246_v7 }
 0x534   : > { %3051 = vmatpush1.bf16.msra.mxu1 %v6244_v8 }
 0x535   : > { %3052 = vmatprep.subr.bf16.mxu1 %v6249_v9 }
 0x538   : > { %3053 = vmatpush1.bf16.msra.mxu1 %v6247_v10 }
 0x539   : > { %3054 = vmatprep.subr.bf16.mxu1 %v6252_v17 }
 0x53c   : > { %3055 = vmatpush1.bf16.msra.mxu1 %v6250_v11 }
 0x53d   : > { %3056 = vmatprep.subr.bf16.mxu1 %v6255_v12 }
 0x540   : > { %3057 = vmatpush1.bf16.msra.mxu1 %v6253_v18 }
 0x5ae   : > { %v2330_v20 = vpop.f32.mrb[64].mxu1 }
 0x5af   : > { %v2331_v21 = vadd.f32 %v2330_v20, %v7052_v15  ;;  %v2332_v22 = vpop.f32.mrb[65].mxu1 }
 0x5b0   : > { %v2333_v23 = vadd.f32 %v2332_v22, %v7055_v19  ;;  %v2334_v24 = vpop.f32.mrb[66].mxu1 }
 0x5b1   : > { %v2335_v25 = vadd.f32 %v2334_v24, %v7052_v15  ;;  %v2336_v30 = vpop.f32.mrb[67].mxu1  ;;  %v2409_v27 = vmax.f32 %v2331_v21, 0.0 }
 0x5b2   : > { %v2337_v26 = vadd.f32 %v2336_v30, %v7055_v19  ;;  %v2410_v28 = vmax.f32 %v2333_v23, 0.0 }
 0x5b3   : > { %v2411_v31 = vmax.f32 %v2335_v25, 0.0 }
 0x5b4   : > { %v2412_v29 = vmax.f32 %v2337_v26, 0.0 }
 0x5b5   : > { %v2441_v32 = vpack.c.bf16 %v2411_v31, %v2409_v27 }
 0x5b6   : > { %v2442_v33 = vpack.c.bf16 %v2412_v29, %v2410_v28  ;;  %v2340_v34 = vpop.f32.mrb[68].mxu1 }
 0x5b7   : > { %v2341_v35 = vadd.f32 %v2340_v34, %v7052_v15  ;;  %v2342_v36 = vpop.f32.mrb[69].mxu1 }
 0x5b8   : > { %v2343_v37 = vadd.f32 %v2342_v36, %v7055_v19  ;;  %v2344_v42 = vpop.f32.mrb[70].mxu1  ;;  %2695 = vmatprep.mubr.bf16.mxu0 %v2442_v33 }
 0x5b9   : > { %v2345_v38 = vadd.f32 %v2344_v42, %v7052_v15  ;;  %v2346_v39 = vpop.f32.mrb[71].mxu1  ;;  %2696 = vmatmul.mubr.bf16.vlgmr.msra.gmra.mrb[96].mxu0 %v2441_v32  ;;  %v2413_v40 = vmax.f32 %v2341_v35, 0.0 }
 0x5ba   : > { %v2347_v43 = vadd.f32 %v2346_v39, %v7055_v19  ;;  %v2414_v44 = vmax.f32 %v2343_v37, 0.0 }
 0x5bb   : > { %v2415_v41 = vmax.f32 %v2345_v38, 0.0 }
 0x5bc   : > { %v2416_v45 = vmax.f32 %v2347_v43, 0.0 }
 0x5bd   : > { %v2443_v46 = vpack.c.bf16 %v2415_v41, %v2413_v40 }
 0x5be   : > { %v2444_v47 = vpack.c.bf16 %v2416_v45, %v2414_v44  ;;  %v2350_v48 = vpop.f32.mrb[72].mxu1 }
 0x5bf   : > { %v2351_v49 = vadd.f32 %v2350_v48, %v7052_v15  ;;  %v2352_v50 = vpop.f32.mrb[73].mxu1 }
 0x5c0   : > { %v2353_v55 = vadd.f32 %v2352_v50, %v7055_v19  ;;  %v2354_v51 = vpop.f32.mrb[74].mxu1  ;;  %2705 = vmatprep.mubr.bf16.mxu0 %v2444_v47 }
 0x5c1   : > { %v2355_v52 = vadd.f32 %v2354_v51, %v7052_v15  ;;  %v2356_v56 = vpop.f32.mrb[75].mxu1  ;;  %2706 = vmatmul.mubr.bf16.gmra.mrb[100].mxu0 %v2443_v46  ;;  %v2417_v54 = vmax.f32 %v2351_v49, 0.0 }
 0x5c2   : > { %v2357_v53 = vadd.f32 %v2356_v56, %v7055_v19  ;;  %v2418_v58 = vmax.f32 %v2353_v55, 0.0 }
 0x5c3   : > { %v2419_v57 = vmax.f32 %v2355_v52, 0.0 }
 0x5c4   : > { %v2420_v59 = vmax.f32 %v2357_v53, 0.0 }
 0x5c5   : > { %v2445_v60 = vpack.c.bf16 %v2419_v57, %v2417_v54 }
 0x5c6   : > { %v2446_v61 = vpack.c.bf16 %v2420_v59, %v2418_v58  ;;  %v2360_v62 = vpop.f32.mrb[76].mxu1 }
 0x5c7   : > { %v2361_v3 = vadd.f32 %v2360_v62, %v7052_v15  ;;  %v2362_v63 = vpop.f32.mrb[77].mxu1 }
 0x5c8   : > { %v2363_v0 = vadd.f32 %v2362_v63, %v7055_v19  ;;  %v2364_v4 = vpop.f32.mrb[78].mxu1  ;;  %2715 = vmatprep.mubr.bf16.mxu0 %v2446_v61 }
 0x5c9   : > { %v2365_v1 = vadd.f32 %v2364_v4, %v7052_v15  ;;  %v2366_v2 = vpop.f32.mrb[79].mxu1  ;;  %2716 = vmatmul.mubr.bf16.gmra.mrb[104].mxu0 %v2445_v60  ;;  %v2421_v6 = vmax.f32 %v2361_v3, 0.0 }
 0x5ca   : > { %v2367_v5 = vadd.f32 %v2366_v2, %v7055_v19  ;;  %v2422_v8 = vmax.f32 %v2363_v0, 0.0 }
 0x5cb   : > { %v2423_v7 = vmax.f32 %v2365_v1, 0.0 }
 0x5cc   : > { %v2424_v9 = vmax.f32 %v2367_v5, 0.0 }
 0x5cd   : > { %v2447_v10 = vpack.c.bf16 %v2423_v7, %v2421_v6 }
 0x5ce   : > { %v2448_v17 = vpack.c.bf16 %v2424_v9, %v2422_v8  ;;  %v2370_v11 = vpop.f32.mrb[80].mxu1  ;;  %v6258_v8 = vld [vmem:[#allocation2 + $0x7e4] ss:$8 sps:$4 sm:$0xff]   ;;  %v6256_v9 = vld [vmem:[#allocation2 + $0x7e0] ss:$8 sps:$4 sm:$0xff]  }
 0x5cf   : > { %v2371_v12 = vadd.f32 %v2370_v11, %v7052_v15  ;;  %v2372_v18 = vpop.f32.mrb[81].mxu1  ;;  %3058 = vmatprep.subr.bf16.mxu1 %v6258_v8  ;;  %v6264_v11 = vld [vmem:[#allocation2 + $0x804] ss:$8 sps:$4 sm:$0xff]  }
 0x5d0   : > { %v2373_v13 = vadd.f32 %v2372_v18, %v7055_v19  ;;  %v2374_v20 = vpop.f32.mrb[82].mxu1  ;;  %2725 = vmatprep.mubr.bf16.mxu0 %v2448_v17  ;;  %3059 = vmatpush1.bf16.msra.mxu1 %v6256_v9  ;;  %v6259_v17 = vld [vmem:[#allocation2 + $0x7f0] ss:$8 sps:$4 sm:$0xff]   ;;  %v6270_v18 = vld [vmem:[#allocation2 + $0x824] ss:$8 sps:$4 sm:$0xff]  }
 0x5d1   : > { %v2375_v21 = vadd.f32 %v2374_v20, %v7052_v15  ;;  %v2376_v22 = vpop.f32.mrb[83].mxu1  ;;  %2726 = vmatmul.mubr.bf16.gmra.mrb[108].mxu0 %v2447_v10  ;;  %v2425_v24 = vmax.f32 %v2371_v12, 0.0  ;;  %v6261_v10 = vld [vmem:[#allocation2 + $0x7f4] ss:$8 sps:$4 sm:$0xff]   ;;  %3397 = vmatprep.subr.bf16.mxu0 %v6264_v11 }
 0x5d2   : > { %v2377_v23 = vadd.f32 %v2376_v22, %v7055_v19  ;;  %v2426_v30 = vmax.f32 %v2373_v13, 0.0  ;;  %3060 = vmatprep.subr.bf16.mxu1 %v6261_v10  ;;  %v6267_v12 = vld [vmem:[#allocation2 + $0x814] ss:$8 sps:$4 sm:$0xff]   ;;  %v6268_v13 = vld [vmem:[#allocation2 + $0x820] ss:$8 sps:$4 sm:$0xff]  }
 0x5d3   : > { %v2427_v25 = vmax.f32 %v2375_v21, 0.0  ;;  %v6273_v20 = vld [vmem:[#allocation2 + $0x834] ss:$8 sps:$4 sm:$0xff]   ;;  %v6271_v21 = vld [vmem:[#allocation2 + $0x830] ss:$8 sps:$4 sm:$0xff]  }
 0x5d4   : > { %v2428_v26 = vmax.f32 %v2377_v23, 0.0  ;;  %3061 = vmatpush1.bf16.msra.mxu1 %v6259_v17  ;;  %v6276_v22 = vld [vmem:[#allocation2 + $0x844] ss:$8 sps:$4 sm:$0xff]   ;;  %v6274_v23 = vld [vmem:[#allocation2 + $0x840] ss:$8 sps:$4 sm:$0xff]  }
 0x5d5   : > { %v2449_v27 = vpack.c.bf16 %v2427_v25, %v2425_v24  ;;  %v6279_v24 = vld [vmem:[#allocation2 + $0x854] ss:$8 sps:$4 sm:$0xff]   ;;  %v6277_v25 = vld [vmem:[#allocation2 + $0x850] ss:$8 sps:$4 sm:$0xff]  }
 0x5d6   : > { %v2450_v31 = vpack.c.bf16 %v2428_v26, %v2426_v30  ;;  %v2380_v28 = vpop.f32.mrb[84].mxu1  ;;  %v6282_v30 = vld [vmem:[#allocation2 + $0x864] ss:$8 sps:$4 sm:$0xff]   ;;  %v6280_v26 = vld [vmem:[#allocation2 + $0x860] ss:$8 sps:$4 sm:$0xff]  }
 0x5d7   : > { %v2381_v29 = vadd.f32 %v2380_v28, %v7052_v15  ;;  %v2382_v32 = vpop.f32.mrb[85].mxu1  ;;  %v6288_v28 = vld [vmem:[#allocation2 + $0x884] ss:$8 sps:$4 sm:$0xff]  }
 0x5d8   : > { %v2383_v33 = vadd.f32 %v2382_v32, %v7055_v19  ;;  %v2384_v34 = vpop.f32.mrb[86].mxu1  ;;  %2735 = vmatprep.mubr.bf16.mxu0 %v2450_v31  ;;  %v6283_v31 = vld [vmem:[#allocation2 + $0x870] ss:$8 sps:$4 sm:$0xff]   ;;  %v6291_v32 = vld [vmem:[#allocation2 + $0x894] ss:$8 sps:$4 sm:$0xff]  }
 0x5d9   : > { %v2385_v35 = vadd.f32 %v2384_v34, %v7052_v15  ;;  %v2386_v36 = vpop.f32.mrb[87].mxu1  ;;  %2736 = vmatmul.mubr.bf16.gmra.mrb[112].mxu0 %v2449_v27  ;;  %v2429_v42 = vmax.f32 %v2381_v29, 0.0  ;;  %v6285_v27 = vld [vmem:[#allocation2 + $0x874] ss:$8 sps:$4 sm:$0xff]   ;;  %v6286_v29 = vld [vmem:[#allocation2 + $0x880] ss:$8 sps:$4 sm:$0xff]  }
 0x5da   : > { %v2387_v37 = vadd.f32 %v2386_v36, %v7055_v19  ;;  %v2430_v39 = vmax.f32 %v2383_v33, 0.0  ;;  %v6289_v33 = vld [vmem:[#allocation2 + $0x890] ss:$8 sps:$4 sm:$0xff]   ;;  %v6294_v34 = vld [vmem:[#allocation2 + $0x8a4] ss:$8 sps:$4 sm:$0xff]  }
 0x5db   : > { %v2431_v38 = vmax.f32 %v2385_v35, 0.0  ;;  %v6292_v35 = vld [vmem:[#allocation2 + $0x8a0] ss:$8 sps:$4 sm:$0xff]   ;;  %v6297_v36 = vld [vmem:[#allocation2 + $0x8b4] ss:$8 sps:$4 sm:$0xff]  }
 0x5dc   : > { %v2432_v43 = vmax.f32 %v2387_v37, 0.0  ;;  %v6295_v37 = vld [vmem:[#allocation2 + $0x8b0] ss:$8 sps:$4 sm:$0xff]  }
 0x5dd   : > { %v2451_v40 = vpack.c.bf16 %v2431_v38, %v2429_v42  ;;  %v6300_v42 = vld [vmem:[#allocation2 + $0x8c4] ss:$8 sps:$4 sm:$0xff]   ;;  %v6298_v38 = vld [vmem:[#allocation2 + $0x8c0] ss:$8 sps:$4 sm:$0xff]  }
 0x5de   : > { %v2452_v41 = vpack.c.bf16 %v2432_v43, %v2430_v39  ;;  %v2390_v44 = vpop.f32.mrb[88].mxu1  ;;  %v6303_v39 = vld [vmem:[#allocation2 + $0x8d4] ss:$8 sps:$4 sm:$0xff]   ;;  %v6301_v43 = vld [vmem:[#allocation2 + $0x8d0] ss:$8 sps:$4 sm:$0xff]  }
 0x5df   : > { %v2391_v45 = vadd.f32 %v2390_v44, %v7052_v15  ;;  %v2392_v46 = vpop.f32.mrb[89].mxu1 }
 0x5e0   : > { %v2393_v47 = vadd.f32 %v2392_v46, %v7055_v19  ;;  %v2394_v48 = vpop.f32.mrb[90].mxu1  ;;  %2745 = vmatprep.mubr.bf16.mxu0 %v2452_v41 }
 0x5e1   : > { %v2395_v49 = vadd.f32 %v2394_v48, %v7052_v15  ;;  %v2396_v50 = vpop.f32.mrb[91].mxu1  ;;  %2746 = vmatmul.mubr.bf16.gmra.mrb[116].mxu0 %v2451_v40  ;;  %v2433_v51 = vmax.f32 %v2391_v45, 0.0  ;;  %v2491_v40 = vld [vmem:[#allocation4 + $0xc] sm:$0x3] }
 0x5e2   : > { %v2397_v55 = vadd.f32 %v2396_v50, %v7055_v19  ;;  %v2434_v56 = vmax.f32 %v2393_v47, 0.0  ;;  %v7090_v41 = vrot.slane %v2491_v40, %v6857_v14  ;;  %v7093_v44 = vrot.slane %v2491_v40, %v6859_v16 }
 0x5e3   : > { %v2435_v52 = vmax.f32 %v2395_v49, 0.0 }
 0x5e4   : > { %v2436_v53 = vmax.f32 %v2397_v55, 0.0 }
 0x5e5   : > { %v2453_v54 = vpack.c.bf16 %v2435_v52, %v2433_v51 }
 0x5e6   : > { %v2454_v57 = vpack.c.bf16 %v2436_v53, %v2434_v56  ;;  %v2400_v58 = vpop.f32.mrb[92].mxu1 }
 0x5e7   : > { %v2401_v59 = vadd.f32 %v2400_v58, %v7052_v15  ;;  %v2402_v60 = vpop.f32.mrb[93].mxu1 }
 0x5e8   : > { %v2403_v61 = vadd.f32 %v2402_v60, %v7055_v19  ;;  %v2404_v62 = vpop.f32.mrb[94].mxu1  ;;  %2755 = vmatprep.mubr.bf16.mxu0 %v2454_v57 }
 0x5e9   : > { %v2405_v3 = vadd.f32 %v2404_v62, %v7052_v15  ;;  %v2406_v63 = vpop.f32.mrb[95].mxu1  ;;  %2756 = vmatmul.mubr.bf16.gmra.mrb[120].mxu0 %v2453_v54  ;;  %v2437_v4 = vmax.f32 %v2401_v59, 0.0  ;;  %v6262_v15 = vld [vmem:[#allocation2 + $0x800] ss:$8 sps:$4 sm:$0xff]  }
 0x5ea   : > { %v2407_v0 = vadd.f32 %v2406_v63, %v7055_v19  ;;  %v2438_v2 = vmax.f32 %v2403_v61, 0.0  ;;  %3398 = vmatpush1.bf16.msra.mxu0 %v6262_v15  ;;  %v6265_v19 = vld [vmem:[#allocation2 + $0x810] ss:$8 sps:$4 sm:$0xff]  }
 0x5eb   : > { %v2439_v1 = vmax.f32 %v2405_v3, 0.0  ;;  %3399 = vmatprep.subr.bf16.mxu0 %v6267_v12 }
 0x5ec   : > { %v2440_v5 = vmax.f32 %v2407_v0, 0.0 }
 0x5ed   : > { %v2455_v6 = vpack.c.bf16 %v2439_v1, %v2437_v4 }
 0x5ee   : > { %v2456_v7 = vpack.c.bf16 %v2440_v5, %v2438_v2  ;;  %3400 = vmatpush1.bf16.msra.mxu0 %v6265_v19 }
 0x5ef   : > { %3401 = vmatprep.subr.bf16.mxu0 %v6270_v18 }
 0x5f0   : > { %2765 = vmatprep.mubr.bf16.mxu0 %v2456_v7 }
 0x5f1   : > { %2766 = vmatmul.mubr.bf16.gmra.mrb[124].mxu0 %v2455_v6 }
 0x5f2   : > { %3402 = vmatpush1.bf16.msra.mxu0 %v6268_v13 }
 0x5f3   : > { %3403 = vmatprep.subr.bf16.mxu0 %v6273_v20 }
 0x5f6   : > { %3404 = vmatpush1.bf16.msra.mxu0 %v6271_v21 }
 0x5f7   : > { %3405 = vmatprep.subr.bf16.mxu0 %v6276_v22 }
 0x5fa   : > { %3406 = vmatpush1.bf16.msra.mxu0 %v6274_v23 }
 0x5fb   : > { %3407 = vmatprep.subr.bf16.mxu0 %v6279_v24 }
 0x5fe   : > { %3408 = vmatpush1.bf16.msra.mxu0 %v6277_v25 }
 0x5ff   : > { %3409 = vmatprep.subr.bf16.mxu0 %v6282_v30 }
 0x602   : > { %3410 = vmatpush1.bf16.msra.mxu0 %v6280_v26 }
 0x603   : > { %3411 = vmatprep.subr.bf16.mxu0 %v6285_v27 }
 0x606   : > { %3412 = vmatpush1.bf16.msra.mxu0 %v6283_v31 }
 0x607   : > { %3413 = vmatprep.subr.bf16.mxu0 %v6288_v28 }
 0x60a   : > { %3414 = vmatpush1.bf16.msra.mxu0 %v6286_v29 }
 0x60b   : > { %3415 = vmatprep.subr.bf16.mxu0 %v6291_v32 }
 0x60e   : > { %3416 = vmatpush1.bf16.msra.mxu0 %v6289_v33 }
 0x60f   : > { %3417 = vmatprep.subr.bf16.mxu0 %v6294_v34 }
 0x612   : > { %3418 = vmatpush1.bf16.msra.mxu0 %v6292_v35 }
 0x613   : > { %3419 = vmatprep.subr.bf16.mxu0 %v6297_v36 }
 0x616   : > { %3420 = vmatpush1.bf16.msra.mxu0 %v6295_v37 }
 0x617   : > { %3421 = vmatprep.subr.bf16.mxu0 %v6300_v42 }
 0x61a   : > { %3422 = vmatpush1.bf16.msra.mxu0 %v6298_v38 }
 0x61b   : > { %3423 = vmatprep.subr.bf16.mxu0 %v6303_v39 }
 0x61e   : > { %3424 = vmatpush1.bf16.msra.mxu0 %v6301_v43 }
 0x68c   : > { %v2697_v45 = vpop.f32.mrb[96].mxu0 }
 0x68d   : > { %v2698_v46 = vadd.f32 %v2697_v45, %v7090_v41  ;;  %v2699_v47 = vpop.f32.mrb[97].mxu0 }
 0x68e   : > { %v2700_v48 = vadd.f32 %v2699_v47, %v7093_v44  ;;  %v2701_v49 = vpop.f32.mrb[98].mxu0 }
 0x68f   : > { %v2702_v50 = vadd.f32 %v2701_v49, %v7090_v41  ;;  %v2703_v55 = vpop.f32.mrb[99].mxu0  ;;  %v2776_v52 = vmax.f32 %v2698_v46, 0.0 }
 0x690   : > { %v2704_v51 = vadd.f32 %v2703_v55, %v7093_v44  ;;  %v2777_v53 = vmax.f32 %v2700_v48, 0.0 }
 0x691   : > { %v2778_v56 = vmax.f32 %v2702_v50, 0.0 }
 0x692   : > { %v2779_v54 = vmax.f32 %v2704_v51, 0.0 }
 0x693   : > { %v2808_v57 = vpack.c.bf16 %v2778_v56, %v2776_v52 }
 0x694   : > { %v2809_v58 = vpack.c.bf16 %v2779_v54, %v2777_v53  ;;  %v2707_v59 = vpop.f32.mrb[100].mxu0 }
 0x695   : > { %v2708_v60 = vadd.f32 %v2707_v59, %v7090_v41  ;;  %v2709_v61 = vpop.f32.mrb[101].mxu0 }
 0x696   : > { %v2710_v62 = vadd.f32 %v2709_v61, %v7093_v44  ;;  %v2711_v3 = vpop.f32.mrb[102].mxu0  ;;  %3062 = vmatprep.mubr.bf16.mxu1 %v2809_v58 }
 0x697   : > { %v2712_v63 = vadd.f32 %v2711_v3, %v7090_v41  ;;  %v2713_v0 = vpop.f32.mrb[103].mxu0  ;;  %3063 = vmatmul.mubr.bf16.vlgmr.msra.gmra.mrb[96].mxu1 %v2808_v57  ;;  %v2780_v1 = vmax.f32 %v2708_v60, 0.0 }
 0x698   : > { %v2714_v4 = vadd.f32 %v2713_v0, %v7093_v44  ;;  %v2781_v5 = vmax.f32 %v2710_v62, 0.0 }
 0x699   : > { %v2782_v2 = vmax.f32 %v2712_v63, 0.0 }
 0x69a   : > { %v2783_v6 = vmax.f32 %v2714_v4, 0.0 }
 0x69b   : > { %v2810_v7 = vpack.c.bf16 %v2782_v2, %v2780_v1 }
 0x69c   : > { %v2811_v8 = vpack.c.bf16 %v2783_v6, %v2781_v5  ;;  %v2717_v9 = vpop.f32.mrb[104].mxu0 }
 0x69d   : > { %v2718_v10 = vadd.f32 %v2717_v9, %v7090_v41  ;;  %v2719_v17 = vpop.f32.mrb[105].mxu0 }
 0x69e   : > { %v2720_v15 = vadd.f32 %v2719_v17, %v7093_v44  ;;  %v2721_v11 = vpop.f32.mrb[106].mxu0  ;;  %3072 = vmatprep.mubr.bf16.mxu1 %v2811_v8 }
 0x69f   : > { %v2722_v12 = vadd.f32 %v2721_v11, %v7090_v41  ;;  %v2723_v19 = vpop.f32.mrb[107].mxu0  ;;  %3073 = vmatmul.mubr.bf16.gmra.mrb[100].mxu1 %v2810_v7  ;;  %v2784_v13 = vmax.f32 %v2718_v10, 0.0 }
 0x6a0   : > { %v2724_v18 = vadd.f32 %v2723_v19, %v7093_v44  ;;  %v2785_v21 = vmax.f32 %v2720_v15, 0.0 }
 0x6a1   : > { %v2786_v20 = vmax.f32 %v2722_v12, 0.0 }
 0x6a2   : > { %v2787_v22 = vmax.f32 %v2724_v18, 0.0 }
 0x6a3   : > { %v2812_v23 = vpack.c.bf16 %v2786_v20, %v2784_v13 }
 0x6a4   : > { %v2813_v24 = vpack.c.bf16 %v2787_v22, %v2785_v21  ;;  %v2727_v25 = vpop.f32.mrb[108].mxu0 }
 0x6a5   : > { %v2728_v30 = vadd.f32 %v2727_v25, %v7090_v41  ;;  %v2729_v26 = vpop.f32.mrb[109].mxu0 }
 0x6a6   : > { %v2730_v27 = vadd.f32 %v2729_v26, %v7093_v44  ;;  %v2731_v31 = vpop.f32.mrb[110].mxu0  ;;  %3082 = vmatprep.mubr.bf16.mxu1 %v2813_v24 }
 0x6a7   : > { %v2732_v28 = vadd.f32 %v2731_v31, %v7090_v41  ;;  %v2733_v29 = vpop.f32.mrb[111].mxu0  ;;  %3083 = vmatmul.mubr.bf16.gmra.mrb[104].mxu1 %v2812_v23  ;;  %v2788_v33 = vmax.f32 %v2728_v30, 0.0 }
 0x6a8   : > { %v2734_v32 = vadd.f32 %v2733_v29, %v7093_v44  ;;  %v2789_v35 = vmax.f32 %v2730_v27, 0.0 }
 0x6a9   : > { %v2790_v34 = vmax.f32 %v2732_v28, 0.0 }
 0x6aa   : > { %v2791_v36 = vmax.f32 %v2734_v32, 0.0 }
 0x6ab   : > { %v2814_v37 = vpack.c.bf16 %v2790_v34, %v2788_v33 }
 0x6ac   : > { %v2815_v42 = vpack.c.bf16 %v2791_v36, %v2789_v35  ;;  %v2737_v38 = vpop.f32.mrb[112].mxu0  ;;  %v6306_v35 = vld [vmem:[#allocation2 + $0x8e4] ss:$8 sps:$4 sm:$0xff]   ;;  %v6304_v36 = vld [vmem:[#allocation2 + $0x8e0] ss:$8 sps:$4 sm:$0xff]  }
 0x6ad   : > { %v2738_v39 = vadd.f32 %v2737_v38, %v7090_v41  ;;  %v2739_v43 = vpop.f32.mrb[113].mxu0  ;;  %3425 = vmatprep.subr.bf16.mxu0 %v6306_v35  ;;  %v6312_v38 = vld [vmem:[#allocation2 + $0x904] ss:$8 sps:$4 sm:$0xff]  }
 0x6ae   : > { %v2740_v40 = vadd.f32 %v2739_v43, %v7093_v44  ;;  %v2741_v45 = vpop.f32.mrb[114].mxu0  ;;  %3092 = vmatprep.mubr.bf16.mxu1 %v2815_v42  ;;  %3426 = vmatpush1.bf16.msra.mxu0 %v6304_v36  ;;  %v6307_v42 = vld [vmem:[#allocation2 + $0x8f0] ss:$8 sps:$4 sm:$0xff]   ;;  %v6318_v43 = vld [vmem:[#allocation2 + $0x924] ss:$8 sps:$4 sm:$0xff]  }
 0x6af   : > { %v2742_v46 = vadd.f32 %v2741_v45, %v7090_v41  ;;  %v2743_v47 = vpop.f32.mrb[115].mxu0  ;;  %3093 = vmatmul.mubr.bf16.gmra.mrb[108].mxu1 %v2814_v37  ;;  %v2792_v49 = vmax.f32 %v2738_v39, 0.0  ;;  %v6309_v37 = vld [vmem:[#allocation2 + $0x8f4] ss:$8 sps:$4 sm:$0xff]   ;;  %3764 = vmatprep.subr.bf16.mxu1 %v6312_v38 }
 0x6b0   : > { %v2744_v48 = vadd.f32 %v2743_v47, %v7093_v44  ;;  %v2793_v55 = vmax.f32 %v2740_v40, 0.0  ;;  %3427 = vmatprep.subr.bf16.mxu0 %v6309_v37  ;;  %v6315_v39 = vld [vmem:[#allocation2 + $0x914] ss:$8 sps:$4 sm:$0xff]   ;;  %v6316_v40 = vld [vmem:[#allocation2 + $0x920] ss:$8 sps:$4 sm:$0xff]  }
 0x6b1   : > { %v2794_v50 = vmax.f32 %v2742_v46, 0.0  ;;  %v6321_v45 = vld [vmem:[#allocation2 + $0x934] ss:$8 sps:$4 sm:$0xff]   ;;  %v6319_v46 = vld [vmem:[#allocation2 + $0x930] ss:$8 sps:$4 sm:$0xff]  }
 0x6b2   : > { %v2795_v51 = vmax.f32 %v2744_v48, 0.0  ;;  %3428 = vmatpush1.bf16.msra.mxu0 %v6307_v42  ;;  %v6324_v47 = vld [vmem:[#allocation2 + $0x944] ss:$8 sps:$4 sm:$0xff]   ;;  %v6322_v48 = vld [vmem:[#allocation2 + $0x940] ss:$8 sps:$4 sm:$0xff]  }
 0x6b3   : > { %v2816_v52 = vpack.c.bf16 %v2794_v50, %v2792_v49  ;;  %v6327_v49 = vld [vmem:[#allocation2 + $0x954] ss:$8 sps:$4 sm:$0xff]   ;;  %v6325_v50 = vld [vmem:[#allocation2 + $0x950] ss:$8 sps:$4 sm:$0xff]  }
 0x6b4   : > { %v2817_v56 = vpack.c.bf16 %v2795_v51, %v2793_v55  ;;  %v2747_v53 = vpop.f32.mrb[116].mxu0  ;;  %v6330_v55 = vld [vmem:[#allocation2 + $0x964] ss:$8 sps:$4 sm:$0xff]   ;;  %v6328_v51 = vld [vmem:[#allocation2 + $0x960] ss:$8 sps:$4 sm:$0xff]  }
 0x6b5   : > { %v2748_v54 = vadd.f32 %v2747_v53, %v7090_v41  ;;  %v2749_v57 = vpop.f32.mrb[117].mxu0  ;;  %v6336_v53 = vld [vmem:[#allocation2 + $0x984] ss:$8 sps:$4 sm:$0xff]  }
 0x6b6   : > { %v2750_v58 = vadd.f32 %v2749_v57, %v7093_v44  ;;  %v2751_v59 = vpop.f32.mrb[118].mxu0  ;;  %3102 = vmatprep.mubr.bf16.mxu1 %v2817_v56  ;;  %v6331_v56 = vld [vmem:[#allocation2 + $0x970] ss:$8 sps:$4 sm:$0xff]   ;;  %v6339_v57 = vld [vmem:[#allocation2 + $0x994] ss:$8 sps:$4 sm:$0xff]  }
 0x6b7   : > { %v2752_v60 = vadd.f32 %v2751_v59, %v7090_v41  ;;  %v2753_v61 = vpop.f32.mrb[119].mxu0  ;;  %3103 = vmatmul.mubr.bf16.gmra.mrb[112].mxu1 %v2816_v52  ;;  %v2796_v3 = vmax.f32 %v2748_v54, 0.0  ;;  %v6333_v52 = vld [vmem:[#allocation2 + $0x974] ss:$8 sps:$4 sm:$0xff]   ;;  %v6334_v54 = vld [vmem:[#allocation2 + $0x980] ss:$8 sps:$4 sm:$0xff]  }
 0x6b8   : > { %v2754_v62 = vadd.f32 %v2753_v61, %v7093_v44  ;;  %v2797_v0 = vmax.f32 %v2750_v58, 0.0  ;;  %v6337_v58 = vld [vmem:[#allocation2 + $0x990] ss:$8 sps:$4 sm:$0xff]   ;;  %v6342_v59 = vld [vmem:[#allocation2 + $0x9a4] ss:$8 sps:$4 sm:$0xff]  }
 0x6b9   : > { %v2798_v63 = vmax.f32 %v2752_v60, 0.0  ;;  %v6340_v60 = vld [vmem:[#allocation2 + $0x9a0] ss:$8 sps:$4 sm:$0xff]   ;;  %v6345_v61 = vld [vmem:[#allocation2 + $0x9b4] ss:$8 sps:$4 sm:$0xff]  }
 0x6ba   : > { %v2799_v4 = vmax.f32 %v2754_v62, 0.0  ;;  %v6343_v62 = vld [vmem:[#allocation2 + $0x9b0] ss:$8 sps:$4 sm:$0xff]  }
 0x6bb   : > { %v2818_v1 = vpack.c.bf16 %v2798_v63, %v2796_v3  ;;  %v6348_v3 = vld [vmem:[#allocation2 + $0x9c4] ss:$8 sps:$4 sm:$0xff]   ;;  %v6346_v63 = vld [vmem:[#allocation2 + $0x9c0] ss:$8 sps:$4 sm:$0xff]  }
 0x6bc   : > { %v2819_v2 = vpack.c.bf16 %v2799_v4, %v2797_v0  ;;  %v2757_v5 = vpop.f32.mrb[120].mxu0  ;;  %v6351_v0 = vld [vmem:[#allocation2 + $0x9d4] ss:$8 sps:$4 sm:$0xff]   ;;  %v6349_v4 = vld [vmem:[#allocation2 + $0x9d0] ss:$8 sps:$4 sm:$0xff]  }
 0x6bd   : > { %v2758_v6 = vadd.f32 %v2757_v5, %v7090_v41  ;;  %v2759_v7 = vpop.f32.mrb[121].mxu0 }
 0x6be   : > { %v2760_v8 = vadd.f32 %v2759_v7, %v7093_v44  ;;  %v2761_v9 = vpop.f32.mrb[122].mxu0  ;;  %3112 = vmatprep.mubr.bf16.mxu1 %v2819_v2 }
 0x6bf   : > { %v2762_v10 = vadd.f32 %v2761_v9, %v7090_v41  ;;  %v2763_v17 = vpop.f32.mrb[123].mxu0  ;;  %3113 = vmatmul.mubr.bf16.gmra.mrb[116].mxu1 %v2818_v1  ;;  %v2800_v11 = vmax.f32 %v2758_v6, 0.0  ;;  %v2858_v1 = vld [vmem:[#allocation4 + $0xe] sm:$0x3] }
 0x6c0   : > { %v2764_v15 = vadd.f32 %v2763_v17, %v7093_v44  ;;  %v2801_v19 = vmax.f32 %v2760_v8, 0.0  ;;  %v7128_v2 = vrot.slane %v2858_v1, %v6857_v14  ;;  %v7131_v5 = vrot.slane %v2858_v1, %v6859_v16 }
 0x6c1   : > { %v2802_v12 = vmax.f32 %v2762_v10, 0.0 }
 0x6c2   : > { %v2803_v18 = vmax.f32 %v2764_v15, 0.0 }
 0x6c3   : > { %v2820_v13 = vpack.c.bf16 %v2802_v12, %v2800_v11 }
 0x6c4   : > { %v2821_v20 = vpack.c.bf16 %v2803_v18, %v2801_v19  ;;  %v2767_v21 = vpop.f32.mrb[124].mxu0 }
 0x6c5   : > { %v2768_v22 = vadd.f32 %v2767_v21, %v7090_v41  ;;  %v2769_v23 = vpop.f32.mrb[125].mxu0 }
 0x6c6   : > { %v2770_v24 = vadd.f32 %v2769_v23, %v7093_v44  ;;  %v2771_v25 = vpop.f32.mrb[126].mxu0  ;;  %3122 = vmatprep.mubr.bf16.mxu1 %v2821_v20 }
 0x6c7   : > { %v2772_v30 = vadd.f32 %v2771_v25, %v7090_v41  ;;  %v2773_v26 = vpop.f32.mrb[127].mxu0  ;;  %3123 = vmatmul.mubr.bf16.gmra.mrb[120].mxu1 %v2820_v13  ;;  %v2804_v31 = vmax.f32 %v2768_v22, 0.0  ;;  %v6310_v41 = vld [vmem:[#allocation2 + $0x900] ss:$8 sps:$4 sm:$0xff]  }
 0x6c8   : > { %v2774_v27 = vadd.f32 %v2773_v26, %v7093_v44  ;;  %v2805_v29 = vmax.f32 %v2770_v24, 0.0  ;;  %3765 = vmatpush1.bf16.msra.mxu1 %v6310_v41  ;;  %v6313_v44 = vld [vmem:[#allocation2 + $0x910] ss:$8 sps:$4 sm:$0xff]  }
 0x6c9   : > { %v2806_v28 = vmax.f32 %v2772_v30, 0.0  ;;  %3766 = vmatprep.subr.bf16.mxu1 %v6315_v39 }
 0x6ca   : > { %v2807_v32 = vmax.f32 %v2774_v27, 0.0 }
 0x6cb   : > { %v2822_v33 = vpack.c.bf16 %v2806_v28, %v2804_v31 }
 0x6cc   : > { %v2823_v34 = vpack.c.bf16 %v2807_v32, %v2805_v29  ;;  %3767 = vmatpush1.bf16.msra.mxu1 %v6313_v44 }
 0x6cd   : > { %3768 = vmatprep.subr.bf16.mxu1 %v6318_v43 }
 0x6ce   : > { %3132 = vmatprep.mubr.bf16.mxu1 %v2823_v34 }
 0x6cf   : > { %3133 = vmatmul.mubr.bf16.gmra.mrb[124].mxu1 %v2822_v33 }
 0x6d0   : > { %3769 = vmatpush1.bf16.msra.mxu1 %v6316_v40 }
 0x6d1   : > { %3770 = vmatprep.subr.bf16.mxu1 %v6321_v45 }
 0x6d4   : > { %3771 = vmatpush1.bf16.msra.mxu1 %v6319_v46 }
 0x6d5   : > { %3772 = vmatprep.subr.bf16.mxu1 %v6324_v47 }
 0x6d8   : > { %3773 = vmatpush1.bf16.msra.mxu1 %v6322_v48 }
 0x6d9   : > { %3774 = vmatprep.subr.bf16.mxu1 %v6327_v49 }
 0x6dc   : > { %3775 = vmatpush1.bf16.msra.mxu1 %v6325_v50 }
 0x6dd   : > { %3776 = vmatprep.subr.bf16.mxu1 %v6330_v55 }
 0x6e0   : > { %3777 = vmatpush1.bf16.msra.mxu1 %v6328_v51 }
 0x6e1   : > { %3778 = vmatprep.subr.bf16.mxu1 %v6333_v52 }
 0x6e4   : > { %3779 = vmatpush1.bf16.msra.mxu1 %v6331_v56 }
 0x6e5   : > { %3780 = vmatprep.subr.bf16.mxu1 %v6336_v53 }
 0x6e8   : > { %3781 = vmatpush1.bf16.msra.mxu1 %v6334_v54 }
 0x6e9   : > { %3782 = vmatprep.subr.bf16.mxu1 %v6339_v57 }
 0x6ec   : > { %3783 = vmatpush1.bf16.msra.mxu1 %v6337_v58 }
 0x6ed   : > { %3784 = vmatprep.subr.bf16.mxu1 %v6342_v59 }
 0x6f0   : > { %3785 = vmatpush1.bf16.msra.mxu1 %v6340_v60 }
 0x6f1   : > { %3786 = vmatprep.subr.bf16.mxu1 %v6345_v61 }
 0x6f4   : > { %3787 = vmatpush1.bf16.msra.mxu1 %v6343_v62 }
 0x6f5   : > { %3788 = vmatprep.subr.bf16.mxu1 %v6348_v3 }
 0x6f8   : > { %3789 = vmatpush1.bf16.msra.mxu1 %v6346_v63 }
 0x6f9   : > { %3790 = vmatprep.subr.bf16.mxu1 %v6351_v0 }
 0x6fc   : > { %3791 = vmatpush1.bf16.msra.mxu1 %v6349_v4 }
 0x76a   : > { %v3064_v6 = vpop.f32.mrb[96].mxu1 }
 0x76b   : > { %v3065_v7 = vadd.f32 %v3064_v6, %v7128_v2  ;;  %v3066_v8 = vpop.f32.mrb[97].mxu1 }
 0x76c   : > { %v3067_v9 = vadd.f32 %v3066_v8, %v7131_v5  ;;  %v3068_v10 = vpop.f32.mrb[98].mxu1 }
 0x76d   : > { %v3069_v17 = vadd.f32 %v3068_v10, %v7128_v2  ;;  %v3070_v15 = vpop.f32.mrb[99].mxu1  ;;  %v3143_v12 = vmax.f32 %v3065_v7, 0.0 }
 0x76e   : > { %v3071_v11 = vadd.f32 %v3070_v15, %v7131_v5  ;;  %v3144_v18 = vmax.f32 %v3067_v9, 0.0 }
 0x76f   : > { %v3145_v19 = vmax.f32 %v3069_v17, 0.0 }
 0x770   : > { %v3146_v13 = vmax.f32 %v3071_v11, 0.0 }
 0x771   : > { %v3175_v20 = vpack.c.bf16 %v3145_v19, %v3143_v12 }
 0x772   : > { %v3176_v21 = vpack.c.bf16 %v3146_v13, %v3144_v18  ;;  %v3074_v22 = vpop.f32.mrb[100].mxu1 }
 0x773   : > { %v3075_v23 = vadd.f32 %v3074_v22, %v7128_v2  ;;  %v3076_v24 = vpop.f32.mrb[101].mxu1 }
 0x774   : > { %v3077_v25 = vadd.f32 %v3076_v24, %v7131_v5  ;;  %v3078_v30 = vpop.f32.mrb[102].mxu1  ;;  %3429 = vmatprep.mubr.bf16.mxu0 %v3176_v21 }
 0x775   : > { %v3079_v26 = vadd.f32 %v3078_v30, %v7128_v2  ;;  %v3080_v27 = vpop.f32.mrb[103].mxu1  ;;  %3430 = vmatmul.mubr.bf16.vlgmr.msra.gmra.mrb[128].mxu0 %v3175_v20  ;;  %v3147_v28 = vmax.f32 %v3075_v23, 0.0 }
 0x776   : > { %v3081_v31 = vadd.f32 %v3080_v27, %v7131_v5  ;;  %v3148_v32 = vmax.f32 %v3077_v25, 0.0 }
 0x777   : > { %v3149_v29 = vmax.f32 %v3079_v26, 0.0 }
 0x778   : > { %v3150_v33 = vmax.f32 %v3081_v31, 0.0 }
 0x779   : > { %v3177_v34 = vpack.c.bf16 %v3149_v29, %v3147_v28 }
 0x77a   : > { %v3178_v35 = vpack.c.bf16 %v3150_v33, %v3148_v32  ;;  %v3084_v36 = vpop.f32.mrb[104].mxu1 }
 0x77b   : > { %v3085_v37 = vadd.f32 %v3084_v36, %v7128_v2  ;;  %v3086_v42 = vpop.f32.mrb[105].mxu1 }
 0x77c   : > { %v3087_v41 = vadd.f32 %v3086_v42, %v7131_v5  ;;  %v3088_v38 = vpop.f32.mrb[106].mxu1  ;;  %3439 = vmatprep.mubr.bf16.mxu0 %v3178_v35 }
 0x77d   : > { %v3089_v39 = vadd.f32 %v3088_v38, %v7128_v2  ;;  %v3090_v44 = vpop.f32.mrb[107].mxu1  ;;  %3440 = vmatmul.mubr.bf16.gmra.mrb[132].mxu0 %v3177_v34  ;;  %v3151_v40 = vmax.f32 %v3085_v37, 0.0 }
 0x77e   : > { %v3091_v43 = vadd.f32 %v3090_v44, %v7131_v5  ;;  %v3152_v46 = vmax.f32 %v3087_v41, 0.0 }
 0x77f   : > { %v3153_v45 = vmax.f32 %v3089_v39, 0.0 }
 0x780   : > { %v3154_v47 = vmax.f32 %v3091_v43, 0.0 }
 0x781   : > { %v3179_v48 = vpack.c.bf16 %v3153_v45, %v3151_v40 }
 0x782   : > { %v3180_v49 = vpack.c.bf16 %v3154_v47, %v3152_v46  ;;  %v3094_v50 = vpop.f32.mrb[108].mxu1 }
 0x783   : > { %v3095_v55 = vadd.f32 %v3094_v50, %v7128_v2  ;;  %v3096_v51 = vpop.f32.mrb[109].mxu1 }
 0x784   : > { %v3097_v52 = vadd.f32 %v3096_v51, %v7131_v5  ;;  %v3098_v56 = vpop.f32.mrb[110].mxu1  ;;  %3449 = vmatprep.mubr.bf16.mxu0 %v3180_v49 }
 0x785   : > { %v3099_v53 = vadd.f32 %v3098_v56, %v7128_v2  ;;  %v3100_v54 = vpop.f32.mrb[111].mxu1  ;;  %3450 = vmatmul.mubr.bf16.gmra.mrb[136].mxu0 %v3179_v48  ;;  %v3155_v58 = vmax.f32 %v3095_v55, 0.0 }
 0x786   : > { %v3101_v57 = vadd.f32 %v3100_v54, %v7131_v5  ;;  %v3156_v60 = vmax.f32 %v3097_v52, 0.0 }
 0x787   : > { %v3157_v59 = vmax.f32 %v3099_v53, 0.0 }
 0x788   : > { %v3158_v61 = vmax.f32 %v3101_v57, 0.0 }
 0x789   : > { %v3181_v62 = vpack.c.bf16 %v3157_v59, %v3155_v58 }
 0x78a   : > { %v3182_v3 = vpack.c.bf16 %v3158_v61, %v3156_v60  ;;  %v3104_v63 = vpop.f32.mrb[112].mxu1  ;;  %v6354_v60 = vld [vmem:[#allocation2 + $0x9e4] ss:$8 sps:$4 sm:$0xff]   ;;  %v6352_v61 = vld [vmem:[#allocation2 + $0x9e0] ss:$8 sps:$4 sm:$0xff]  }
 0x78b   : > { %v3105_v0 = vadd.f32 %v3104_v63, %v7128_v2  ;;  %v3106_v4 = vpop.f32.mrb[113].mxu1  ;;  %3792 = vmatprep.subr.bf16.mxu1 %v6354_v60  ;;  %v6360_v63 = vld [vmem:[#allocation2 + $0xa04] ss:$8 sps:$4 sm:$0xff]  }
 0x78c   : > { %v3107_v1 = vadd.f32 %v3106_v4, %v7131_v5  ;;  %v3108_v6 = vpop.f32.mrb[114].mxu1  ;;  %3459 = vmatprep.mubr.bf16.mxu0 %v3182_v3  ;;  %3793 = vmatpush1.bf16.msra.mxu1 %v6352_v61  ;;  %v6355_v3 = vld [vmem:[#allocation2 + $0x9f0] ss:$8 sps:$4 sm:$0xff]   ;;  %v6366_v4 = vld [vmem:[#allocation2 + $0xa24] ss:$8 sps:$4 sm:$0xff]  }
 0x78d   : > { %v3109_v7 = vadd.f32 %v3108_v6, %v7128_v2  ;;  %v3110_v8 = vpop.f32.mrb[115].mxu1  ;;  %3460 = vmatmul.mubr.bf16.gmra.mrb[140].mxu0 %v3181_v62  ;;  %v3159_v10 = vmax.f32 %v3105_v0, 0.0  ;;  %v6357_v62 = vld [vmem:[#allocation2 + $0x9f4] ss:$8 sps:$4 sm:$0xff]   ;;  %4131 = vmatprep.subr.bf16.mxu0 %v6360_v63 }
 0x78e   : > { %v3111_v9 = vadd.f32 %v3110_v8, %v7131_v5  ;;  %v3160_v15 = vmax.f32 %v3107_v1, 0.0  ;;  %3794 = vmatprep.subr.bf16.mxu1 %v6357_v62  ;;  %v6363_v0 = vld [vmem:[#allocation2 + $0xa14] ss:$8 sps:$4 sm:$0xff]   ;;  %v6364_v1 = vld [vmem:[#allocation2 + $0xa20] ss:$8 sps:$4 sm:$0xff]  }
 0x78f   : > { %v3161_v17 = vmax.f32 %v3109_v7, 0.0  ;;  %v6369_v6 = vld [vmem:[#allocation2 + $0xa34] ss:$8 sps:$4 sm:$0xff]   ;;  %v6367_v7 = vld [vmem:[#allocation2 + $0xa30] ss:$8 sps:$4 sm:$0xff]  }
 0x790   : > { %v3162_v11 = vmax.f32 %v3111_v9, 0.0  ;;  %3795 = vmatpush1.bf16.msra.mxu1 %v6355_v3  ;;  %v6372_v8 = vld [vmem:[#allocation2 + $0xa44] ss:$8 sps:$4 sm:$0xff]   ;;  %v6370_v9 = vld [vmem:[#allocation2 + $0xa40] ss:$8 sps:$4 sm:$0xff]  }
 0x791   : > { %v3183_v12 = vpack.c.bf16 %v3161_v17, %v3159_v10  ;;  %v6375_v10 = vld [vmem:[#allocation2 + $0xa54] ss:$8 sps:$4 sm:$0xff]   ;;  %v6373_v17 = vld [vmem:[#allocation2 + $0xa50] ss:$8 sps:$4 sm:$0xff]  }
 0x792   : > { %v3184_v19 = vpack.c.bf16 %v3162_v11, %v3160_v15  ;;  %v3114_v18 = vpop.f32.mrb[116].mxu1  ;;  %v6378_v15 = vld [vmem:[#allocation2 + $0xa64] ss:$8 sps:$4 sm:$0xff]   ;;  %v6376_v11 = vld [vmem:[#allocation2 + $0xa60] ss:$8 sps:$4 sm:$0xff]  }
 0x793   : > { %v3115_v13 = vadd.f32 %v3114_v18, %v7128_v2  ;;  %v3116_v20 = vpop.f32.mrb[117].mxu1  ;;  %v6384_v18 = vld [vmem:[#allocation2 + $0xa84] ss:$8 sps:$4 sm:$0xff]  }
 0x794   : > { %v3117_v21 = vadd.f32 %v3116_v20, %v7131_v5  ;;  %v3118_v22 = vpop.f32.mrb[118].mxu1  ;;  %3469 = vmatprep.mubr.bf16.mxu0 %v3184_v19  ;;  %v6379_v19 = vld [vmem:[#allocation2 + $0xa70] ss:$8 sps:$4 sm:$0xff]   ;;  %v6387_v20 = vld [vmem:[#allocation2 + $0xa94] ss:$8 sps:$4 sm:$0xff]  }
 0x795   : > { %v3119_v23 = vadd.f32 %v3118_v22, %v7128_v2  ;;  %v3120_v24 = vpop.f32.mrb[119].mxu1  ;;  %3470 = vmatmul.mubr.bf16.gmra.mrb[144].mxu0 %v3183_v12  ;;  %v3163_v30 = vmax.f32 %v3115_v13, 0.0  ;;  %v6381_v12 = vld [vmem:[#allocation2 + $0xa74] ss:$8 sps:$4 sm:$0xff]   ;;  %v6382_v13 = vld [vmem:[#allocation2 + $0xa80] ss:$8 sps:$4 sm:$0xff]  }
 0x796   : > { %v3121_v25 = vadd.f32 %v3120_v24, %v7131_v5  ;;  %v3164_v27 = vmax.f32 %v3117_v21, 0.0  ;;  %v6385_v21 = vld [vmem:[#allocation2 + $0xa90] ss:$8 sps:$4 sm:$0xff]   ;;  %v6390_v22 = vld [vmem:[#allocation2 + $0xaa4] ss:$8 sps:$4 sm:$0xff]  }
 0x797   : > { %v3165_v26 = vmax.f32 %v3119_v23, 0.0  ;;  %v6388_v23 = vld [vmem:[#allocation2 + $0xaa0] ss:$8 sps:$4 sm:$0xff]   ;;  %v6393_v24 = vld [vmem:[#allocation2 + $0xab4] ss:$8 sps:$4 sm:$0xff]  }
 0x798   : > { %v3166_v31 = vmax.f32 %v3121_v25, 0.0  ;;  %v6391_v25 = vld [vmem:[#allocation2 + $0xab0] ss:$8 sps:$4 sm:$0xff]  }
 0x799   : > { %v3185_v28 = vpack.c.bf16 %v3165_v26, %v3163_v30  ;;  %v6396_v30 = vld [vmem:[#allocation2 + $0xac4] ss:$8 sps:$4 sm:$0xff]   ;;  %v6394_v26 = vld [vmem:[#allocation2 + $0xac0] ss:$8 sps:$4 sm:$0xff]  }
 0x79a   : > { %v3186_v29 = vpack.c.bf16 %v3166_v31, %v3164_v27  ;;  %v3124_v32 = vpop.f32.mrb[120].mxu1  ;;  %v6399_v27 = vld [vmem:[#allocation2 + $0xad4] ss:$8 sps:$4 sm:$0xff]   ;;  %v6397_v31 = vld [vmem:[#allocation2 + $0xad0] ss:$8 sps:$4 sm:$0xff]  }
 0x79b   : > { %v3125_v33 = vadd.f32 %v3124_v32, %v7128_v2  ;;  %v3126_v34 = vpop.f32.mrb[121].mxu1 }
 0x79c   : > { %v3127_v35 = vadd.f32 %v3126_v34, %v7131_v5  ;;  %v3128_v36 = vpop.f32.mrb[122].mxu1  ;;  %3479 = vmatprep.mubr.bf16.mxu0 %v3186_v29 }
 0x79d   : > { %v3129_v37 = vadd.f32 %v3128_v36, %v7128_v2  ;;  %v3130_v42 = vpop.f32.mrb[123].mxu1  ;;  %3480 = vmatmul.mubr.bf16.gmra.mrb[148].mxu0 %v3185_v28  ;;  %v3167_v38 = vmax.f32 %v3125_v33, 0.0  ;;  %v3225_v28 = vld [vmem:[#allocation4 + $0x10] sm:$0x3] }
 0x79e   : > { %v3131_v41 = vadd.f32 %v3130_v42, %v7131_v5  ;;  %v3168_v44 = vmax.f32 %v3127_v35, 0.0  ;;  %v7166_v29 = vrot.slane %v3225_v28, %v6857_v14  ;;  %v7169_v32 = vrot.slane %v3225_v28, %v6859_v16 }
 0x79f   : > { %v3169_v39 = vmax.f32 %v3129_v37, 0.0 }
 0x7a0   : > { %v3170_v43 = vmax.f32 %v3131_v41, 0.0 }
 0x7a1   : > { %v3187_v40 = vpack.c.bf16 %v3169_v39, %v3167_v38 }
 0x7a2   : > { %v3188_v45 = vpack.c.bf16 %v3170_v43, %v3168_v44  ;;  %v3134_v46 = vpop.f32.mrb[124].mxu1 }
 0x7a3   : > { %v3135_v47 = vadd.f32 %v3134_v46, %v7128_v2  ;;  %v3136_v48 = vpop.f32.mrb[125].mxu1 }
 0x7a4   : > { %v3137_v49 = vadd.f32 %v3136_v48, %v7131_v5  ;;  %v3138_v50 = vpop.f32.mrb[126].mxu1  ;;  %3489 = vmatprep.mubr.bf16.mxu0 %v3188_v45 }
 0x7a5   : > { %v3139_v55 = vadd.f32 %v3138_v50, %v7128_v2  ;;  %v3140_v51 = vpop.f32.mrb[127].mxu1  ;;  %3490 = vmatmul.mubr.bf16.gmra.mrb[152].mxu0 %v3187_v40  ;;  %v3171_v56 = vmax.f32 %v3135_v47, 0.0  ;;  %v6358_v2 = vld [vmem:[#allocation2 + $0xa00] ss:$8 sps:$4 sm:$0xff]  }
 0x7a6   : > { %v3141_v52 = vadd.f32 %v3140_v51, %v7131_v5  ;;  %v3172_v54 = vmax.f32 %v3137_v49, 0.0  ;;  %4132 = vmatpush1.bf16.msra.mxu0 %v6358_v2  ;;  %v6361_v5 = vld [vmem:[#allocation2 + $0xa10] ss:$8 sps:$4 sm:$0xff]  }
 0x7a7   : > { %v3173_v53 = vmax.f32 %v3139_v55, 0.0  ;;  %4133 = vmatprep.subr.bf16.mxu0 %v6363_v0 }
 0x7a8   : > { %v3174_v57 = vmax.f32 %v3141_v52, 0.0 }
 0x7a9   : > { %v3189_v58 = vpack.c.bf16 %v3173_v53, %v3171_v56 }
 0x7aa   : > { %v3190_v59 = vpack.c.bf16 %v3174_v57, %v3172_v54  ;;  %4134 = vmatpush1.bf16.msra.mxu0 %v6361_v5 }
 0x7ab   : > { %4135 = vmatprep.subr.bf16.mxu0 %v6366_v4 }
 0x7ac   : > { %3499 = vmatprep.mubr.bf16.mxu0 %v3190_v59 }
 0x7ad   : > { %3500 = vmatmul.mubr.bf16.gmra.mrb[156].mxu0 %v3189_v58 }
 0x7ae   : > { %4136 = vmatpush1.bf16.msra.mxu0 %v6364_v1 }
 0x7af   : > { %4137 = vmatprep.subr.bf16.mxu0 %v6369_v6 }
 0x7b2   : > { %4138 = vmatpush1.bf16.msra.mxu0 %v6367_v7 }
 0x7b3   : > { %4139 = vmatprep.subr.bf16.mxu0 %v6372_v8 }
 0x7b6   : > { %4140 = vmatpush1.bf16.msra.mxu0 %v6370_v9 }
 0x7b7   : > { %4141 = vmatprep.subr.bf16.mxu0 %v6375_v10 }
 0x7ba   : > { %4142 = vmatpush1.bf16.msra.mxu0 %v6373_v17 }
 0x7bb   : > { %4143 = vmatprep.subr.bf16.mxu0 %v6378_v15 }
 0x7be   : > { %4144 = vmatpush1.bf16.msra.mxu0 %v6376_v11 }
 0x7bf   : > { %4145 = vmatprep.subr.bf16.mxu0 %v6381_v12 }
 0x7c2   : > { %4146 = vmatpush1.bf16.msra.mxu0 %v6379_v19 }
 0x7c3   : > { %4147 = vmatprep.subr.bf16.mxu0 %v6384_v18 }
 0x7c6   : > { %4148 = vmatpush1.bf16.msra.mxu0 %v6382_v13 }
 0x7c7   : > { %4149 = vmatprep.subr.bf16.mxu0 %v6387_v20 }
 0x7ca   : > { %4150 = vmatpush1.bf16.msra.mxu0 %v6385_v21 }
 0x7cb   : > { %4151 = vmatprep.subr.bf16.mxu0 %v6390_v22 }
 0x7ce   : > { %4152 = vmatpush1.bf16.msra.mxu0 %v6388_v23 }
 0x7cf   : > { %4153 = vmatprep.subr.bf16.mxu0 %v6393_v24 }
 0x7d2   : > { %4154 = vmatpush1.bf16.msra.mxu0 %v6391_v25 }
 0x7d3   : > { %4155 = vmatprep.subr.bf16.mxu0 %v6396_v30 }
 0x7d6   : > { %4156 = vmatpush1.bf16.msra.mxu0 %v6394_v26 }
 0x7d7   : > { %4157 = vmatprep.subr.bf16.mxu0 %v6399_v27 }
 0x7da   : > { %4158 = vmatpush1.bf16.msra.mxu0 %v6397_v31 }
 0x848   : > { %v3431_v33 = vpop.f32.mrb[128].mxu0 }
 0x849   : > { %v3432_v34 = vadd.f32 %v3431_v33, %v7166_v29  ;;  %v3433_v35 = vpop.f32.mrb[129].mxu0 }
 0x84a   : > { %v3434_v36 = vadd.f32 %v3433_v35, %v7169_v32  ;;  %v3435_v37 = vpop.f32.mrb[130].mxu0 }
 0x84b   : > { %v3436_v42 = vadd.f32 %v3435_v37, %v7166_v29  ;;  %v3437_v41 = vpop.f32.mrb[131].mxu0  ;;  %v3510_v39 = vmax.f32 %v3432_v34, 0.0 }
 0x84c   : > { %v3438_v38 = vadd.f32 %v3437_v41, %v7169_v32  ;;  %v3511_v43 = vmax.f32 %v3434_v36, 0.0 }
 0x84d   : > { %v3512_v44 = vmax.f32 %v3436_v42, 0.0 }
 0x84e   : > { %v3513_v40 = vmax.f32 %v3438_v38, 0.0 }
 0x84f   : > { %v3542_v45 = vpack.c.bf16 %v3512_v44, %v3510_v39 }
 0x850   : > { %v3543_v46 = vpack.c.bf16 %v3513_v40, %v3511_v43  ;;  %v3441_v47 = vpop.f32.mrb[132].mxu0 }
 0x851   : > { %v3442_v48 = vadd.f32 %v3441_v47, %v7166_v29  ;;  %v3443_v49 = vpop.f32.mrb[133].mxu0 }
 0x852   : > { %v3444_v50 = vadd.f32 %v3443_v49, %v7169_v32  ;;  %v3445_v55 = vpop.f32.mrb[134].mxu0  ;;  %3796 = vmatprep.mubr.bf16.mxu1 %v3543_v46 }
 0x853   : > { %v3446_v51 = vadd.f32 %v3445_v55, %v7166_v29  ;;  %v3447_v52 = vpop.f32.mrb[135].mxu0  ;;  %3797 = vmatmul.mubr.bf16.vlgmr.msra.gmra.mrb[128].mxu1 %v3542_v45  ;;  %v3514_v53 = vmax.f32 %v3442_v48, 0.0 }
 0x854   : > { %v3448_v56 = vadd.f32 %v3447_v52, %v7169_v32  ;;  %v3515_v57 = vmax.f32 %v3444_v50, 0.0 }
 0x855   : > { %v3516_v54 = vmax.f32 %v3446_v51, 0.0 }
 0x856   : > { %v3517_v58 = vmax.f32 %v3448_v56, 0.0 }
 0x857   : > { %v3544_v59 = vpack.c.bf16 %v3516_v54, %v3514_v53 }
 0x858   : > { %v3545_v60 = vpack.c.bf16 %v3517_v58, %v3515_v57  ;;  %v3451_v61 = vpop.f32.mrb[136].mxu0 }
 0x859   : > { %v3452_v62 = vadd.f32 %v3451_v61, %v7166_v29  ;;  %v3453_v3 = vpop.f32.mrb[137].mxu0 }
 0x85a   : > { %v3454_v2 = vadd.f32 %v3453_v3, %v7169_v32  ;;  %v3455_v63 = vpop.f32.mrb[138].mxu0  ;;  %3806 = vmatprep.mubr.bf16.mxu1 %v3545_v60 }
 0x85b   : > { %v3456_v0 = vadd.f32 %v3455_v63, %v7166_v29  ;;  %v3457_v5 = vpop.f32.mrb[139].mxu0  ;;  %3807 = vmatmul.mubr.bf16.gmra.mrb[132].mxu1 %v3544_v59  ;;  %v3518_v1 = vmax.f32 %v3452_v62, 0.0 }
 0x85c   : > { %v3458_v4 = vadd.f32 %v3457_v5, %v7169_v32  ;;  %v3519_v7 = vmax.f32 %v3454_v2, 0.0 }
 0x85d   : > { %v3520_v6 = vmax.f32 %v3456_v0, 0.0 }
 0x85e   : > { %v3521_v8 = vmax.f32 %v3458_v4, 0.0 }
 0x85f   : > { %v3546_v9 = vpack.c.bf16 %v3520_v6, %v3518_v1 }
 0x860   : > { %v3547_v10 = vpack.c.bf16 %v3521_v8, %v3519_v7  ;;  %v3461_v17 = vpop.f32.mrb[140].mxu0 }
 0x861   : > { %v3462_v15 = vadd.f32 %v3461_v17, %v7166_v29  ;;  %v3463_v11 = vpop.f32.mrb[141].mxu0 }
 0x862   : > { %v3464_v12 = vadd.f32 %v3463_v11, %v7169_v32  ;;  %v3465_v19 = vpop.f32.mrb[142].mxu0  ;;  %3816 = vmatprep.mubr.bf16.mxu1 %v3547_v10 }
 0x863   : > { %v3466_v18 = vadd.f32 %v3465_v19, %v7166_v29  ;;  %v3467_v13 = vpop.f32.mrb[143].mxu0  ;;  %3817 = vmatmul.mubr.bf16.gmra.mrb[136].mxu1 %v3546_v9  ;;  %v3522_v21 = vmax.f32 %v3462_v15, 0.0 }
 0x864   : > { %v3468_v20 = vadd.f32 %v3467_v13, %v7169_v32  ;;  %v3523_v23 = vmax.f32 %v3464_v12, 0.0 }
 0x865   : > { %v3524_v22 = vmax.f32 %v3466_v18, 0.0 }
 0x866   : > { %v3525_v24 = vmax.f32 %v3468_v20, 0.0 }
 0x867   : > { %v3548_v25 = vpack.c.bf16 %v3524_v22, %v3522_v21 }
 0x868   : > { %v3549_v30 = vpack.c.bf16 %v3525_v24, %v3523_v23  ;;  %v3471_v26 = vpop.f32.mrb[144].mxu0  ;;  %v6402_v23 = vld [vmem:[#allocation2 + $0xae4] ss:$8 sps:$4 sm:$0xff]   ;;  %v6400_v24 = vld [vmem:[#allocation2 + $0xae0] ss:$8 sps:$4 sm:$0xff]  }
 0x869   : > { %v3472_v27 = vadd.f32 %v3471_v26, %v7166_v29  ;;  %v3473_v31 = vpop.f32.mrb[145].mxu0  ;;  %4159 = vmatprep.subr.bf16.mxu0 %v6402_v23  ;;  %v6408_v26 = vld [vmem:[#allocation2 + $0xb04] ss:$8 sps:$4 sm:$0xff]  }
 0x86a   : > { %v3474_v28 = vadd.f32 %v3473_v31, %v7169_v32  ;;  %v3475_v33 = vpop.f32.mrb[146].mxu0  ;;  %3826 = vmatprep.mubr.bf16.mxu1 %v3549_v30  ;;  %4160 = vmatpush1.bf16.msra.mxu0 %v6400_v24  ;;  %v6403_v30 = vld [vmem:[#allocation2 + $0xaf0] ss:$8 sps:$4 sm:$0xff]   ;;  %v6414_v31 = vld [vmem:[#allocation2 + $0xb24] ss:$8 sps:$4 sm:$0xff]  }
 0x86b   : > { %v3476_v34 = vadd.f32 %v3475_v33, %v7166_v29  ;;  %v3477_v35 = vpop.f32.mrb[147].mxu0  ;;  %3827 = vmatmul.mubr.bf16.gmra.mrb[140].mxu1 %v3548_v25  ;;  %v3526_v37 = vmax.f32 %v3472_v27, 0.0  ;;  %v6405_v25 = vld [vmem:[#allocation2 + $0xaf4] ss:$8 sps:$4 sm:$0xff]   ;;  %4498 = vmatprep.subr.bf16.mxu1 %v6408_v26 }
 0x86c   : > { %v3478_v36 = vadd.f32 %v3477_v35, %v7169_v32  ;;  %v3527_v41 = vmax.f32 %v3474_v28, 0.0  ;;  %4161 = vmatprep.subr.bf16.mxu0 %v6405_v25  ;;  %v6411_v27 = vld [vmem:[#allocation2 + $0xb14] ss:$8 sps:$4 sm:$0xff]   ;;  %v6412_v28 = vld [vmem:[#allocation2 + $0xb20] ss:$8 sps:$4 sm:$0xff]  }
 0x86d   : > { %v3528_v42 = vmax.f32 %v3476_v34, 0.0  ;;  %v6417_v33 = vld [vmem:[#allocation2 + $0xb34] ss:$8 sps:$4 sm:$0xff]   ;;  %v6415_v34 = vld [vmem:[#allocation2 + $0xb30] ss:$8 sps:$4 sm:$0xff]  }
 0x86e   : > { %v3529_v38 = vmax.f32 %v3478_v36, 0.0  ;;  %4162 = vmatpush1.bf16.msra.mxu0 %v6403_v30  ;;  %v6420_v35 = vld [vmem:[#allocation2 + $0xb44] ss:$8 sps:$4 sm:$0xff]   ;;  %v6418_v36 = vld [vmem:[#allocation2 + $0xb40] ss:$8 sps:$4 sm:$0xff]  }
 0x86f   : > { %v3550_v39 = vpack.c.bf16 %v3528_v42, %v3526_v37  ;;  %v6423_v37 = vld [vmem:[#allocation2 + $0xb54] ss:$8 sps:$4 sm:$0xff]   ;;  %v6421_v42 = vld [vmem:[#allocation2 + $0xb50] ss:$8 sps:$4 sm:$0xff]  }
 0x870   : > { %v3551_v44 = vpack.c.bf16 %v3529_v38, %v3527_v41  ;;  %v3481_v43 = vpop.f32.mrb[148].mxu0  ;;  %v6426_v41 = vld [vmem:[#allocation2 + $0xb64] ss:$8 sps:$4 sm:$0xff]   ;;  %v6424_v38 = vld [vmem:[#allocation2 + $0xb60] ss:$8 sps:$4 sm:$0xff]  }
 0x871   : > { %v3482_v40 = vadd.f32 %v3481_v43, %v7166_v29  ;;  %v3483_v45 = vpop.f32.mrb[149].mxu0  ;;  %v6432_v43 = vld [vmem:[#allocation2 + $0xb84] ss:$8 sps:$4 sm:$0xff]  }
 0x872   : > { %v3484_v46 = vadd.f32 %v3483_v45, %v7169_v32  ;;  %v3485_v47 = vpop.f32.mrb[150].mxu0  ;;  %3836 = vmatprep.mubr.bf16.mxu1 %v3551_v44  ;;  %v6427_v44 = vld [vmem:[#allocation2 + $0xb70] ss:$8 sps:$4 sm:$0xff]   ;;  %v6435_v45 = vld [vmem:[#allocation2 + $0xb94] ss:$8 sps:$4 sm:$0xff]  }
 0x873   : > { %v3486_v48 = vadd.f32 %v3485_v47, %v7166_v29  ;;  %v3487_v49 = vpop.f32.mrb[151].mxu0  ;;  %3837 = vmatmul.mubr.bf16.gmra.mrb[144].mxu1 %v3550_v39  ;;  %v3530_v55 = vmax.f32 %v3482_v40, 0.0  ;;  %v6429_v39 = vld [vmem:[#allocation2 + $0xb74] ss:$8 sps:$4 sm:$0xff]   ;;  %v6430_v40 = vld [vmem:[#allocation2 + $0xb80] ss:$8 sps:$4 sm:$0xff]  }
 0x874   : > { %v3488_v50 = vadd.f32 %v3487_v49, %v7169_v32  ;;  %v3531_v52 = vmax.f32 %v3484_v46, 0.0  ;;  %v6433_v46 = vld [vmem:[#allocation2 + $0xb90] ss:$8 sps:$4 sm:$0xff]   ;;  %v6438_v47 = vld [vmem:[#allocation2 + $0xba4] ss:$8 sps:$4 sm:$0xff]  }
 0x875   : > { %v3532_v51 = vmax.f32 %v3486_v48, 0.0  ;;  %v6436_v48 = vld [vmem:[#allocation2 + $0xba0] ss:$8 sps:$4 sm:$0xff]   ;;  %v6441_v49 = vld [vmem:[#allocation2 + $0xbb4] ss:$8 sps:$4 sm:$0xff]  }
 0x876   : > { %v3533_v56 = vmax.f32 %v3488_v50, 0.0  ;;  %v6439_v50 = vld [vmem:[#allocation2 + $0xbb0] ss:$8 sps:$4 sm:$0xff]  }
 0x877   : > { %v3552_v53 = vpack.c.bf16 %v3532_v51, %v3530_v55  ;;  %v6444_v55 = vld [vmem:[#allocation2 + $0xbc4] ss:$8 sps:$4 sm:$0xff]   ;;  %v6442_v51 = vld [vmem:[#allocation2 + $0xbc0] ss:$8 sps:$4 sm:$0xff]  }
 0x878   : > { %v3553_v54 = vpack.c.bf16 %v3533_v56, %v3531_v52  ;;  %v3491_v57 = vpop.f32.mrb[152].mxu0  ;;  %v6447_v52 = vld [vmem:[#allocation2 + $0xbd4] ss:$8 sps:$4 sm:$0xff]   ;;  %v6445_v56 = vld [vmem:[#allocation2 + $0xbd0] ss:$8 sps:$4 sm:$0xff]  }
 0x879   : > { %v3492_v58 = vadd.f32 %v3491_v57, %v7166_v29  ;;  %v3493_v59 = vpop.f32.mrb[153].mxu0 }
 0x87a   : > { %v3494_v60 = vadd.f32 %v3493_v59, %v7169_v32  ;;  %v3495_v61 = vpop.f32.mrb[154].mxu0  ;;  %3846 = vmatprep.mubr.bf16.mxu1 %v3553_v54 }
 0x87b   : > { %v3496_v62 = vadd.f32 %v3495_v61, %v7166_v29  ;;  %v3497_v3 = vpop.f32.mrb[155].mxu0  ;;  %3847 = vmatmul.mubr.bf16.gmra.mrb[148].mxu1 %v3552_v53  ;;  %v3534_v63 = vmax.f32 %v3492_v58, 0.0  ;;  %v3592_v53 = vld [vmem:[#allocation4 + $0x12] sm:$0x3] }
 0x87c   : > { %v3498_v2 = vadd.f32 %v3497_v3, %v7169_v32  ;;  %v3535_v5 = vmax.f32 %v3494_v60, 0.0  ;;  %v7204_v54 = vrot.slane %v3592_v53, %v6857_v14  ;;  %v7207_v57 = vrot.slane %v3592_v53, %v6859_v16 }
 0x87d   : > { %v3536_v0 = vmax.f32 %v3496_v62, 0.0 }
 0x87e   : > { %v3537_v4 = vmax.f32 %v3498_v2, 0.0 }
 0x87f   : > { %v3554_v1 = vpack.c.bf16 %v3536_v0, %v3534_v63 }
 0x880   : > { %v3555_v6 = vpack.c.bf16 %v3537_v4, %v3535_v5  ;;  %v3501_v7 = vpop.f32.mrb[156].mxu0 }
 0x881   : > { %v3502_v8 = vadd.f32 %v3501_v7, %v7166_v29  ;;  %v3503_v9 = vpop.f32.mrb[157].mxu0 }
 0x882   : > { %v3504_v10 = vadd.f32 %v3503_v9, %v7169_v32  ;;  %v3505_v17 = vpop.f32.mrb[158].mxu0  ;;  %3856 = vmatprep.mubr.bf16.mxu1 %v3555_v6 }
 0x883   : > { %v3506_v15 = vadd.f32 %v3505_v17, %v7166_v29  ;;  %v3507_v11 = vpop.f32.mrb[159].mxu0  ;;  %3857 = vmatmul.mubr.bf16.gmra.mrb[152].mxu1 %v3554_v1  ;;  %v3538_v19 = vmax.f32 %v3502_v8, 0.0  ;;  %v6406_v29 = vld [vmem:[#allocation2 + $0xb00] ss:$8 sps:$4 sm:$0xff]  }
 0x884   : > { %v3508_v12 = vadd.f32 %v3507_v11, %v7169_v32  ;;  %v3539_v13 = vmax.f32 %v3504_v10, 0.0  ;;  %4499 = vmatpush1.bf16.msra.mxu1 %v6406_v29  ;;  %v6409_v32 = vld [vmem:[#allocation2 + $0xb10] ss:$8 sps:$4 sm:$0xff]  }
 0x885   : > { %v3540_v18 = vmax.f32 %v3506_v15, 0.0  ;;  %4500 = vmatprep.subr.bf16.mxu1 %v6411_v27 }
 0x886   : > { %v3541_v20 = vmax.f32 %v3508_v12, 0.0 }
 0x887   : > { %v3556_v21 = vpack.c.bf16 %v3540_v18, %v3538_v19 }
 0x888   : > { %v3557_v22 = vpack.c.bf16 %v3541_v20, %v3539_v13  ;;  %4501 = vmatpush1.bf16.msra.mxu1 %v6409_v32 }
 0x889   : > { %4502 = vmatprep.subr.bf16.mxu1 %v6414_v31 }
 0x88a   : > { %3866 = vmatprep.mubr.bf16.mxu1 %v3557_v22 }
 0x88b   : > { %3867 = vmatmul.mubr.bf16.gmra.mrb[156].mxu1 %v3556_v21 }
 0x88c   : > { %4503 = vmatpush1.bf16.msra.mxu1 %v6412_v28 }
 0x88d   : > { %4504 = vmatprep.subr.bf16.mxu1 %v6417_v33 }
 0x890   : > { %4505 = vmatpush1.bf16.msra.mxu1 %v6415_v34 }
 0x891   : > { %4506 = vmatprep.subr.bf16.mxu1 %v6420_v35 }
 0x894   : > { %4507 = vmatpush1.bf16.msra.mxu1 %v6418_v36 }
 0x895   : > { %4508 = vmatprep.subr.bf16.mxu1 %v6423_v37 }
 0x898   : > { %4509 = vmatpush1.bf16.msra.mxu1 %v6421_v42 }
 0x899   : > { %4510 = vmatprep.subr.bf16.mxu1 %v6426_v41 }
 0x89c   : > { %4511 = vmatpush1.bf16.msra.mxu1 %v6424_v38 }
 0x89d   : > { %4512 = vmatprep.subr.bf16.mxu1 %v6429_v39 }
 0x8a0   : > { %4513 = vmatpush1.bf16.msra.mxu1 %v6427_v44 }
 0x8a1   : > { %4514 = vmatprep.subr.bf16.mxu1 %v6432_v43 }
 0x8a4   : > { %4515 = vmatpush1.bf16.msra.mxu1 %v6430_v40 }
 0x8a5   : > { %4516 = vmatprep.subr.bf16.mxu1 %v6435_v45 }
 0x8a8   : > { %4517 = vmatpush1.bf16.msra.mxu1 %v6433_v46 }
 0x8a9   : > { %4518 = vmatprep.subr.bf16.mxu1 %v6438_v47 }
 0x8ac   : > { %4519 = vmatpush1.bf16.msra.mxu1 %v6436_v48 }
 0x8ad   : > { %4520 = vmatprep.subr.bf16.mxu1 %v6441_v49 }
 0x8b0   : > { %4521 = vmatpush1.bf16.msra.mxu1 %v6439_v50 }
 0x8b1   : > { %4522 = vmatprep.subr.bf16.mxu1 %v6444_v55 }
 0x8b4   : > { %4523 = vmatpush1.bf16.msra.mxu1 %v6442_v51 }
 0x8b5   : > { %4524 = vmatprep.subr.bf16.mxu1 %v6447_v52 }
 0x8b8   : > { %4525 = vmatpush1.bf16.msra.mxu1 %v6445_v56 }
 0x926   : > { %v3798_v58 = vpop.f32.mrb[128].mxu1 }
 0x927   : > { %v3799_v59 = vadd.f32 %v3798_v58, %v7204_v54  ;;  %v3800_v60 = vpop.f32.mrb[129].mxu1 }
 0x928   : > { %v3801_v61 = vadd.f32 %v3800_v60, %v7207_v57  ;;  %v3802_v62 = vpop.f32.mrb[130].mxu1 }
 0x929   : > { %v3803_v3 = vadd.f32 %v3802_v62, %v7204_v54  ;;  %v3804_v2 = vpop.f32.mrb[131].mxu1  ;;  %v3877_v0 = vmax.f32 %v3799_v59, 0.0 }
 0x92a   : > { %v3805_v63 = vadd.f32 %v3804_v2, %v7207_v57  ;;  %v3878_v4 = vmax.f32 %v3801_v61, 0.0 }
 0x92b   : > { %v3879_v5 = vmax.f32 %v3803_v3, 0.0 }
 0x92c   : > { %v3880_v1 = vmax.f32 %v3805_v63, 0.0 }
 0x92d   : > { %v3909_v6 = vpack.c.bf16 %v3879_v5, %v3877_v0 }
 0x92e   : > { %v3910_v7 = vpack.c.bf16 %v3880_v1, %v3878_v4  ;;  %v3808_v8 = vpop.f32.mrb[132].mxu1 }
 0x92f   : > { %v3809_v9 = vadd.f32 %v3808_v8, %v7204_v54  ;;  %v3810_v10 = vpop.f32.mrb[133].mxu1 }
 0x930   : > { %v3811_v17 = vadd.f32 %v3810_v10, %v7207_v57  ;;  %v3812_v15 = vpop.f32.mrb[134].mxu1  ;;  %4163 = vmatprep.mubr.bf16.mxu0 %v3910_v7 }
 0x931   : > { %v3813_v11 = vadd.f32 %v3812_v15, %v7204_v54  ;;  %v3814_v12 = vpop.f32.mrb[135].mxu1  ;;  %4164 = vmatmul.mubr.bf16.vlgmr.msra.gmra.mrb[160].mxu0 %v3909_v6  ;;  %v3881_v18 = vmax.f32 %v3809_v9, 0.0 }
 0x932   : > { %v3815_v19 = vadd.f32 %v3814_v12, %v7207_v57  ;;  %v3882_v20 = vmax.f32 %v3811_v17, 0.0 }
 0x933   : > { %v3883_v13 = vmax.f32 %v3813_v11, 0.0 }
 0x934   : > { %v3884_v21 = vmax.f32 %v3815_v19, 0.0 }
 0x935   : > { %v3911_v22 = vpack.c.bf16 %v3883_v13, %v3881_v18 }
 0x936   : > { %v3912_v23 = vpack.c.bf16 %v3884_v21, %v3882_v20  ;;  %v3818_v24 = vpop.f32.mrb[136].mxu1 }
 0x937   : > { %v3819_v25 = vadd.f32 %v3818_v24, %v7204_v54  ;;  %v3820_v30 = vpop.f32.mrb[137].mxu1 }
 0x938   : > { %v3821_v29 = vadd.f32 %v3820_v30, %v7207_v57  ;;  %v3822_v26 = vpop.f32.mrb[138].mxu1  ;;  %4173 = vmatprep.mubr.bf16.mxu0 %v3912_v23 }
 0x939   : > { %v3823_v27 = vadd.f32 %v3822_v26, %v7204_v54  ;;  %v3824_v32 = vpop.f32.mrb[139].mxu1  ;;  %4174 = vmatmul.mubr.bf16.gmra.mrb[164].mxu0 %v3911_v22  ;;  %v3885_v28 = vmax.f32 %v3819_v25, 0.0 }
 0x93a   : > { %v3825_v31 = vadd.f32 %v3824_v32, %v7207_v57  ;;  %v3886_v34 = vmax.f32 %v3821_v29, 0.0 }
 0x93b   : > { %v3887_v33 = vmax.f32 %v3823_v27, 0.0 }
 0x93c   : > { %v3888_v35 = vmax.f32 %v3825_v31, 0.0 }
 0x93d   : > { %v3913_v36 = vpack.c.bf16 %v3887_v33, %v3885_v28 }
 0x93e   : > { %v3914_v37 = vpack.c.bf16 %v3888_v35, %v3886_v34  ;;  %v3828_v42 = vpop.f32.mrb[140].mxu1 }
 0x93f   : > { %v3829_v41 = vadd.f32 %v3828_v42, %v7204_v54  ;;  %v3830_v38 = vpop.f32.mrb[141].mxu1 }
 0x940   : > { %v3831_v39 = vadd.f32 %v3830_v38, %v7207_v57  ;;  %v3832_v44 = vpop.f32.mrb[142].mxu1  ;;  %4183 = vmatprep.mubr.bf16.mxu0 %v3914_v37 }
 0x941   : > { %v3833_v43 = vadd.f32 %v3832_v44, %v7204_v54  ;;  %v3834_v40 = vpop.f32.mrb[143].mxu1  ;;  %4184 = vmatmul.mubr.bf16.gmra.mrb[168].mxu0 %v3913_v36  ;;  %v3889_v46 = vmax.f32 %v3829_v41, 0.0 }
 0x942   : > { %v3835_v45 = vadd.f32 %v3834_v40, %v7207_v57  ;;  %v3890_v48 = vmax.f32 %v3831_v39, 0.0 }
 0x943   : > { %v3891_v47 = vmax.f32 %v3833_v43, 0.0 }
 0x944   : > { %v3892_v49 = vmax.f32 %v3835_v45, 0.0 }
 0x945   : > { %v3915_v50 = vpack.c.bf16 %v3891_v47, %v3889_v46 }
 0x946   : > { %v3916_v55 = vpack.c.bf16 %v3892_v49, %v3890_v48  ;;  %v3838_v51 = vpop.f32.mrb[144].mxu1  ;;  %v6450_v48 = vld [vmem:[#allocation2 + $0xbe4] ss:$8 sps:$4 sm:$0xff]   ;;  %v6448_v49 = vld [vmem:[#allocation2 + $0xbe0] ss:$8 sps:$4 sm:$0xff]  }
 0x947   : > { %v3839_v52 = vadd.f32 %v3838_v51, %v7204_v54  ;;  %v3840_v56 = vpop.f32.mrb[145].mxu1  ;;  %4526 = vmatprep.subr.bf16.mxu1 %v6450_v48  ;;  %v6456_v51 = vld [vmem:[#allocation2 + $0xc04] ss:$8 sps:$4 sm:$0xff]  }
 0x948   : > { %v3841_v53 = vadd.f32 %v3840_v56, %v7207_v57  ;;  %v3842_v58 = vpop.f32.mrb[146].mxu1  ;;  %4193 = vmatprep.mubr.bf16.mxu0 %v3916_v55  ;;  %4527 = vmatpush1.bf16.msra.mxu1 %v6448_v49  ;;  %v6451_v55 = vld [vmem:[#allocation2 + $0xbf0] ss:$8 sps:$4 sm:$0xff]   ;;  %v7249_v56 = vld [vmem:[#allocation2 + $0xc24] ss:$8 sps:$4 sm:$0xff]  }
 0x949   : > { %v3843_v59 = vadd.f32 %v3842_v58, %v7204_v54  ;;  %v3844_v60 = vpop.f32.mrb[147].mxu1  ;;  %4194 = vmatmul.mubr.bf16.gmra.mrb[172].mxu0 %v3915_v50  ;;  %v3893_v62 = vmax.f32 %v3839_v52, 0.0  ;;  %v6453_v50 = vld [vmem:[#allocation2 + $0xbf4] ss:$8 sps:$4 sm:$0xff]   ;;  %4865 = vmatprep.subr.bf16.mxu0 %v6456_v51  ;;  %v7246_v52 = vld [vmem:[#allocation2 + $0xc10] ss:$8 sps:$4 sm:$0xff]  }
 0x94a   : > { %v3845_v61 = vadd.f32 %v3844_v60, %v7207_v57  ;;  %v3894_v2 = vmax.f32 %v3841_v53, 0.0  ;;  %4528 = vmatprep.subr.bf16.mxu1 %v6453_v50  ;;  %v7252_v53 = vld [vmem:[#allocation2 + $0xc20] ss:$8 sps:$4 sm:$0xff]   ;;  %v7255_v58 = vld [vmem:[#allocation2 + $0xc34] ss:$8 sps:$4 sm:$0xff]  }
 0x94b   : > { %v3895_v3 = vmax.f32 %v3843_v59, 0.0  ;;  %v7258_v59 = vld [vmem:[#allocation2 + $0xc30] ss:$8 sps:$4 sm:$0xff]   ;;  %v7261_v60 = vld [vmem:[#allocation2 + $0xc44] ss:$8 sps:$4 sm:$0xff]  }
 0x94c   : > { %v3896_v63 = vmax.f32 %v3845_v61, 0.0  ;;  %4529 = vmatpush1.bf16.msra.mxu1 %v6451_v55  ;;  %v7264_v61 = vld [vmem:[#allocation2 + $0xc40] ss:$8 sps:$4 sm:$0xff]  }
 0x94d   : > { %v3917_v0 = vpack.c.bf16 %v3895_v3, %v3893_v62  ;;  %5813 = vmatprep.subr.bf16.mxu1 %v6456_v51  ;;  %v7267_v62 = vld [vmem:[#allocation2 + $0xc54] ss:$8 sps:$4 sm:$0xff]   ;;  %v7270_v3 = vld [vmem:[#allocation2 + $0xc50] ss:$8 sps:$4 sm:$0xff]  }
 0x94e   : > { %v3918_v5 = vpack.c.bf16 %v3896_v63, %v3894_v2  ;;  %v3848_v4 = vpop.f32.mrb[148].mxu1  ;;  %v7273_v2 = vld [vmem:[#allocation2 + $0xc64] ss:$8 sps:$4 sm:$0xff]   ;;  %v7276_v63 = vld [vmem:[#allocation2 + $0xc60] ss:$8 sps:$4 sm:$0xff]  }
 0x94f   : > { %v3849_v1 = vadd.f32 %v3848_v4, %v7204_v54  ;;  %v3850_v6 = vpop.f32.mrb[149].mxu1  ;;  %v7285_v4 = vld [vmem:[#allocation2 + $0xc84] ss:$8 sps:$4 sm:$0xff]  }
 0x950   : > { %v3851_v7 = vadd.f32 %v3850_v6, %v7207_v57  ;;  %v3852_v8 = vpop.f32.mrb[150].mxu1  ;;  %4203 = vmatprep.mubr.bf16.mxu0 %v3918_v5  ;;  %v7282_v5 = vld [vmem:[#allocation2 + $0xc70] ss:$8 sps:$4 sm:$0xff]   ;;  %v7291_v6 = vld [vmem:[#allocation2 + $0xc94] ss:$8 sps:$4 sm:$0xff]  }
 0x951   : > { %v3853_v9 = vadd.f32 %v3852_v8, %v7204_v54  ;;  %v3854_v10 = vpop.f32.mrb[151].mxu1  ;;  %4204 = vmatmul.mubr.bf16.gmra.mrb[176].mxu0 %v3917_v0  ;;  %v3897_v15 = vmax.f32 %v3849_v1, 0.0  ;;  %v7279_v0 = vld [vmem:[#allocation2 + $0xc74] ss:$8 sps:$4 sm:$0xff]   ;;  %v7288_v1 = vld [vmem:[#allocation2 + $0xc80] ss:$8 sps:$4 sm:$0xff]  }
 0x952   : > { %v3855_v17 = vadd.f32 %v3854_v10, %v7207_v57  ;;  %v3898_v12 = vmax.f32 %v3851_v7, 0.0  ;;  %v7294_v7 = vld [vmem:[#allocation2 + $0xc90] ss:$8 sps:$4 sm:$0xff]   ;;  %v7297_v8 = vld [vmem:[#allocation2 + $0xca4] ss:$8 sps:$4 sm:$0xff]  }
 0x953   : > { %v3899_v11 = vmax.f32 %v3853_v9, 0.0  ;;  %v7300_v9 = vld [vmem:[#allocation2 + $0xca0] ss:$8 sps:$4 sm:$0xff]   ;;  %v7303_v10 = vld [vmem:[#allocation2 + $0xcb4] ss:$8 sps:$4 sm:$0xff]  }
 0x954   : > { %v3900_v19 = vmax.f32 %v3855_v17, 0.0  ;;  %v7306_v17 = vld [vmem:[#allocation2 + $0xcb0] ss:$8 sps:$4 sm:$0xff]  }
 0x955   : > { %v3919_v18 = vpack.c.bf16 %v3899_v11, %v3897_v15  ;;  %v7309_v15 = vld [vmem:[#allocation2 + $0xcc4] ss:$8 sps:$4 sm:$0xff]   ;;  %v7312_v11 = vld [vmem:[#allocation2 + $0xcc0] ss:$8 sps:$4 sm:$0xff]  }
 0x956   : > { %v3920_v13 = vpack.c.bf16 %v3900_v19, %v3898_v12  ;;  %v3858_v20 = vpop.f32.mrb[152].mxu1  ;;  %v7315_v12 = vld [vmem:[#allocation2 + $0xcd4] ss:$8 sps:$4 sm:$0xff]   ;;  %v7318_v19 = vld [vmem:[#allocation2 + $0xcd0] ss:$8 sps:$4 sm:$0xff]  }
 0x957   : > { %v3859_v21 = vadd.f32 %v3858_v20, %v7204_v54  ;;  %v3860_v22 = vpop.f32.mrb[153].mxu1 }
 0x958   : > { %v3861_v23 = vadd.f32 %v3860_v22, %v7207_v57  ;;  %v3862_v24 = vpop.f32.mrb[154].mxu1  ;;  %4213 = vmatprep.mubr.bf16.mxu0 %v3920_v13 }
 0x959   : > { %v3863_v25 = vadd.f32 %v3862_v24, %v7204_v54  ;;  %v3864_v30 = vpop.f32.mrb[155].mxu1  ;;  %4214 = vmatmul.mubr.bf16.gmra.mrb[180].mxu0 %v3919_v18  ;;  %v3901_v26 = vmax.f32 %v3859_v21, 0.0  ;;  %v3959_v18 = vld [vmem:[#allocation4 + $0x14] sm:$0x3] }
 0x95a   : > { %v3865_v29 = vadd.f32 %v3864_v30, %v7207_v57  ;;  %v3902_v32 = vmax.f32 %v3861_v23, 0.0  ;;  %v7323_v13 = vrot.slane %v3959_v18, %v6857_v14  ;;  %v7326_v20 = vrot.slane %v3959_v18, %v6859_v16 }
 0x95b   : > { %v3903_v27 = vmax.f32 %v3863_v25, 0.0 }
 0x95c   : > { %v3904_v31 = vmax.f32 %v3865_v29, 0.0 }
 0x95d   : > { %v3921_v28 = vpack.c.bf16 %v3903_v27, %v3901_v26 }
 0x95e   : > { %v3922_v33 = vpack.c.bf16 %v3904_v31, %v3902_v32  ;;  %v3868_v34 = vpop.f32.mrb[156].mxu1 }
 0x95f   : > { %v3869_v35 = vadd.f32 %v3868_v34, %v7204_v54  ;;  %v3870_v36 = vpop.f32.mrb[157].mxu1 }
 0x960   : > { %v3871_v37 = vadd.f32 %v3870_v36, %v7207_v57  ;;  %v3872_v42 = vpop.f32.mrb[158].mxu1  ;;  %4223 = vmatprep.mubr.bf16.mxu0 %v3922_v33 }
 0x961   : > { %v3873_v41 = vadd.f32 %v3872_v42, %v7204_v54  ;;  %v3874_v38 = vpop.f32.mrb[159].mxu1  ;;  %4224 = vmatmul.mubr.bf16.gmra.mrb[184].mxu0 %v3921_v28  ;;  %v3905_v44 = vmax.f32 %v3869_v35, 0.0  ;;  %v7241_v54 = vld [vmem:[#allocation2 + $0xc00] ss:$8 sps:$4 sm:$0xff]  }
 0x962   : > { %v3875_v39 = vadd.f32 %v3874_v38, %v7207_v57  ;;  %v3906_v40 = vmax.f32 %v3871_v37, 0.0  ;;  %v7243_v57 = vld [vmem:[#allocation2 + $0xc14] ss:$8 sps:$4 sm:$0xff]   ;;  %4866 = vmatpush1.bf16.msra.mxu0 %v7241_v54 }
 0x963   : > { %v3907_v43 = vmax.f32 %v3873_v41, 0.0  ;;  %4867 = vmatprep.subr.bf16.mxu0 %v7243_v57 }
 0x964   : > { %v3908_v45 = vmax.f32 %v3875_v39, 0.0 }
 0x965   : > { %v3923_v46 = vpack.c.bf16 %v3907_v43, %v3905_v44 }
 0x966   : > { %v3924_v47 = vpack.c.bf16 %v3908_v45, %v3906_v40  ;;  %4868 = vmatpush1.bf16.msra.mxu0 %v7246_v52 }
 0x967   : > { %4869 = vmatprep.subr.bf16.mxu0 %v7249_v56 }
 0x968   : > { %4233 = vmatprep.mubr.bf16.mxu0 %v3924_v47 }
 0x969   : > { %4234 = vmatmul.mubr.bf16.gmra.mrb[188].mxu0 %v3923_v46 }
 0x96a   : > { %4870 = vmatpush1.bf16.msra.mxu0 %v7252_v53 }
 0x96b   : > { %4871 = vmatprep.subr.bf16.mxu0 %v7255_v58 }
 0x96e   : > { %4872 = vmatpush1.bf16.msra.mxu0 %v7258_v59 }
 0x96f   : > { %4873 = vmatprep.subr.bf16.mxu0 %v7261_v60 }
 0x972   : > { %4874 = vmatpush1.bf16.msra.mxu0 %v7264_v61 }
 0x973   : > { %4875 = vmatprep.subr.bf16.mxu0 %v7267_v62 }
 0x976   : > { %4876 = vmatpush1.bf16.msra.mxu0 %v7270_v3 }
 0x977   : > { %4877 = vmatprep.subr.bf16.mxu0 %v7273_v2 }
 0x97a   : > { %4878 = vmatpush1.bf16.msra.mxu0 %v7276_v63 }
 0x97b   : > { %4879 = vmatprep.subr.bf16.mxu0 %v7279_v0 }
 0x97e   : > { %4880 = vmatpush1.bf16.msra.mxu0 %v7282_v5 }
 0x97f   : > { %4881 = vmatprep.subr.bf16.mxu0 %v7285_v4 }
 0x982   : > { %4882 = vmatpush1.bf16.msra.mxu0 %v7288_v1 }
 0x983   : > { %4883 = vmatprep.subr.bf16.mxu0 %v7291_v6 }
 0x986   : > { %4884 = vmatpush1.bf16.msra.mxu0 %v7294_v7 }
 0x987   : > { %4885 = vmatprep.subr.bf16.mxu0 %v7297_v8 }
 0x98a   : > { %4886 = vmatpush1.bf16.msra.mxu0 %v7300_v9 }
 0x98b   : > { %4887 = vmatprep.subr.bf16.mxu0 %v7303_v10 }
 0x98e   : > { %4888 = vmatpush1.bf16.msra.mxu0 %v7306_v17 }
 0x98f   : > { %4889 = vmatprep.subr.bf16.mxu0 %v7309_v15 }
 0x992   : > { %4890 = vmatpush1.bf16.msra.mxu0 %v7312_v11 }
 0x993   : > { %4891 = vmatprep.subr.bf16.mxu0 %v7315_v12 }
 0x996   : > { %4892 = vmatpush1.bf16.msra.mxu0 %v7318_v19 }
 0xa04   : > { %v4165_v21 = vpop.f32.mrb[160].mxu0 }
 0xa05   : > { %v4166_v22 = vadd.f32 %v4165_v21, %v7323_v13  ;;  %v4167_v23 = vpop.f32.mrb[161].mxu0 }
 0xa06   : > { %v4168_v24 = vadd.f32 %v4167_v23, %v7326_v20  ;;  %v4169_v25 = vpop.f32.mrb[162].mxu0 }
 0xa07   : > { %v4170_v30 = vadd.f32 %v4169_v25, %v7323_v13  ;;  %v4171_v29 = vpop.f32.mrb[163].mxu0  ;;  %v4244_v27 = vmax.f32 %v4166_v22, 0.0 }
 0xa08   : > { %v4172_v26 = vadd.f32 %v4171_v29, %v7326_v20  ;;  %v4245_v31 = vmax.f32 %v4168_v24, 0.0 }
 0xa09   : > { %v4246_v32 = vmax.f32 %v4170_v30, 0.0 }
 0xa0a   : > { %v4247_v28 = vmax.f32 %v4172_v26, 0.0 }
 0xa0b   : > { %v4276_v33 = vpack.c.bf16 %v4246_v32, %v4244_v27 }
 0xa0c   : > { %v4277_v34 = vpack.c.bf16 %v4247_v28, %v4245_v31  ;;  %v4175_v35 = vpop.f32.mrb[164].mxu0 }
 0xa0d   : > { %v4176_v36 = vadd.f32 %v4175_v35, %v7323_v13  ;;  %v4177_v37 = vpop.f32.mrb[165].mxu0 }
 0xa0e   : > { %v4178_v42 = vadd.f32 %v4177_v37, %v7326_v20  ;;  %v4179_v41 = vpop.f32.mrb[166].mxu0  ;;  %4530 = vmatprep.mubr.bf16.mxu1 %v4277_v34 }
 0xa0f   : > { %v4180_v38 = vadd.f32 %v4179_v41, %v7323_v13  ;;  %v4181_v39 = vpop.f32.mrb[167].mxu0  ;;  %4531 = vmatmul.mubr.bf16.vlgmr.msra.gmra.mrb[160].mxu1 %v4276_v33  ;;  %v4248_v43 = vmax.f32 %v4176_v36, 0.0 }
 0xa10   : > { %v4182_v44 = vadd.f32 %v4181_v39, %v7326_v20  ;;  %5829 = vmatpush1.bf16.msra.mxu1 %v7241_v54  ;;  %v4249_v45 = vmax.f32 %v4178_v42, 0.0 }
 0xa11   : > { %v4250_v40 = vmax.f32 %v4180_v38, 0.0  ;;  %5814 = vmatprep.subr.bf16.mxu1 %v7243_v57 }
 0xa12   : > { %v4251_v46 = vmax.f32 %v4182_v44, 0.0 }
 0xa13   : > { %v4278_v47 = vpack.c.bf16 %v4250_v40, %v4248_v43 }
 0xa14   : > { %v4279_v48 = vpack.c.bf16 %v4251_v46, %v4249_v45  ;;  %v4185_v49 = vpop.f32.mrb[168].mxu0  ;;  %5830 = vmatpush1.bf16.msra.mxu1 %v7246_v52 }
 0xa15   : > { %v4186_v50 = vadd.f32 %v4185_v49, %v7323_v13  ;;  %v4187_v55 = vpop.f32.mrb[169].mxu0  ;;  %5815 = vmatprep.subr.bf16.mxu1 %v7249_v56 }
 0xa16   : > { %v4188_v51 = vadd.f32 %v4187_v55, %v7326_v20  ;;  %v4189_v18 = vpop.f32.mrb[170].mxu0  ;;  %4540 = vmatprep.mubr.bf16.mxu1 %v4279_v48 }
 0xa17   : > { %v4190_v54 = vadd.f32 %v4189_v18, %v7323_v13  ;;  %v4191_v21 = vpop.f32.mrb[171].mxu0  ;;  %4541 = vmatmul.mubr.bf16.gmra.mrb[164].mxu1 %v4278_v47  ;;  %v4252_v22 = vmax.f32 %v4186_v50, 0.0 }
 0xa18   : > { %v4192_v57 = vadd.f32 %v4191_v21, %v7326_v20  ;;  %5831 = vmatpush1.bf16.msra.mxu1 %v7252_v53  ;;  %v4253_v52 = vmax.f32 %v4188_v51, 0.0 }
 0xa19   : > { %v4254_v23 = vmax.f32 %v4190_v54, 0.0  ;;  %5816 = vmatprep.subr.bf16.mxu1 %v7255_v58 }
 0xa1a   : > { %v4255_v24 = vmax.f32 %v4192_v57, 0.0 }
 0xa1b   : > { %v4280_v25 = vpack.c.bf16 %v4254_v23, %v4252_v22 }
 0xa1c   : > { %v4281_v56 = vpack.c.bf16 %v4255_v24, %v4253_v52  ;;  %v4195_v30 = vpop.f32.mrb[172].mxu0  ;;  %5832 = vmatpush1.bf16.msra.mxu1 %v7258_v59 }
 0xa1d   : > { %v4196_v29 = vadd.f32 %v4195_v30, %v7323_v13  ;;  %v4197_v26 = vpop.f32.mrb[173].mxu0  ;;  %5817 = vmatprep.subr.bf16.mxu1 %v7261_v60 }
 0xa1e   : > { %v4198_v27 = vadd.f32 %v4197_v26, %v7326_v20  ;;  %v4199_v32 = vpop.f32.mrb[174].mxu0  ;;  %4550 = vmatprep.mubr.bf16.mxu1 %v4281_v56 }
 0xa1f   : > { %v4200_v53 = vadd.f32 %v4199_v32, %v7323_v13  ;;  %v4201_v31 = vpop.f32.mrb[175].mxu0  ;;  %4551 = vmatmul.mubr.bf16.gmra.mrb[168].mxu1 %v4280_v25  ;;  %v4256_v28 = vmax.f32 %v4196_v29, 0.0 }
 0xa20   : > { %v4202_v58 = vadd.f32 %v4201_v31, %v7326_v20  ;;  %5833 = vmatpush1.bf16.msra.mxu1 %v7264_v61  ;;  %v4257_v59 = vmax.f32 %v4198_v27, 0.0 }
 0xa21   : > { %v4258_v33 = vmax.f32 %v4200_v53, 0.0  ;;  %5818 = vmatprep.subr.bf16.mxu1 %v7267_v62 }
 0xa22   : > { %v4259_v34 = vmax.f32 %v4202_v58, 0.0 }
 0xa23   : > { %v4282_v35 = vpack.c.bf16 %v4258_v33, %v4256_v28 }
 0xa24   : > { %v4283_v60 = vpack.c.bf16 %v4259_v34, %v4257_v59  ;;  %v4205_v36 = vpop.f32.mrb[176].mxu0  ;;  %5834 = vmatpush1.bf16.msra.mxu1 %v7270_v3 }
 0xa25   : > { %v4206_v37 = vadd.f32 %v4205_v36, %v7323_v13  ;;  %v4207_v42 = vpop.f32.mrb[177].mxu0  ;;  %5819 = vmatprep.subr.bf16.mxu1 %v7273_v2 }
 0xa26   : > { %v4208_v41 = vadd.f32 %v4207_v42, %v7326_v20  ;;  %v4209_v38 = vpop.f32.mrb[178].mxu0  ;;  %4560 = vmatprep.mubr.bf16.mxu1 %v4283_v60  ;;  %v6498_v60 = vld [vmem:[#allocation2 + $0xce4] ss:$8 sps:$4 sm:$0xff]  }
 0xa27   : > { %v4210_v61 = vadd.f32 %v4209_v38, %v7323_v13  ;;  %v4211_v39 = vpop.f32.mrb[179].mxu0  ;;  %4561 = vmatmul.mubr.bf16.gmra.mrb[172].mxu1 %v4282_v35  ;;  %v4260_v44 = vmax.f32 %v4206_v37, 0.0  ;;  %4893 = vmatprep.subr.bf16.mxu0 %v6498_v60 }
 0xa28   : > { %v4212_v62 = vadd.f32 %v4211_v39, %v7326_v20  ;;  %5835 = vmatpush1.bf16.msra.mxu1 %v7276_v63  ;;  %v4261_v3 = vmax.f32 %v4208_v41, 0.0 }
 0xa29   : > { %v4262_v43 = vmax.f32 %v4210_v61, 0.0  ;;  %5820 = vmatprep.subr.bf16.mxu1 %v7279_v0 }
 0xa2a   : > { %v4263_v40 = vmax.f32 %v4212_v62, 0.0 }
 0xa2b   : > { %v4284_v45 = vpack.c.bf16 %v4262_v43, %v4260_v44 }
 0xa2c   : > { %v4285_v2 = vpack.c.bf16 %v4263_v40, %v4261_v3  ;;  %v4215_v46 = vpop.f32.mrb[180].mxu0  ;;  %5836 = vmatpush1.bf16.msra.mxu1 %v7282_v5 }
 0xa2d   : > { %v4216_v47 = vadd.f32 %v4215_v46, %v7323_v13  ;;  %v4217_v48 = vpop.f32.mrb[181].mxu0  ;;  %5821 = vmatprep.subr.bf16.mxu1 %v7285_v4 }
 0xa2e   : > { %v4218_v49 = vadd.f32 %v4217_v48, %v7326_v20  ;;  %v4219_v50 = vpop.f32.mrb[182].mxu0  ;;  %4570 = vmatprep.mubr.bf16.mxu1 %v4285_v2 }
 0xa2f   : > { %v4220_v63 = vadd.f32 %v4219_v50, %v7323_v13  ;;  %v4221_v55 = vpop.f32.mrb[183].mxu0  ;;  %4571 = vmatmul.mubr.bf16.gmra.mrb[176].mxu1 %v4284_v45  ;;  %v4264_v51 = vmax.f32 %v4216_v47, 0.0 }
 0xa30   : > { %v4222_v0 = vadd.f32 %v4221_v55, %v7326_v20  ;;  %5837 = vmatpush1.bf16.msra.mxu1 %v7288_v1  ;;  %v4265_v5 = vmax.f32 %v4218_v49, 0.0 }
 0xa31   : > { %v4266_v18 = vmax.f32 %v4220_v63, 0.0  ;;  %5822 = vmatprep.subr.bf16.mxu1 %v7291_v6 }
 0xa32   : > { %v4267_v54 = vmax.f32 %v4222_v0, 0.0 }
 0xa33   : > { %v4286_v21 = vpack.c.bf16 %v4266_v18, %v4264_v51 }
 0xa34   : > { %v4287_v4 = vpack.c.bf16 %v4267_v54, %v4265_v5  ;;  %v4225_v57 = vpop.f32.mrb[184].mxu0  ;;  %5838 = vmatpush1.bf16.msra.mxu1 %v7294_v7 }
 0xa35   : > { %v4226_v22 = vadd.f32 %v4225_v57, %v7323_v13  ;;  %v4227_v23 = vpop.f32.mrb[185].mxu0  ;;  %5823 = vmatprep.subr.bf16.mxu1 %v7297_v8 }
 0xa36   : > { %v4228_v52 = vadd.f32 %v4227_v23, %v7326_v20  ;;  %v4229_v24 = vpop.f32.mrb[186].mxu0  ;;  %4580 = vmatprep.mubr.bf16.mxu1 %v4287_v4 }
 0xa37   : > { %v4230_v1 = vadd.f32 %v4229_v24, %v7323_v13  ;;  %v4231_v25 = vpop.f32.mrb[187].mxu0  ;;  %4581 = vmatmul.mubr.bf16.gmra.mrb[180].mxu1 %v4286_v21  ;;  %v4268_v56 = vmax.f32 %v4226_v22, 0.0 }
 0xa38   : > { %v4232_v6 = vadd.f32 %v4231_v25, %v7326_v20  ;;  %5839 = vmatpush1.bf16.msra.mxu1 %v7300_v9  ;;  %v4269_v7 = vmax.f32 %v4228_v52, 0.0 }
 0xa39   : > { %v4270_v30 = vmax.f32 %v4230_v1, 0.0  ;;  %5824 = vmatprep.subr.bf16.mxu1 %v7303_v10 }
 0xa3a   : > { %v4271_v29 = vmax.f32 %v4232_v6, 0.0 }
 0xa3b   : > { %v4288_v26 = vpack.c.bf16 %v4270_v30, %v4268_v56 }
 0xa3c   : > { %v4289_v8 = vpack.c.bf16 %v4271_v29, %v4269_v7  ;;  %v4235_v27 = vpop.f32.mrb[188].mxu0  ;;  %5840 = vmatpush1.bf16.msra.mxu1 %v7306_v17 }
 0xa3d   : > { %v4236_v32 = vadd.f32 %v4235_v27, %v7323_v13  ;;  %v4237_v53 = vpop.f32.mrb[189].mxu0  ;;  %5825 = vmatprep.subr.bf16.mxu1 %v7309_v15 }
 0xa3e   : > { %v4238_v31 = vadd.f32 %v4237_v53, %v7326_v20  ;;  %v4239_v58 = vpop.f32.mrb[190].mxu0  ;;  %4590 = vmatprep.mubr.bf16.mxu1 %v4289_v8 }
 0xa3f   : > { %v4240_v9 = vadd.f32 %v4239_v58, %v7323_v13  ;;  %v4241_v28 = vpop.f32.mrb[191].mxu0  ;;  %4591 = vmatmul.mubr.bf16.gmra.mrb[184].mxu1 %v4288_v26  ;;  %v4272_v33 = vmax.f32 %v4236_v32, 0.0  ;;  %v6496_v13 = vld [vmem:[#allocation2 + $0xce0] ss:$8 sps:$4 sm:$0xff]  }
 0xa40   : > { %v4242_v10 = vadd.f32 %v4241_v28, %v7326_v20  ;;  %5841 = vmatpush1.bf16.msra.mxu1 %v7312_v11  ;;  %v4273_v17 = vmax.f32 %v4238_v31, 0.0  ;;  %4894 = vmatpush1.bf16.msra.mxu0 %v6496_v13  ;;  %v6501_v20 = vld [vmem:[#allocation2 + $0xcf4] ss:$8 sps:$4 sm:$0xff]   ;;  %v6499_v11 = vld [vmem:[#allocation2 + $0xcf0] ss:$8 sps:$4 sm:$0xff]  }
 0xa41   : > { %v4274_v59 = vmax.f32 %v4240_v9, 0.0  ;;  %5826 = vmatprep.subr.bf16.mxu1 %v7315_v12  ;;  %4895 = vmatprep.subr.bf16.mxu0 %v6501_v20  ;;  %v4326_v12 = vld [vmem:[#allocation4 + $0x16] sm:$0x3] }
 0xa42   : > { %v4275_v34 = vmax.f32 %v4242_v10, 0.0  ;;  %v7388_v36 = vrot.slane %v4326_v12, %v6857_v14 }
 0xa43   : > { %v4290_v35 = vpack.c.bf16 %v4274_v59, %v4272_v33 }
 0xa44   : > { %v4291_v15 = vpack.c.bf16 %v4275_v34, %v4273_v17  ;;  %5842 = vmatpush1.bf16.msra.mxu1 %v7318_v19  ;;  %4896 = vmatpush1.bf16.msra.mxu0 %v6499_v11  ;;  %v7391_v19 = vrot.slane %v4326_v12, %v6859_v16 }
 0xa45   : > { %5827 = vmatprep.subr.bf16.mxu1 %v6498_v60 }
 0xa46   : > { %4600 = vmatprep.mubr.bf16.mxu1 %v4291_v15 }
 0xa47   : > { %4601 = vmatmul.mubr.bf16.gmra.mrb[188].mxu1 %v4290_v35 }
 0xa48   : > { %5843 = vmatpush1.bf16.msra.mxu1 %v6496_v13 }
 0xa49   : > { %5828 = vmatprep.subr.bf16.mxu1 %v6501_v20 }
 0xa4c   : > { %5844 = vmatpush1.bf16.msra.mxu1 %v6499_v11 }
 0xae2   : > { %v4532_v37 = vpop.f32.mrb[160].mxu1 }
 0xae3   : > { %v4533_v42 = vadd.f32 %v4532_v37, %v7388_v36  ;;  %v4534_v41 = vpop.f32.mrb[161].mxu1 }
 0xae4   : > { %v4535_v38 = vadd.f32 %v4534_v41, %v7391_v19  ;;  %v4536_v61 = vpop.f32.mrb[162].mxu1 }
 0xae5   : > { %v4537_v39 = vadd.f32 %v4536_v61, %v7388_v36  ;;  %v4538_v62 = vpop.f32.mrb[163].mxu1  ;;  %v4611_v43 = vmax.f32 %v4533_v42, 0.0 }
 0xae6   : > { %v4539_v44 = vadd.f32 %v4538_v62, %v7391_v19  ;;  %v4612_v40 = vmax.f32 %v4535_v38, 0.0 }
 0xae7   : > { %v4613_v3 = vmax.f32 %v4537_v39, 0.0 }
 0xae8   : > { %v4614_v45 = vmax.f32 %v4539_v44, 0.0 }
 0xae9   : > { %v4643_v2 = vpack.c.bf16 %v4613_v3, %v4611_v43 }
 0xaea   : > { %v4644_v46 = vpack.c.bf16 %v4614_v45, %v4612_v40  ;;  %v4542_v47 = vpop.f32.mrb[164].mxu1 }
 0xaeb   : > { %v4543_v48 = vadd.f32 %v4542_v47, %v7388_v36  ;;  %v4544_v49 = vpop.f32.mrb[165].mxu1 }
 0xaec   : > { %v4545_v50 = vadd.f32 %v4544_v49, %v7391_v19  ;;  %v4546_v63 = vpop.f32.mrb[166].mxu1  ;;  %4897 = vmatprep.mubr.bf16.mxu0 %v4644_v46 }
 0xaed   : > { %v4547_v55 = vadd.f32 %v4546_v63, %v7388_v36  ;;  %v4548_v0 = vpop.f32.mrb[167].mxu1  ;;  %4898 = vmatmul.mubr.bf16.vlgmr.msra.gmra.mrb[192].mxu0 %v4643_v2  ;;  %v4615_v18 = vmax.f32 %v4543_v48, 0.0 }
 0xaee   : > { %v4549_v51 = vadd.f32 %v4548_v0, %v7391_v19  ;;  %v4616_v54 = vmax.f32 %v4545_v50, 0.0 }
 0xaef   : > { %v4617_v5 = vmax.f32 %v4547_v55, 0.0 }
 0xaf0   : > { %v4618_v21 = vmax.f32 %v4549_v51, 0.0 }
 0xaf1   : > { %v4645_v4 = vpack.c.bf16 %v4617_v5, %v4615_v18 }
 0xaf2   : > { %v4646_v57 = vpack.c.bf16 %v4618_v21, %v4616_v54  ;;  %v4552_v22 = vpop.f32.mrb[168].mxu1 }
 0xaf3   : > { %v4553_v23 = vadd.f32 %v4552_v22, %v7388_v36  ;;  %v4554_v52 = vpop.f32.mrb[169].mxu1 }
 0xaf4   : > { %v4555_v24 = vadd.f32 %v4554_v52, %v7391_v19  ;;  %v4556_v1 = vpop.f32.mrb[170].mxu1  ;;  %4907 = vmatprep.mubr.bf16.mxu0 %v4646_v57 }
 0xaf5   : > { %v4557_v25 = vadd.f32 %v4556_v1, %v7388_v36  ;;  %v4558_v6 = vpop.f32.mrb[171].mxu1  ;;  %4908 = vmatmul.mubr.bf16.gmra.mrb[196].mxu0 %v4645_v4  ;;  %v4619_v30 = vmax.f32 %v4553_v23, 0.0 }
 0xaf6   : > { %v4559_v56 = vadd.f32 %v4558_v6, %v7391_v19  ;;  %v4620_v29 = vmax.f32 %v4555_v24, 0.0 }
 0xaf7   : > { %v4621_v7 = vmax.f32 %v4557_v25, 0.0 }
 0xaf8   : > { %v4622_v26 = vmax.f32 %v4559_v56, 0.0 }
 0xaf9   : > { %v4647_v8 = vpack.c.bf16 %v4621_v7, %v4619_v30 }
 0xafa   : > { %v4648_v27 = vpack.c.bf16 %v4622_v26, %v4620_v29  ;;  %v4562_v32 = vpop.f32.mrb[172].mxu1 }
 0xafb   : > { %v4563_v53 = vadd.f32 %v4562_v32, %v7388_v36  ;;  %v4564_v31 = vpop.f32.mrb[173].mxu1 }
 0xafc   : > { %v4565_v58 = vadd.f32 %v4564_v31, %v7391_v19  ;;  %v4566_v9 = vpop.f32.mrb[174].mxu1  ;;  %4917 = vmatprep.mubr.bf16.mxu0 %v4648_v27 }
 0xafd   : > { %v4567_v28 = vadd.f32 %v4566_v9, %v7388_v36  ;;  %v4568_v10 = vpop.f32.mrb[175].mxu1  ;;  %4918 = vmatmul.mubr.bf16.gmra.mrb[200].mxu0 %v4647_v8  ;;  %v4623_v59 = vmax.f32 %v4563_v53, 0.0 }
 0xafe   : > { %v4569_v33 = vadd.f32 %v4568_v10, %v7391_v19  ;;  %v4624_v34 = vmax.f32 %v4565_v58, 0.0 }
 0xaff   : > { %v4625_v17 = vmax.f32 %v4567_v28, 0.0 }
 0xb00   : > { %v4626_v35 = vmax.f32 %v4569_v33, 0.0 }
 0xb01   : > { %v4649_v15 = vpack.c.bf16 %v4625_v17, %v4623_v59 }
 0xb02   : > { %v4650_v60 = vpack.c.bf16 %v4626_v35, %v4624_v34  ;;  %v4572_v13 = vpop.f32.mrb[176].mxu1  ;;  %v4693_v34 = vld [vmem:[#allocation4 + $0x18] sm:$0x3] }
 0xb03   : > { %v4573_v20 = vadd.f32 %v4572_v13, %v7388_v36  ;;  %v4574_v11 = vpop.f32.mrb[177].mxu1  ;;  %v7426_v35 = vrot.slane %v4693_v34, %v6857_v14 }
 0xb04   : > { %v4575_v12 = vadd.f32 %v4574_v11, %v7391_v19  ;;  %v4576_v37 = vpop.f32.mrb[178].mxu1  ;;  %4927 = vmatprep.mubr.bf16.mxu0 %v4650_v60 }
 0xb05   : > { %v4577_v42 = vadd.f32 %v4576_v37, %v7388_v36  ;;  %v4578_v41 = vpop.f32.mrb[179].mxu1  ;;  %4928 = vmatmul.mubr.bf16.gmra.mrb[204].mxu0 %v4649_v15  ;;  %v4627_v61 = vmax.f32 %v4573_v20, 0.0  ;;  %v7429_v15 = vrot.slane %v4693_v34, %v6859_v16 }
 0xb06   : > { %v4579_v38 = vadd.f32 %v4578_v41, %v7391_v19  ;;  %v4628_v62 = vmax.f32 %v4575_v12, 0.0 }
 0xb07   : > { %v4629_v39 = vmax.f32 %v4577_v42, 0.0 }
 0xb08   : > { %v4630_v44 = vmax.f32 %v4579_v38, 0.0 }
 0xb09   : > { %v4651_v43 = vpack.c.bf16 %v4629_v39, %v4627_v61 }
 0xb0a   : > { %v4652_v3 = vpack.c.bf16 %v4630_v44, %v4628_v62  ;;  %v4582_v40 = vpop.f32.mrb[180].mxu1 }
 0xb0b   : > { %v4583_v45 = vadd.f32 %v4582_v40, %v7388_v36  ;;  %v4584_v2 = vpop.f32.mrb[181].mxu1 }
 0xb0c   : > { %v4585_v46 = vadd.f32 %v4584_v2, %v7391_v19  ;;  %v4586_v47 = vpop.f32.mrb[182].mxu1  ;;  %4937 = vmatprep.mubr.bf16.mxu1 %v4652_v3 }
 0xb0d   : > { %v4587_v48 = vadd.f32 %v4586_v47, %v7388_v36  ;;  %v4588_v49 = vpop.f32.mrb[183].mxu1  ;;  %4938 = vmatmul.mubr.bf16.vlgmr.msra.gmra.mrb[192].mxu1 %v4651_v43  ;;  %v4631_v63 = vmax.f32 %v4583_v45, 0.0 }
 0xb0e   : > { %v4589_v50 = vadd.f32 %v4588_v49, %v7391_v19  ;;  %v4632_v0 = vmax.f32 %v4585_v46, 0.0 }
 0xb0f   : > { %v4633_v55 = vmax.f32 %v4587_v48, 0.0 }
 0xb10   : > { %v4634_v51 = vmax.f32 %v4589_v50, 0.0 }
 0xb11   : > { %v4653_v18 = vpack.c.bf16 %v4633_v55, %v4631_v63 }
 0xb12   : > { %v4654_v5 = vpack.c.bf16 %v4634_v51, %v4632_v0  ;;  %v4592_v54 = vpop.f32.mrb[184].mxu1 }
 0xb13   : > { %v4593_v21 = vadd.f32 %v4592_v54, %v7388_v36  ;;  %v4594_v4 = vpop.f32.mrb[185].mxu1 }
 0xb14   : > { %v4595_v57 = vadd.f32 %v4594_v4, %v7391_v19  ;;  %v4596_v22 = vpop.f32.mrb[186].mxu1  ;;  %4947 = vmatprep.mubr.bf16.mxu1 %v4654_v5 }
 0xb15   : > { %v4597_v23 = vadd.f32 %v4596_v22, %v7388_v36  ;;  %v4598_v52 = vpop.f32.mrb[187].mxu1  ;;  %4948 = vmatmul.mubr.bf16.gmra.mrb[196].mxu1 %v4653_v18  ;;  %v4635_v1 = vmax.f32 %v4593_v21, 0.0 }
 0xb16   : > { %v4599_v24 = vadd.f32 %v4598_v52, %v7391_v19  ;;  %v4636_v6 = vmax.f32 %v4595_v57, 0.0 }
 0xb17   : > { %v4637_v25 = vmax.f32 %v4597_v23, 0.0 }
 0xb18   : > { %v4638_v56 = vmax.f32 %v4599_v24, 0.0 }
 0xb19   : > { %v4655_v30 = vpack.c.bf16 %v4637_v25, %v4635_v1 }
 0xb1a   : > { %v4656_v7 = vpack.c.bf16 %v4638_v56, %v4636_v6  ;;  %v4602_v29 = vpop.f32.mrb[188].mxu1 }
 0xb1b   : > { %v4603_v26 = vadd.f32 %v4602_v29, %v7388_v36  ;;  %v4604_v8 = vpop.f32.mrb[189].mxu1 }
 0xb1c   : > { %v4605_v27 = vadd.f32 %v4604_v8, %v7391_v19  ;;  %v4606_v32 = vpop.f32.mrb[190].mxu1  ;;  %4957 = vmatprep.mubr.bf16.mxu1 %v4656_v7 }
 0xb1d   : > { %v4607_v53 = vadd.f32 %v4606_v32, %v7388_v36  ;;  %v4608_v31 = vpop.f32.mrb[191].mxu1  ;;  %4958 = vmatmul.mubr.bf16.gmra.mrb[200].mxu1 %v4655_v30  ;;  %v4639_v9 = vmax.f32 %v4603_v26, 0.0 }
 0xb1e   : > { %v4609_v58 = vadd.f32 %v4608_v31, %v7391_v19  ;;  %v4640_v10 = vmax.f32 %v4605_v27, 0.0 }
 0xb1f   : > { %v4641_v28 = vmax.f32 %v4607_v53, 0.0 }
 0xb20   : > { %v4642_v33 = vmax.f32 %v4609_v58, 0.0 }
 0xb21   : > { %v4657_v59 = vpack.c.bf16 %v4641_v28, %v4639_v9 }
 0xb22   : > { %v4658_v17 = vpack.c.bf16 %v4642_v33, %v4640_v10 }
 0xb24   : > { %4967 = vmatprep.mubr.bf16.mxu1 %v4658_v17 }
 0xb25   : > { %4968 = vmatmul.mubr.bf16.gmra.mrb[204].mxu1 %v4657_v59 }
 0xbc0   : > { %v4899_v36 = vpop.f32.mrb[192].mxu0 }
 0xbc1   : > { %v7432_v60 = vadd.f32 %v4899_v36, %v7426_v35  ;;  %v4901_v19 = vpop.f32.mrb[193].mxu0 }
 0xbc2   : > { %v7435_v13 = vadd.f32 %v4901_v19, %v7429_v15  ;;  %v4903_v20 = vpop.f32.mrb[194].mxu0 }
 0xbc3   : > { %v5010_v11 = vand.u32 2147483647, %v7432_v60  ;;  %v7439_v12 = vadd.f32 %v4903_v20, %v7426_v35  ;;  %v4905_v37 = vpop.f32.mrb[195].mxu0 }
 0xbc4   : > { %v5011_v14 = vand.u32 2147483647, %v7435_v13  ;;  %v7443_v16 = vadd.f32 %v4905_v37, %v7429_v15 }
 0xbc5   : > { %v5042_v42 = vsub.f32 0.0, %v5010_v11  ;;  %v5012_v41 = vand.u32 2147483647, %v7439_v12 }
 0xbc6   : > { %v5043_v38 = vsub.f32 0.0, %v5011_v14  ;;  %v5013_v61 = vand.u32 2147483647, %v7443_v16 }
 0xbc7   : > { %v5074_v39 = vmul.f32 1.442695, %v5042_v42  ;;  %v5044_v62 = vsub.f32 0.0, %v5012_v41  ;;  %v4978_v41 = vmax.f32 %v7432_v60, 0.0  ;;  %v4981_v60 = vmax.f32 %v7443_v16, 0.0 }
 0xbc8   : > { %v5076_v44 = vmul.f32 1.442695, %v5043_v38  ;;  %v5045_v43 = vsub.f32 0.0, %v5013_v61  ;;  %v4909_v3 = vpop.f32.mrb[196].mxu0 }
 0xbc9   : > { %6502 = vpow2.f32 %v5074_v39  ;;  %v5078_v40 = vmul.f32 1.442695, %v5044_v62  ;;  %v7448_v45 = vadd.f32 %v4909_v3, %v7426_v35  ;;  %v4911_v2 = vpop.f32.mrb[197].mxu0 }
 0xbca   : > { %6504 = vpow2.f32 %v5076_v44  ;;  %v5080_v46 = vmul.f32 1.442695, %v5045_v43  ;;  %v7451_v47 = vadd.f32 %v4911_v2, %v7429_v15  ;;  %v4913_v48 = vpop.f32.mrb[198].mxu0  ;;  %v4979_v44 = vmax.f32 %v7435_v13, 0.0 }
 0xbcb   : > { %6506 = vpow2.f32 %v5078_v40  ;;  %v5014_v49 = vand.u32 2147483647, %v7448_v45  ;;  %v7455_v50 = vadd.f32 %v4913_v48, %v7426_v35  ;;  %v4915_v63 = vpop.f32.mrb[199].mxu0 }
 0xbcc   : > { %6508 = vpow2.f32 %v5080_v46  ;;  %v5015_v55 = vand.u32 2147483647, %v7451_v47  ;;  %v7459_v0 = vadd.f32 %v4915_v63, %v7429_v15  ;;  %v4980_v46 = vmax.f32 %v7439_v12, 0.0 }
 0xbcd   : > { %v5046_v51 = vsub.f32 0.0, %v5014_v49  ;;  %v5016_v18 = vand.u32 2147483647, %v7455_v50 }
 0xbce   : > { %v5047_v5 = vsub.f32 0.0, %v5015_v55  ;;  %v5017_v54 = vand.u32 2147483647, %v7459_v0 }
 0xbcf   : > { %v5082_v21 = vmul.f32 1.442695, %v5046_v51  ;;  %v5048_v4 = vsub.f32 0.0, %v5016_v18 }
 0xbd0   : > { %v5084_v57 = vmul.f32 1.442695, %v5047_v5  ;;  %v5049_v22 = vsub.f32 0.0, %v5017_v54  ;;  %v4919_v23 = vpop.f32.mrb[200].mxu0 }
 0xbd1   : > { %6510 = vpow2.f32 %v5082_v21  ;;  %v5086_v52 = vmul.f32 1.442695, %v5048_v4  ;;  %v7464_v24 = vadd.f32 %v4919_v23, %v7426_v35  ;;  %v4921_v1 = vpop.f32.mrb[201].mxu0 }
 0xbd2   : > { %6512 = vpow2.f32 %v5084_v57  ;;  %v5088_v25 = vmul.f32 1.442695, %v5049_v22  ;;  %v7467_v6 = vadd.f32 %v4921_v1, %v7429_v15  ;;  %v4923_v56 = vpop.f32.mrb[202].mxu0  ;;  %v4982_v22 = vmax.f32 %v7448_v45, 0.0 }
 0xbd3   : > { %v6503_v30 = vpop.eup %6502  ;;  %6514 = vpow2.f32 %v5086_v52  ;;  %v5018_v7 = vand.u32 2147483647, %v7464_v24  ;;  %v7471_v29 = vadd.f32 %v4923_v56, %v7426_v35  ;;  %v4925_v26 = vpop.f32.mrb[203].mxu0 }
 0xbd4   : > { %v6505_v8 = vpop.eup %6504  ;;  %v5138_v27 = vadd.f32 1.0, %v6503_v30  ;;  %6516 = vpow2.f32 %v5088_v25  ;;  %v5019_v32 = vand.u32 2147483647, %v7467_v6  ;;  %v7476_v59 = vadd.f32 %v4925_v26, %v7429_v15 }
 0xbd5   : > { %v6507_v53 = vpop.eup %6506  ;;  %v5139_v31 = vadd.f32 1.0, %v6505_v8  ;;  %v5050_v58 = vsub.f32 0.0, %v5018_v7  ;;  %v5020_v9 = vand.u32 2147483647, %v7471_v29 }
 0xbd6   : > { %v6509_v28 = vpop.eup %6508  ;;  %6518 = vlog2.f32 %v5138_v27  ;;  %v5140_v10 = vadd.f32 1.0, %v6507_v53  ;;  %v5051_v33 = vsub.f32 0.0, %v5019_v32  ;;  %v5021_v20 = vand.u32 2147483647, %v7476_v59 }
 0xbd7   : > { %6520 = vlog2.f32 %v5139_v31  ;;  %v5141_v17 = vadd.f32 1.0, %v6509_v28  ;;  %v5090_v34 = vmul.f32 1.442695, %v5050_v58  ;;  %v5052_v36 = vsub.f32 0.0, %v5020_v9 }
 0xbd8   : > { %6522 = vlog2.f32 %v5140_v10  ;;  %v5092_v19 = vmul.f32 1.442695, %v5051_v33  ;;  %v4929_v11 = vpop.f32.mrb[204].mxu0  ;;  %v5053_v38 = vsub.f32 0.0, %v5021_v20  ;;  %v4983_v10 = vmax.f32 %v7451_v47, 0.0 }
 0xbd9   : > { %6524 = vlog2.f32 %v5141_v17  ;;  %v5094_v37 = vmul.f32 1.442695, %v5052_v36  ;;  %v7480_v14 = vadd.f32 %v4929_v11, %v7426_v35  ;;  %v4931_v42 = vpop.f32.mrb[205].mxu0 }
 0xbda   : > { %6526 = vpow2.f32 %v5090_v34  ;;  %v7484_v61 = vadd.f32 %v4931_v42, %v7429_v15  ;;  %v4933_v39 = vpop.f32.mrb[206].mxu0  ;;  %v5096_v55 = vmul.f32 1.442695, %v5053_v38 }
 0xbdb   : > { %v6511_v62 = vpop.eup %6510  ;;  %6528 = vpow2.f32 %v5092_v19  ;;  %v5022_v43 = vand.u32 2147483647, %v7480_v14  ;;  %v7489_v3 = vadd.f32 %v4933_v39, %v7426_v35  ;;  %v4935_v40 = vpop.f32.mrb[207].mxu0 }
 0xbdc   : > { %v6513_v2 = vpop.eup %6512  ;;  %v5142_v48 = vadd.f32 1.0, %v6511_v62  ;;  %6530 = vpow2.f32 %v5094_v37  ;;  %v5023_v13 = vand.u32 2147483647, %v7484_v61  ;;  %v7496_v21 = vadd.f32 %v4935_v40, %v7429_v15 }
 0xbdd   : > { %v6515_v49 = vpop.eup %6514  ;;  %v5143_v63 = vadd.f32 1.0, %v6513_v2  ;;  %v5054_v51 = vsub.f32 0.0, %v5022_v43  ;;  %v5024_v54 = vand.u32 2147483647, %v7489_v3  ;;  %v4984_v2 = vmax.f32 %v7455_v50, 0.0 }
 0xbde   : > { %v6517_v18 = vpop.eup %6516  ;;  %6532 = vlog2.f32 %v5142_v48  ;;  %v5144_v5 = vadd.f32 1.0, %v6515_v49  ;;  %v5055_v4 = vsub.f32 0.0, %v5023_v13  ;;  %v5025_v52 = vand.u32 2147483647, %v7496_v21 }
 0xbdf   : > { %6534 = vlog2.f32 %v5143_v63  ;;  %v5145_v12 = vadd.f32 1.0, %v6517_v18  ;;  %v5098_v16 = vmul.f32 1.442695, %v5054_v51  ;;  %v5056_v23 = vsub.f32 0.0, %v5024_v54 }
 0xbe0   : > { %v6519_v57 = vpop.eup %6518  ;;  %6536 = vlog2.f32 %v5144_v5  ;;  %v4939_v1 = vpop.f32.mrb[192].mxu1  ;;  %v5100_v30 = vmul.f32 1.442695, %v5055_v4  ;;  %v5057_v53 = vsub.f32 0.0, %v5025_v52  ;;  %v4986_v54 = vmax.f32 %v7464_v24, 0.0 }
 0xbe1   : > { %v6521_v25 = vpop.eup %6520  ;;  %v5171_v56 = vmul.f32 0.6931472, %v6519_v57  ;;  %6538 = vlog2.f32 %v5145_v12  ;;  %v7501_v7 = vadd.f32 %v4939_v1, %v7426_v35  ;;  %v4941_v26 = vpop.f32.mrb[193].mxu1  ;;  %v5102_v32 = vmul.f32 1.442695, %v5056_v23 }
 0xbe2   : > { %v6523_v8 = vpop.eup %6522  ;;  %v5173_v27 = vmul.f32 0.6931472, %v6521_v25  ;;  %6540 = vpow2.f32 %v5096_v55  ;;  %v4943_v31 = vpop.f32.mrb[194].mxu1  ;;  %v5104_v19 = vmul.f32 1.442695, %v5057_v53  ;;  %v7515_v39 = vadd.f32 %v4941_v26, %v7429_v15 }
 0xbe3   : > { %v6525_v58 = vpop.eup %6524  ;;  %v5234_v9 = vadd.f32 %v5171_v56, %v4978_v41  ;;  %v5175_v28 = vmul.f32 0.6931472, %v6523_v8  ;;  %6542 = vpow2.f32 %v5098_v16  ;;  %v4945_v33 = vpop.f32.mrb[195].mxu1  ;;  %v5026_v42 = vand.u32 2147483647, %v7501_v7 }
 0xbe4   : > { %v6527_v17 = vpop.eup %6526  ;;  %v5235_v34 = vadd.f32 %v5173_v27, %v4979_v44  ;;  %v5177_v36 = vmul.f32 0.6931472, %v6525_v58  ;;  %6544 = vpow2.f32 %v5100_v30  ;;  %v7519_v43 = vadd.f32 %v4943_v31, %v7426_v35 }
 0xbe5   : > { %v6529_v20 = vpop.eup %6528  ;;  %5266 = vst [vmem:[%s7508_s26] sm:$0xff] %v5234_v9  ;;  %v5236_v11 = vadd.f32 %v5175_v28, %v4980_v46  ;;  %v5146_v37 = vadd.f32 1.0, %v6527_v17  ;;  %6546 = vpow2.f32 %v5102_v32  ;;  %v5058_v44 = vsub.f32 0.0, %v5026_v42 }
 0xbe6   : > { %v6531_v41 = vpop.eup %6530  ;;  %5267 = vst [vmem:[%s7508_s26 + $0x8] sm:$0xff] %v5235_v34  ;;  %v5237_v38 = vadd.f32 %v5177_v36, %v4981_v60  ;;  %v5147_v47 = vadd.f32 1.0, %v6529_v20  ;;  %6548 = vpow2.f32 %v5104_v19  ;;  %v5027_v46 = vand.u32 2147483647, %v7515_v39 }
 0xbe7   : > { %5268 = vst [vmem:[%s7508_s26 + $0x10] sm:$0xff] %v5236_v11  ;;  %6550 = vlog2.f32 %v5146_v37  ;;  %v5148_v62 = vadd.f32 1.0, %v6531_v41  ;;  %v7525_v60 = vadd.f32 %v4945_v33, %v7429_v15  ;;  %v4985_v55 = vmax.f32 %v7459_v0, 0.0 }
 0xbe8   : > { %v6533_v40 = vpop.eup %6532  ;;  %5269 = vst [vmem:[%s7508_s26 + $0x18] sm:$0xff] %v5237_v38  ;;  %6552 = vlog2.f32 %v5147_v47  ;;  %v4949_v48 = vpop.f32.mrb[196].mxu1  ;;  %v5106_v51 = vmul.f32 1.442695, %v5058_v44  ;;  %v5059_v50 = vsub.f32 0.0, %v5027_v46  ;;  %v4987_v31 = vmax.f32 %v7467_v6, 0.0 }
 0xbe9   : > { %v6535_v49 = vpop.eup %6534  ;;  %v5179_v63 = vmul.f32 0.6931472, %v6533_v40  ;;  %6554 = vlog2.f32 %v5148_v62  ;;  %v4951_v13 = vpop.f32.mrb[197].mxu1  ;;  %v5028_v12 = vand.u32 2147483647, %v7519_v43  ;;  %v4988_v28 = vmax.f32 %v7471_v29, 0.0 }
 0xbea   : > { %v6537_v18 = vpop.eup %6536  ;;  %v5181_v5 = vmul.f32 0.6931472, %v6535_v49  ;;  %6556 = vpow2.f32 %v5106_v51  ;;  %v5029_v0 = vand.u32 2147483647, %v7525_v60  ;;  %v4953_v23 = vpop.f32.mrb[198].mxu1  ;;  %v7544_v19 = vadd.f32 %v4951_v13, %v7429_v15 }
 0xbeb   : > { %v6539_v16 = vpop.eup %6538  ;;  %v5238_v4 = vadd.f32 %v5179_v63, %v4982_v22  ;;  %v5183_v57 = vmul.f32 0.6931472, %v6537_v18  ;;  %v5108_v56 = vmul.f32 1.442695, %v5059_v50  ;;  %v5060_v24 = vsub.f32 0.0, %v5028_v12  ;;  %v4955_v30 = vpop.f32.mrb[199].mxu1 }
 0xbec   : > { %v6541_v52 = vpop.eup %6540  ;;  %v5239_v1 = vadd.f32 %v5181_v5, %v4983_v10  ;;  %v5185_v25 = vmul.f32 0.6931472, %v6539_v16  ;;  %v5061_v45 = vsub.f32 0.0, %v5029_v0  ;;  %v7535_v22 = vadd.f32 %v4949_v48, %v7426_v35 }
 0xbed   : > { %v6543_v26 = vpop.eup %6542  ;;  %5270 = vst [vmem:[%s7508_s26 + $0x20] sm:$0xff] %v5238_v4  ;;  %v5240_v8 = vadd.f32 %v5183_v57, %v4984_v2  ;;  %v5149_v27 = vadd.f32 1.0, %v6541_v52  ;;  %6558 = vpow2.f32 %v5108_v56  ;;  %v5110_v33 = vmul.f32 1.442695, %v5060_v24 }
 0xbee   : > { %v6545_v32 = vpop.eup %6544  ;;  %5271 = vst [vmem:[%s7508_s26 + $0x28] sm:$0xff] %v5239_v1  ;;  %v5241_v53 = vadd.f32 %v5185_v25, %v4985_v55  ;;  %v5150_v58 = vadd.f32 1.0, %v6543_v26  ;;  %v5030_v36 = vand.u32 2147483647, %v7535_v22  ;;  %v5112_v37 = vmul.f32 1.442695, %v5061_v45 }
 0xbef   : > { %v6547_v9 = vpop.eup %6546  ;;  %5272 = vst [vmem:[%s7508_s26 + $0x30] sm:$0xff] %v5240_v8  ;;  %6560 = vlog2.f32 %v5149_v27  ;;  %v5151_v10 = vadd.f32 1.0, %v6545_v32  ;;  %v7547_v42 = vadd.f32 %v4953_v23, %v7426_v35  ;;  %v4989_v47 = vmax.f32 %v7476_v59, 0.0 }
 0xbf0   : > { %v6549_v17 = vpop.eup %6548  ;;  %5273 = vst [vmem:[%s7508_s26 + $0x38] sm:$0xff] %v5241_v53  ;;  %6562 = vlog2.f32 %v5150_v58  ;;  %v5152_v34 = vadd.f32 1.0, %v6547_v9  ;;  %v4959_v20 = vpop.f32.mrb[200].mxu1  ;;  %v5062_v62 = vsub.f32 0.0, %v5030_v36  ;;  %v5031_v46 = vand.u32 2147483647, %v7544_v19 }
 0xbf1   : > { %v6551_v6 = vpop.eup %6550  ;;  %6564 = vlog2.f32 %v5151_v10  ;;  %v5153_v11 = vadd.f32 1.0, %v6549_v17  ;;  %v4961_v29 = vpop.f32.mrb[201].mxu1  ;;  %v7552_v48 = vadd.f32 %v4955_v30, %v7429_v15  ;;  %v5032_v5 = vand.u32 2147483647, %v7547_v42 }
 0xbf2   : > { %v6553_v41 = vpop.eup %6552  ;;  %v5187_v38 = vmul.f32 0.6931472, %v6551_v6  ;;  %6566 = vlog2.f32 %v5152_v34  ;;  %v4963_v44 = vpop.f32.mrb[202].mxu1  ;;  %v5114_v51 = vmul.f32 1.442695, %v5062_v62  ;;  %v5063_v18 = vsub.f32 0.0, %v5031_v46 }
 0xbf3   : > { %v6555_v40 = vpop.eup %6554  ;;  %v5189_v2 = vmul.f32 0.6931472, %v6553_v41  ;;  %6568 = vlog2.f32 %v5153_v11  ;;  %v4965_v49 = vpop.f32.mrb[203].mxu1  ;;  %v4990_v12 = vmax.f32 %v7480_v14, 0.0  ;;  %v5064_v57 = vsub.f32 0.0, %v5032_v5 }
 0xbf4   : > { %v5242_v63 = vadd.f32 %v5187_v38, %v4986_v54  ;;  %v5191_v55 = vmul.f32 0.6931472, %v6555_v40  ;;  %6570 = vpow2.f32 %v5110_v33  ;;  %v6557_v13 = vpop.eup %6556  ;;  %v5116_v4 = vmul.f32 1.442695, %v5063_v18 }
 0xbf5   : > { %v5243_v59 = vadd.f32 %v5189_v2, %v4987_v31  ;;  %6572 = vpow2.f32 %v5112_v37  ;;  %v5154_v16 = vadd.f32 1.0, %v6557_v13  ;;  %v5033_v54 = vand.u32 2147483647, %v7552_v48 }
 0xbf6   : > { %5274 = vst [vmem:[%s7508_s26 + $0x40] sm:$0xff] %v5242_v63  ;;  %v5244_v50 = vadd.f32 %v5191_v55, %v4988_v28  ;;  %6574 = vpow2.f32 %v5114_v51  ;;  %v7560_v0 = vadd.f32 %v4959_v20, %v7426_v35  ;;  %v4991_v52 = vmax.f32 %v7484_v61, 0.0 }
 0xbf7   : > { %5275 = vst [vmem:[%s7508_s26 + $0x48] sm:$0xff] %v5243_v59  ;;  %v6559_v23 = vpop.eup %6558  ;;  %v4992_v1 = vmax.f32 %v7489_v3, 0.0  ;;  %6576 = vlog2.f32 %v5154_v16  ;;  %v7566_v25 = vadd.f32 %v4961_v29, %v7429_v15  ;;  %v5118_v30 = vmul.f32 1.442695, %v5064_v57 }
 0xbf8   : > { %5276 = vst [vmem:[%s7508_s26 + $0x50] sm:$0xff] %v5244_v50  ;;  %v4969_v14 = vpop.f32.mrb[204].mxu1  ;;  %v5155_v24 = vadd.f32 1.0, %v6559_v23  ;;  %6578 = vpow2.f32 %v5116_v4  ;;  %v5065_v26 = vsub.f32 0.0, %v5033_v54  ;;  %v5034_v32 = vand.u32 2147483647, %v7560_v0 }
 0xbf9   : > { %v6561_v56 = vpop.eup %6560  ;;  %v4971_v8 = vpop.f32.mrb[205].mxu1  ;;  %v7570_v53 = vadd.f32 %v4963_v44, %v7426_v35  ;;  %v7573_v61 = vadd.f32 %v4965_v49, %v7429_v15  ;;  %v5035_v9 = vand.u32 2147483647, %v7566_v25  ;;  %v4993_v38 = vmax.f32 %v7496_v21, 0.0 }
 0xbfa   : > { %v6563_v27 = vpop.eup %6562  ;;  %v5193_v45 = vmul.f32 0.6931472, %v6561_v56  ;;  %6580 = vlog2.f32 %v5155_v24  ;;  %v5120_v58 = vmul.f32 1.442695, %v5065_v26  ;;  %v5066_v17 = vsub.f32 0.0, %v5034_v32  ;;  %v4973_v34 = vpop.f32.mrb[206].mxu1 }
 0xbfb   : > { %v6565_v3 = vpop.eup %6564  ;;  %v5195_v31 = vmul.f32 0.6931472, %v6563_v27  ;;  %6582 = vpow2.f32 %v5118_v30  ;;  %v5067_v11 = vsub.f32 0.0, %v5035_v9  ;;  %v4975_v37 = vpop.f32.mrb[207].mxu1  ;;  %v4994_v2 = vmax.f32 %v7501_v7, 0.0 }
 0xbfc   : > { %v6567_v28 = vpop.eup %6566  ;;  %v5245_v10 = vadd.f32 %v5193_v45, %v4989_v47  ;;  %v5197_v33 = vmul.f32 0.6931472, %v6565_v3  ;;  %6584 = vpow2.f32 %v5120_v58  ;;  %v5122_v47 = vmul.f32 1.442695, %v5066_v17 }
 0xbfd   : > { %v6569_v36 = vpop.eup %6568  ;;  %v5246_v20 = vadd.f32 %v5195_v31, %v4990_v12  ;;  %v5199_v6 = vmul.f32 0.6931472, %v6567_v28  ;;  %v5036_v49 = vand.u32 2147483647, %v7570_v53  ;;  %v5124_v13 = vmul.f32 1.442695, %v5067_v11 }
 0xbfe   : > { %v6571_v29 = vpop.eup %6570  ;;  %5277 = vst [vmem:[%s7508_s26 + $0x58] sm:$0xff] %v5245_v10  ;;  %v5247_v41 = vadd.f32 %v5197_v33, %v4991_v52  ;;  %v5201_v62 = vmul.f32 0.6931472, %v6569_v36  ;;  %6586 = vpow2.f32 %v5122_v47  ;;  %v5037_v18 = vand.u32 2147483647, %v7573_v61 }
 0xbff   : > { %v6573_v44 = vpop.eup %6572  ;;  %5278 = vst [vmem:[%s7508_s26 + $0x60] sm:$0xff] %v5246_v20  ;;  %v5248_v40 = vadd.f32 %v5199_v6, %v4992_v1  ;;  %v5156_v46 = vadd.f32 1.0, %v6571_v29  ;;  %v5068_v59 = vsub.f32 0.0, %v5036_v49  ;;  %v7586_v7 = vadd.f32 %v4969_v14, %v7426_v35 }
 0xc00   : > { %v6575_v63 = vpop.eup %6574  ;;  %5279 = vst [vmem:[%s7508_s26 + $0x68] sm:$0xff] %v5247_v41  ;;  %v5249_v55 = vadd.f32 %v5201_v62, %v4993_v38  ;;  %v5157_v51 = vadd.f32 1.0, %v6573_v44  ;;  %v7589_v50 = vadd.f32 %v4971_v8, %v7429_v15  ;;  %v7592_v12 = vadd.f32 %v4973_v34, %v7426_v35 }
 0xc01   : > { %5280 = vst [vmem:[%s7508_s26 + $0x70] sm:$0xff] %v5248_v40  ;;  %6588 = vlog2.f32 %v5156_v46  ;;  %v5158_v21 = vadd.f32 1.0, %v6575_v63  ;;  %v6577_v5 = vpop.eup %6576  ;;  %v5126_v57 = vmul.f32 1.442695, %v5068_v59  ;;  %v5069_v54 = vsub.f32 0.0, %v5037_v18 }
 0xc02   : > { %5281 = vst [vmem:[%s7508_s26 + $0x78] sm:$0xff] %v5249_v55  ;;  %6590 = vlog2.f32 %v5157_v51  ;;  %v6579_v16 = vpop.eup %6578  ;;  %v5203_v4 = vmul.f32 0.6931472, %v6577_v5  ;;  %v5038_v52 = vand.u32 2147483647, %v7586_v7  ;;  %v4995_v14 = vmax.f32 %v7515_v39, 0.0 }
 0xc03   : > { %6592 = vlog2.f32 %v5158_v21  ;;  %v5159_v23 = vadd.f32 1.0, %v6579_v16  ;;  %v5128_v24 = vmul.f32 1.442695, %v5069_v54  ;;  %v5039_v8 = vand.u32 2147483647, %v7589_v50 }
 0xc04   : > { %6594 = vpow2.f32 %v5124_v13  ;;  %v6581_v1 = vpop.eup %6580  ;;  %v5250_v56 = vadd.f32 %v5203_v4, %v4994_v2  ;;  %v5070_v35 = vsub.f32 0.0, %v5038_v52  ;;  %v5040_v32 = vand.u32 2147483647, %v7592_v12 }
 0xc05   : > { %6596 = vpow2.f32 %v5126_v57  ;;  %v6583_v30 = vpop.eup %6582  ;;  %v5205_v26 = vmul.f32 0.6931472, %v6581_v1  ;;  %v5071_v9 = vsub.f32 0.0, %v5039_v8  ;;  %v7600_v28 = vadd.f32 %v4975_v37, %v7429_v15 }
 0xc06   : > { %6598 = vlog2.f32 %v5159_v23  ;;  %v6585_v27 = vpop.eup %6584  ;;  %5282 = vst [vmem:[%s7508_s26 + $0x80] sm:$0xff] %v5250_v56  ;;  %v5160_v45 = vadd.f32 1.0, %v6583_v30  ;;  %v5130_v58 = vmul.f32 1.442695, %v5070_v35  ;;  %v5072_v39 = vsub.f32 0.0, %v5040_v32 }
 0xc07   : > { %6600 = vpow2.f32 %v5128_v24  ;;  %v5251_v3 = vadd.f32 %v5205_v26, %v4995_v14  ;;  %v5161_v31 = vadd.f32 1.0, %v6585_v27  ;;  %v5132_v33 = vmul.f32 1.442695, %v5071_v9 }
 0xc08   : > { %6602 = vlog2.f32 %v5160_v45  ;;  %v6587_v10 = vpop.eup %6586  ;;  %v5134_v36 = vmul.f32 1.442695, %v5072_v39  ;;  %v4996_v6 = vmax.f32 %v7519_v43, 0.0  ;;  %v5041_v29 = vand.u32 2147483647, %v7600_v28 }
 0xc09   : > { %5283 = vst [vmem:[%s7508_s26 + $0x88] sm:$0xff] %v5251_v3  ;;  %6604 = vlog2.f32 %v5161_v31  ;;  %v5162_v34 = vadd.f32 1.0, %v6587_v10  ;;  %v4997_v15 = vmax.f32 %v7525_v60, 0.0  ;;  %v4998_v38 = vmax.f32 %v7535_v22, 0.0 }
 0xc0a   : > { %6606 = vpow2.f32 %v5130_v58  ;;  %v5073_v40 = vsub.f32 0.0, %v5041_v29  ;;  %v4999_v22 = vmax.f32 %v7544_v19, 0.0  ;;  %v5000_v16 = vmax.f32 %v7547_v42, 0.0 }
 0xc0b   : > { %v6589_v17 = vpop.eup %6588  ;;  %6608 = vpow2.f32 %v5132_v33  ;;  %v5001_v54 = vmax.f32 %v7552_v48, 0.0  ;;  %v5002_v26 = vmax.f32 %v7560_v0, 0.0  ;;  %v5003_v45 = vmax.f32 %v7566_v25, 0.0 }
 0xc0c   : > { %v6591_v20 = vpop.eup %6590  ;;  %v5207_v11 = vmul.f32 0.6931472, %v6589_v17  ;;  %6610 = vlog2.f32 %v5162_v34  ;;  %v5136_v51 = vmul.f32 1.442695, %v5073_v40  ;;  %v5004_v31 = vmax.f32 %v7570_v53, 0.0 }
 0xc0d   : > { %v6593_v41 = vpop.eup %6592  ;;  %v5209_v37 = vmul.f32 0.6931472, %v6591_v20  ;;  %6612 = vpow2.f32 %v5134_v36  ;;  %v5005_v33 = vmax.f32 %v7573_v61, 0.0  ;;  %v5006_v53 = vmax.f32 %v7586_v7, 0.0 }
 0xc0e   : > { %v6595_v62 = vpop.eup %6594  ;;  %v5252_v47 = vadd.f32 %v5207_v11, %v4996_v6  ;;  %v5211_v44 = vmul.f32 0.6931472, %v6593_v41  ;;  %v5007_v6 = vmax.f32 %v7589_v50, 0.0 }
 0xc0f   : > { %v6597_v43 = vpop.eup %6596  ;;  %v5253_v2 = vadd.f32 %v5209_v37, %v4997_v15  ;;  %v5163_v46 = vadd.f32 1.0, %v6595_v62  ;;  %v5008_v15 = vmax.f32 %v7592_v12, 0.0 }
 0xc10   : > { %v6599_v49 = vpop.eup %6598  ;;  %5284 = vst [vmem:[%s7508_s26 + $0x90] sm:$0xff] %v5252_v47  ;;  %v5254_v63 = vadd.f32 %v5211_v44, %v4998_v38  ;;  %v5164_v55 = vadd.f32 1.0, %v6597_v43  ;;  %v5009_v47 = vmax.f32 %v7600_v28, 0.0 }
 0xc11   : > { %v6601_v60 = vpop.eup %6600  ;;  %5285 = vst [vmem:[%s7508_s26 + $0x98] sm:$0xff] %v5253_v2  ;;  %v5213_v13 = vmul.f32 0.6931472, %v6599_v49  ;;  %6614 = vlog2.f32 %v5163_v46 }
 0xc12   : > { %5286 = vst [vmem:[%s7508_s26 + $0xa0] sm:$0xff] %v5254_v63  ;;  %6616 = vlog2.f32 %v5164_v55  ;;  %v5165_v21 = vadd.f32 1.0, %v6601_v60  ;;  %v6603_v59 = vpop.eup %6602 }
 0xc13   : > { %v5255_v18 = vadd.f32 %v5213_v13, %v4999_v22  ;;  %6618 = vpow2.f32 %v5136_v51  ;;  %v6605_v5 = vpop.eup %6604  ;;  %v5215_v4 = vmul.f32 0.6931472, %v6603_v59 }
 0xc14   : > { %6620 = vlog2.f32 %v5165_v21  ;;  %v6607_v57 = vpop.eup %6606  ;;  %v5217_v19 = vmul.f32 0.6931472, %v6605_v5 }
 0xc15   : > { %5287 = vst [vmem:[%s7508_s26 + $0xa8] sm:$0xff] %v5255_v18  ;;  %v6609_v23 = vpop.eup %6608  ;;  %v5256_v52 = vadd.f32 %v5215_v4, %v5000_v16  ;;  %v5166_v1 = vadd.f32 1.0, %v6607_v57 }
 0xc16   : > { %v6611_v56 = vpop.eup %6610  ;;  %v5257_v14 = vadd.f32 %v5217_v19, %v5001_v54  ;;  %v5167_v24 = vadd.f32 1.0, %v6609_v23 }
 0xc17   : > { %v6613_v30 = vpop.eup %6612  ;;  %5288 = vst [vmem:[%s7508_s26 + $0xb0] sm:$0xff] %v5256_v52  ;;  %v5219_v42 = vmul.f32 0.6931472, %v6611_v56  ;;  %6622 = vlog2.f32 %v5166_v1 }
 0xc18   : > { %5289 = vst [vmem:[%s7508_s26 + $0xb8] sm:$0xff] %v5257_v14  ;;  %6624 = vlog2.f32 %v5167_v24  ;;  %v5168_v35 = vadd.f32 1.0, %v6613_v30 }
 0xc19   : > { %v5258_v8 = vadd.f32 %v5219_v42, %v5002_v26 }
 0xc1a   : > { %6626 = vlog2.f32 %v5168_v35 }
 0xc1b   : > { %v6615_v48 = vpop.eup %6614  ;;  %5290 = vst [vmem:[%s7508_s26 + $0xc0] sm:$0xff] %v5258_v8 }
 0xc1c   : > { %v6617_v27 = vpop.eup %6616  ;;  %v5221_v32 = vmul.f32 0.6931472, %v6615_v48 }
 0xc1d   : > { %v6619_v3 = vpop.eup %6618  ;;  %v5223_v0 = vmul.f32 0.6931472, %v6617_v27 }
 0xc1e   : > { %v6621_v58 = vpop.eup %6620  ;;  %v5259_v9 = vadd.f32 %v5221_v32, %v5003_v45  ;;  %v5169_v39 = vadd.f32 1.0, %v6619_v3 }
 0xc1f   : > { %v5260_v10 = vadd.f32 %v5223_v0, %v5004_v31  ;;  %v5225_v17 = vmul.f32 0.6931472, %v6621_v58 }
 0xc20   : > { %5291 = vst [vmem:[%s7508_s26 + $0xc8] sm:$0xff] %v5259_v9  ;;  %6628 = vlog2.f32 %v5169_v39 }
 0xc21   : > { %5292 = vst [vmem:[%s7508_s26 + $0xd0] sm:$0xff] %v5260_v10  ;;  %v5261_v34 = vadd.f32 %v5225_v17, %v5005_v33  ;;  %v6623_v25 = vpop.eup %6622 }
 0xc22   : > { %v6625_v36 = vpop.eup %6624  ;;  %v5227_v20 = vmul.f32 0.6931472, %v6623_v25 }
 0xc23   : > { %5293 = vst [vmem:[%s7508_s26 + $0xd8] sm:$0xff] %v5261_v34  ;;  %v5229_v11 = vmul.f32 0.6931472, %v6625_v36 }
 0xc24   : > { %v6627_v29 = vpop.eup %6626  ;;  %v5262_v61 = vadd.f32 %v5227_v20, %v5006_v53 }
 0xc25   : > { %v5263_v41 = vadd.f32 %v5229_v11, %v5007_v6  ;;  %v5231_v37 = vmul.f32 0.6931472, %v6627_v29 }
 0xc26   : > { %5294 = vst [vmem:[%s7508_s26 + $0xe0] sm:$0xff] %v5262_v61 }
 0xc27   : > { %5295 = vst [vmem:[%s7508_s26 + $0xe8] sm:$0xff] %v5263_v41  ;;  %v5264_v38 = vadd.f32 %v5231_v37, %v5008_v15 }
 0xc29   : > { %5296 = vst [vmem:[%s7508_s26 + $0xf0] sm:$0xff] %v5264_v38 }
 0xc2a   : > { %v6629_v62 = vpop.eup %6628 }
 0xc2b   : > { %v5233_v44 = vmul.f32 0.6931472, %v6629_v62 }
 0xc2d   : > { %v5265_v7 = vadd.f32 %v5233_v44, %v5009_v47 }
 0xc2f   : > { %5297 = vst [vmem:[%s7508_s26 + $0xf8] sm:$0xff] %v5265_v7 }
 0xc30 PF: > { %s15_s12 = sadd.s32 1, %s6700_s12  }
 0xc31   : > { %p12_p2 = scmp.ge.s32.totalorder %s15_s12, 4  }
 0xc33   :  { %14 = sbr.rel (!%p12_p2) target bundleno = 2 (0x2), region = 95 }
 0xc3a   :  { %5322 = vsyncpa [#allocation3], 1 }
 0xc3b   :  { %5324 = vsyncpa [#allocation3 + $0x1], 1 }
 0xc3c   :  { %5325 = vsyncpa [#allocation5], 1 }

</bundles_post_ra>
